<compile_context>
chip_gen: v5e
topology: v5e:2x2
jax: 0.10.0
libtpu: 0.0.40
codegen_flags: <defaults>
</compile_context>

<pallas_src>
import math

import jax
import jax.numpy as jnp
from jax.experimental import pallas as pl
from jax.experimental.pallas import tpu as pltpu

# ----------------------------- model config ---------------------------------
D_MODEL = 32
NUM_HEADS = 4
HEAD_DIM = D_MODEL // NUM_HEADS
DIM_FF = 64
NUM_LAYERS = 2
LN_EPS = 1e-5
_SCALE = 1.0 / math.sqrt(HEAD_DIM)


# ----------------------------- fused Pallas kernel ---------------------------
def _fused_decoder_kernel(tgt_ref, mem_ref, pos_ref, qpos_ref,
                          wqkv_ref, bqkv_ref, wo_ref, bo_ref,
                          ffw1_ref, ffb1_ref, ffw2_ref, ffb2_ref,
                          lng_ref, lnb_ref,
                          o_ref):
    """Whole decoder stack for one batch element; everything stays in VMEM.

    tgt_ref/qpos_ref: (1, Sq, D)        mem_ref/pos_ref: (1, Sk, D)
    wqkv_ref: (L*2*3*H, D, Dh)          bqkv_ref: (L*2*3*H, 1, Dh)
    wo_ref:   (L*2*H, Dh, D)            bo_ref:   (L*2, 1, D)
    ffw1_ref: (L, D, F)   ffb1_ref: (L, 1, F)
    ffw2_ref: (L, F, D)   ffb2_ref: (L, 1, D)
    lng_ref/lnb_ref: (L*3+1, 1, D)      (final LayerNorm is the last entry)
    """
    x = tgt_ref[0]                       # (Sq, D)
    mem = mem_ref[0]                     # (Sk, D)
    qpos = qpos_ref[0]                   # (Sq, D)
    mem_k = mem + pos_ref[0]             # hoisted once, reused by every cross-attn layer

    def layer_norm(v, idx):
        mean = jnp.mean(v, axis=-1, keepdims=True)
        var = jnp.mean((v - mean) ** 2, axis=-1, keepdims=True)
        return (v - mean) * jax.lax.rsqrt(var + LN_EPS) * lng_ref[idx] + lnb_ref[idx]

    def mha(layer, which, q_in, k_in, v_in):
        """Multi-head attention; `which` is 0 (self-attn) / 1 (cross-attn)."""
        a = layer * 2 + which
        qkv_base = a * 3 * NUM_HEADS
        out = None
        for h in range(NUM_HEADS):       # static unroll; head slices are leading-axis (free)
            wq = wqkv_ref[qkv_base + h]
            wk = wqkv_ref[qkv_base + NUM_HEADS + h]
            wv = wqkv_ref[qkv_base + 2 * NUM_HEADS + h]
            bq = bqkv_ref[qkv_base + h]
            bk = bqkv_ref[qkv_base + NUM_HEADS + h]
            bv = bqkv_ref[qkv_base + 2 * NUM_HEADS + h]

            qh = (jnp.dot(q_in, wq, preferred_element_type=jnp.float32) + bq) * _SCALE
            kh = jnp.dot(k_in, wk, preferred_element_type=jnp.float32) + bk
            vh = jnp.dot(v_in, wv, preferred_element_type=jnp.float32) + bv

            s = jnp.dot(qh, kh.T, preferred_element_type=jnp.float32)     # (Sq, Sk)
            s = s - jnp.max(s, axis=-1, keepdims=True)
            p = jnp.exp(s)
            p = p * pl.reciprocal(jnp.sum(p, axis=-1, keepdims=True), approx=True)
            oh = jnp.dot(p, vh, preferred_element_type=jnp.float32)       # (Sq, Dh)

            # concat(heads) @ Wo  ==  sum_h  oh @ Wo[h*Dh:(h+1)*Dh, :]
            contrib = jnp.dot(oh, wo_ref[a * NUM_HEADS + h],
                              preferred_element_type=jnp.float32)         # (Sq, D)
            out = contrib if out is None else out + contrib
        return out + bo_ref[a]

    for l in range(NUM_LAYERS):
        # --- self-attention: q = k = x + query_pos, v = x
        qk = x + qpos
        x = layer_norm(x + mha(l, 0, qk, qk, x), 3 * l)
        # --- cross-attention: q = x + query_pos, k = memory + pos, v = memory
        x = layer_norm(x + mha(l, 1, x + qpos, mem_k, mem), 3 * l + 1)
        # --- feed-forward
        hidden = jnp.dot(x, ffw1_ref[l], preferred_element_type=jnp.float32) + ffb1_ref[l]
        hidden = jnp.maximum(hidden, 0.0)
        ff = jnp.dot(hidden, ffw2_ref[l], preferred_element_type=jnp.float32) + ffb2_ref[l]
        x = layer_norm(x + ff, 3 * l + 2)

    x = layer_norm(x, 3 * NUM_LAYERS)    # final decoder norm (no zeros residual)
    o_ref[0] = x.astype(o_ref.dtype)


# ----------------------------- wrapper ---------------------------------------
def _act_spec(S):
    return pl.BlockSpec((1, S, D_MODEL), lambda b: (b, 0, 0))


def _resident_spec(arr):
    n = arr.ndim
    return pl.BlockSpec(arr.shape, lambda b: (0,) * n)


@jax.jit
def transformer_decoder_forward(params, tgt, memory, pos, query_pos):
    """return_intermediate=False path of TransformerDecoder.forward.

    Returns (1, B, Sq, D) -- mirrors output.unsqueeze(0).
    """
    B, SQ, _ = tgt.shape
    SK = memory.shape[1]
    weights = (params["attn_wqkv"], params["attn_bqkv"],
               params["attn_wo"], params["attn_bo"],
               params["ffn_w1"], params["ffn_b1"],
               params["ffn_w2"], params["ffn_b2"],
               params["ln_g"], params["ln_b"])
    out = pl.pallas_call(
        _fused_decoder_kernel,
        out_shape=jax.ShapeDtypeStruct((B, SQ, D_MODEL), tgt.dtype),
        grid=(B,),
        in_specs=[_act_spec(SQ), _act_spec(SK), _act_spec(SK), _act_spec(SQ)]
                 + [_resident_spec(w) for w in weights],
        out_specs=_act_spec(SQ),
        compiler_params=pltpu.CompilerParams(dimension_semantics=("parallel",)),
    )(tgt, memory, pos, query_pos, *weights)
    # TODO(synk): return_intermediate=True (stacked per-layer outputs) and the optional
    # attention / key-padding masks (None in the reference path) are not wired up.
    return out[None]


# ----------------------------- parameter init --------------------------------
def init_decoder_params(key, num_layers=NUM_LAYERS):
    """Weights stacked across layers / attn-type / head for the fused kernel."""
    n_attn = num_layers * 2
    k_qkv, k_o, k_f1, k_f2 = jax.random.split(key, 4)
    std = 0.02
    return {
        # [layer, self|cross, q|k|v, head] flattened on the leading axis, head-major slabs.
        "attn_wqkv": jax.random.normal(
            k_qkv, (n_attn * 3 * NUM_HEADS, D_MODEL, HEAD_DIM), jnp.float32) * std,
        "attn_bqkv": jnp.zeros((n_attn * 3 * NUM_HEADS, 1, HEAD_DIM), jnp.float32),
        "attn_wo": jax.random.normal(
            k_o, (n_attn * NUM_HEADS, HEAD_DIM, D_MODEL), jnp.float32) * std,
        "attn_bo": jnp.zeros((n_attn, 1, D_MODEL), jnp.float32),
        "ffn_w1": jax.random.normal(k_f1, (num_layers, D_MODEL, DIM_FF), jnp.float32) * std,
        "ffn_b1": jnp.zeros((num_layers, 1, DIM_FF), jnp.float32),
        "ffn_w2": jax.random.normal(k_f2, (num_layers, DIM_FF, D_MODEL), jnp.float32) * std,
        "ffn_b2": jnp.zeros((num_layers, 1, D_MODEL), jnp.float32),
        # ln1/ln2/ln3 per layer + final decoder norm as the last entry.
        "ln_g": jnp.ones((num_layers * 3 + 1, 1, D_MODEL), jnp.float32),
        "ln_b": jnp.zeros((num_layers * 3 + 1, 1, D_MODEL), jnp.float32),
    }


# ----------------------------- main -------------------------------------------
if __name__ == "__main__":
    key = jax.random.PRNGKey(0)
    k_tgt, k_mem, k_pos, k_qpos, k_params = jax.random.split(key, 5)

    B = 2            # batch
    SQ = 8           # number of object queries (tgt sequence length)
    SK = 16          # memory sequence length (flattened encoder features)

    tgt = jax.random.normal(k_tgt, (B, SQ, D_MODEL), jnp.float32)
    memory = jax.random.normal(k_mem, (B, SK, D_MODEL), jnp.float32)
    pos = jax.random.normal(k_pos, (B, SK, D_MODEL), jnp.float32)
    query_pos = jax.random.normal(k_qpos, (B, SQ, D_MODEL), jnp.float32)

    params = init_decoder_params(k_params, NUM_LAYERS)

    out = transformer_decoder_forward(params, tgt, memory, pos, query_pos)
    jax.block_until_ready(out)
    assert out.shape == (1, B, SQ, D_MODEL), out.shape
    print("KERNEL_OK")
</pallas_src>

<mosaic_0001>
module attributes {stable_mosaic.version = 11 : i64} {
  func.func @_fused_decoder_kernel(%arg0: i32, %arg1: memref<1x8x32xf32, #tpu.memory_space<vmem>>, %arg2: memref<1x16x32xf32, #tpu.memory_space<vmem>>, %arg3: memref<1x16x32xf32, #tpu.memory_space<vmem>>, %arg4: memref<1x8x32xf32, #tpu.memory_space<vmem>>, %arg5: memref<48x32x8xf32, #tpu.memory_space<vmem>>, %arg6: memref<48x1x8xf32, #tpu.memory_space<vmem>>, %arg7: memref<16x8x32xf32, #tpu.memory_space<vmem>>, %arg8: memref<4x1x32xf32, #tpu.memory_space<vmem>>, %arg9: memref<2x32x64xf32, #tpu.memory_space<vmem>>, %arg10: memref<2x1x64xf32, #tpu.memory_space<vmem>>, %arg11: memref<2x64x32xf32, #tpu.memory_space<vmem>>, %arg12: memref<2x1x32xf32, #tpu.memory_space<vmem>>, %arg13: memref<7x1x32xf32, #tpu.memory_space<vmem>>, %arg14: memref<7x1x32xf32, #tpu.memory_space<vmem>>, %arg15: memref<1x8x32xf32, #tpu.memory_space<vmem>>) attributes {dimension_semantics = [#tpu.dimension_semantics<parallel>], iteration_bounds = array<i64: 2>, scalar_prefetch = 0 : i64, scratch_operands = 0 : i64, tpu.core_type = #tpu.core_type<tc>, window_params = [{transform_indices = @transform_0, window_bounds = array<i64: 1, 8, 32>}, {transform_indices = @transform_1, window_bounds = array<i64: 1, 16, 32>}, {transform_indices = @transform_2, window_bounds = array<i64: 1, 16, 32>}, {transform_indices = @transform_3, window_bounds = array<i64: 1, 8, 32>}, {pipeline_mode = #tpu.pipeline_mode<synchronous>, transform_indices = @transform_4, window_bounds = array<i64: 48, 32, 8>}, {pipeline_mode = #tpu.pipeline_mode<synchronous>, transform_indices = @transform_5, window_bounds = array<i64: 48, 1, 8>}, {pipeline_mode = #tpu.pipeline_mode<synchronous>, transform_indices = @transform_6, window_bounds = array<i64: 16, 8, 32>}, {pipeline_mode = #tpu.pipeline_mode<synchronous>, transform_indices = @transform_7, window_bounds = array<i64: 4, 1, 32>}, {pipeline_mode = #tpu.pipeline_mode<synchronous>, transform_indices = @transform_8, window_bounds = array<i64: 2, 32, 64>}, {pipeline_mode = #tpu.pipeline_mode<synchronous>, transform_indices = @transform_9, window_bounds = array<i64: 2, 1, 64>}, {pipeline_mode = #tpu.pipeline_mode<synchronous>, transform_indices = @transform_10, window_bounds = array<i64: 2, 64, 32>}, {pipeline_mode = #tpu.pipeline_mode<synchronous>, transform_indices = @transform_11, window_bounds = array<i64: 2, 1, 32>}, {pipeline_mode = #tpu.pipeline_mode<synchronous>, transform_indices = @transform_12, window_bounds = array<i64: 7, 1, 32>}, {pipeline_mode = #tpu.pipeline_mode<synchronous>, transform_indices = @transform_13, window_bounds = array<i64: 7, 1, 32>}, {transform_indices = @transform_14, window_bounds = array<i64: 1, 8, 32>}]} {
    %c0 = arith.constant 0 : index
    %c0_0 = arith.constant 0 : index
    %c0_1 = arith.constant 0 : index
    %0 = vector.load %arg1[%c0, %c0_0, %c0_1] : memref<1x8x32xf32, #tpu.memory_space<vmem>>, vector<1x8x32xf32>
    %1 = vector.shape_cast %0 : vector<1x8x32xf32> to vector<8x32xf32>
    %c0_2 = arith.constant 0 : index
    %c0_3 = arith.constant 0 : index
    %c0_4 = arith.constant 0 : index
    %2 = vector.load %arg2[%c0_2, %c0_3, %c0_4] : memref<1x16x32xf32, #tpu.memory_space<vmem>>, vector<1x16x32xf32>
    %3 = vector.shape_cast %2 : vector<1x16x32xf32> to vector<16x32xf32>
    %c0_5 = arith.constant 0 : index
    %c0_6 = arith.constant 0 : index
    %c0_7 = arith.constant 0 : index
    %4 = vector.load %arg4[%c0_5, %c0_6, %c0_7] : memref<1x8x32xf32, #tpu.memory_space<vmem>>, vector<1x8x32xf32>
    %5 = vector.shape_cast %4 : vector<1x8x32xf32> to vector<8x32xf32>
    %c0_8 = arith.constant 0 : index
    %c0_9 = arith.constant 0 : index
    %c0_10 = arith.constant 0 : index
    %6 = vector.load %arg3[%c0_8, %c0_9, %c0_10] : memref<1x16x32xf32, #tpu.memory_space<vmem>>, vector<1x16x32xf32>
    %7 = vector.shape_cast %6 : vector<1x16x32xf32> to vector<16x32xf32>
    %8 = arith.addf %3, %7 : vector<16x32xf32>
    %9 = arith.addf %1, %5 : vector<8x32xf32>
    %c0_11 = arith.constant 0 : index
    %c0_12 = arith.constant 0 : index
    %c0_13 = arith.constant 0 : index
    %10 = vector.load %arg5[%c0_11, %c0_12, %c0_13] : memref<48x32x8xf32, #tpu.memory_space<vmem>>, vector<1x32x8xf32>
    %11 = vector.shape_cast %10 : vector<1x32x8xf32> to vector<32x8xf32>
    %c4 = arith.constant 4 : index
    %c0_14 = arith.constant 0 : index
    %c0_15 = arith.constant 0 : index
    %12 = vector.load %arg5[%c4, %c0_14, %c0_15] : memref<48x32x8xf32, #tpu.memory_space<vmem>>, vector<1x32x8xf32>
    %13 = vector.shape_cast %12 : vector<1x32x8xf32> to vector<32x8xf32>
    %c8 = arith.constant 8 : index
    %c0_16 = arith.constant 0 : index
    %c0_17 = arith.constant 0 : index
    %14 = vector.load %arg5[%c8, %c0_16, %c0_17] : memref<48x32x8xf32, #tpu.memory_space<vmem>>, vector<1x32x8xf32>
    %15 = vector.shape_cast %14 : vector<1x32x8xf32> to vector<32x8xf32>
    %c0_18 = arith.constant 0 : index
    %c0_19 = arith.constant 0 : index
    %c0_20 = arith.constant 0 : index
    %16 = vector.load %arg6[%c0_18, %c0_19, %c0_20] : memref<48x1x8xf32, #tpu.memory_space<vmem>>, vector<1x1x8xf32>
    %17 = vector.shape_cast %16 : vector<1x1x8xf32> to vector<1x8xf32>
    %c4_21 = arith.constant 4 : index
    %c0_22 = arith.constant 0 : index
    %c0_23 = arith.constant 0 : index
    %18 = vector.load %arg6[%c4_21, %c0_22, %c0_23] : memref<48x1x8xf32, #tpu.memory_space<vmem>>, vector<1x1x8xf32>
    %19 = vector.shape_cast %18 : vector<1x1x8xf32> to vector<1x8xf32>
    %c8_24 = arith.constant 8 : index
    %c0_25 = arith.constant 0 : index
    %c0_26 = arith.constant 0 : index
    %20 = vector.load %arg6[%c8_24, %c0_25, %c0_26] : memref<48x1x8xf32, #tpu.memory_space<vmem>>, vector<1x1x8xf32>
    %21 = vector.shape_cast %20 : vector<1x1x8xf32> to vector<1x8xf32>
    %cst = arith.constant dense<0.000000e+00> : vector<8x8xf32>
    %22 = tpu.matmul %9, %11, %cst {dimension_numbers = #tpu.dot_dimension_numbers<[1], [0], [0], [1], [0, 0, 1, 1], [], []>} : vector<8x32xf32>, vector<32x8xf32>, vector<8x8xf32> -> vector<8x8xf32>
    %23 = vector.broadcast %17 : vector<1x8xf32> to vector<8x8xf32>
    %24 = arith.addf %22, %23 : vector<8x8xf32>
    %cst_27 = arith.constant 0.353553385 : f32
    %25 = vector.broadcast %cst_27 : f32 to vector<8x8xf32>
    %26 = arith.mulf %24, %25 : vector<8x8xf32>
    %cst_28 = arith.constant dense<0.000000e+00> : vector<8x8xf32>
    %27 = tpu.matmul %9, %13, %cst_28 {dimension_numbers = #tpu.dot_dimension_numbers<[1], [0], [0], [1], [0, 0, 1, 1], [], []>} : vector<8x32xf32>, vector<32x8xf32>, vector<8x8xf32> -> vector<8x8xf32>
    %28 = vector.broadcast %19 : vector<1x8xf32> to vector<8x8xf32>
    %29 = arith.addf %27, %28 : vector<8x8xf32>
    %cst_29 = arith.constant dense<0.000000e+00> : vector<8x8xf32>
    %30 = tpu.matmul %1, %15, %cst_29 {dimension_numbers = #tpu.dot_dimension_numbers<[1], [0], [0], [1], [0, 0, 1, 1], [], []>} : vector<8x32xf32>, vector<32x8xf32>, vector<8x8xf32> -> vector<8x8xf32>
    %31 = vector.broadcast %21 : vector<1x8xf32> to vector<8x8xf32>
    %32 = arith.addf %30, %31 : vector<8x8xf32>
    %33 = tpu.transpose %29, [1, 0] : vector<8x8xf32> -> vector<8x8xf32>
    %cst_30 = arith.constant dense<0.000000e+00> : vector<8x8xf32>
    %34 = tpu.matmul %26, %33, %cst_30 {dimension_numbers = #tpu.dot_dimension_numbers<[1], [0], [0], [1], [0, 0, 1, 1], [], []>} : vector<8x8xf32>, vector<8x8xf32>, vector<8x8xf32> -> vector<8x8xf32>
    %cst_31 = arith.constant dense<0xFF800000> : vector<8xf32>
    %35 = vector.multi_reduction <maximumf>, %34, %cst_31 [1] : vector<8x8xf32> to vector<8xf32>
    %36 = vector.shape_cast %35 : vector<8xf32> to vector<8x1xf32>
    %37 = vector.broadcast %36 : vector<8x1xf32> to vector<8x8xf32>
    %38 = arith.subf %34, %37 : vector<8x8xf32>
    %39 = math.exp %38 : vector<8x8xf32>
    %cst_32 = arith.constant dense<0.000000e+00> : vector<8xf32>
    %40 = vector.multi_reduction <add>, %39, %cst_32 [1] : vector<8x8xf32> to vector<8xf32>
    %41 = vector.shape_cast %40 : vector<8xf32> to vector<8x1xf32>
    %42 = tpu.reciprocal %41 {approx = true} : vector<8x1xf32> -> vector<8x1xf32>
    %43 = vector.broadcast %42 : vector<8x1xf32> to vector<8x8xf32>
    %44 = arith.mulf %39, %43 : vector<8x8xf32>
    %cst_33 = arith.constant dense<0.000000e+00> : vector<8x8xf32>
    %45 = tpu.matmul %44, %32, %cst_33 {dimension_numbers = #tpu.dot_dimension_numbers<[1], [0], [0], [1], [0, 0, 1, 1], [], []>} : vector<8x8xf32>, vector<8x8xf32>, vector<8x8xf32> -> vector<8x8xf32>
    %c0_34 = arith.constant 0 : index
    %c0_35 = arith.constant 0 : index
    %c0_36 = arith.constant 0 : index
    %46 = vector.load %arg7[%c0_34, %c0_35, %c0_36] : memref<16x8x32xf32, #tpu.memory_space<vmem>>, vector<1x8x32xf32>
    %47 = vector.shape_cast %46 : vector<1x8x32xf32> to vector<8x32xf32>
    %cst_37 = arith.constant dense<0.000000e+00> : vector<8x32xf32>
    %48 = tpu.matmul %45, %47, %cst_37 {dimension_numbers = #tpu.dot_dimension_numbers<[1], [0], [0], [1], [0, 0, 1, 1], [], []>} : vector<8x8xf32>, vector<8x32xf32>, vector<8x32xf32> -> vector<8x32xf32>
    %c1 = arith.constant 1 : index
    %c0_38 = arith.constant 0 : index
    %c0_39 = arith.constant 0 : index
    %49 = vector.load %arg5[%c1, %c0_38, %c0_39] : memref<48x32x8xf32, #tpu.memory_space<vmem>>, vector<1x32x8xf32>
    %50 = vector.shape_cast %49 : vector<1x32x8xf32> to vector<32x8xf32>
    %c5 = arith.constant 5 : index
    %c0_40 = arith.constant 0 : index
    %c0_41 = arith.constant 0 : index
    %51 = vector.load %arg5[%c5, %c0_40, %c0_41] : memref<48x32x8xf32, #tpu.memory_space<vmem>>, vector<1x32x8xf32>
    %52 = vector.shape_cast %51 : vector<1x32x8xf32> to vector<32x8xf32>
    %c9 = arith.constant 9 : index
    %c0_42 = arith.constant 0 : index
    %c0_43 = arith.constant 0 : index
    %53 = vector.load %arg5[%c9, %c0_42, %c0_43] : memref<48x32x8xf32, #tpu.memory_space<vmem>>, vector<1x32x8xf32>
    %54 = vector.shape_cast %53 : vector<1x32x8xf32> to vector<32x8xf32>
    %c1_44 = arith.constant 1 : index
    %c0_45 = arith.constant 0 : index
    %c0_46 = arith.constant 0 : index
    %55 = vector.load %arg6[%c1_44, %c0_45, %c0_46] : memref<48x1x8xf32, #tpu.memory_space<vmem>>, vector<1x1x8xf32>
    %56 = vector.shape_cast %55 : vector<1x1x8xf32> to vector<1x8xf32>
    %c5_47 = arith.constant 5 : index
    %c0_48 = arith.constant 0 : index
    %c0_49 = arith.constant 0 : index
    %57 = vector.load %arg6[%c5_47, %c0_48, %c0_49] : memref<48x1x8xf32, #tpu.memory_space<vmem>>, vector<1x1x8xf32>
    %58 = vector.shape_cast %57 : vector<1x1x8xf32> to vector<1x8xf32>
    %c9_50 = arith.constant 9 : index
    %c0_51 = arith.constant 0 : index
    %c0_52 = arith.constant 0 : index
    %59 = vector.load %arg6[%c9_50, %c0_51, %c0_52] : memref<48x1x8xf32, #tpu.memory_space<vmem>>, vector<1x1x8xf32>
    %60 = vector.shape_cast %59 : vector<1x1x8xf32> to vector<1x8xf32>
    %cst_53 = arith.constant dense<0.000000e+00> : vector<8x8xf32>
    %61 = tpu.matmul %9, %50, %cst_53 {dimension_numbers = #tpu.dot_dimension_numbers<[1], [0], [0], [1], [0, 0, 1, 1], [], []>} : vector<8x32xf32>, vector<32x8xf32>, vector<8x8xf32> -> vector<8x8xf32>
    %62 = vector.broadcast %56 : vector<1x8xf32> to vector<8x8xf32>
    %63 = arith.addf %61, %62 : vector<8x8xf32>
    %cst_54 = arith.constant 0.353553385 : f32
    %64 = vector.broadcast %cst_54 : f32 to vector<8x8xf32>
    %65 = arith.mulf %63, %64 : vector<8x8xf32>
    %cst_55 = arith.constant dense<0.000000e+00> : vector<8x8xf32>
    %66 = tpu.matmul %9, %52, %cst_55 {dimension_numbers = #tpu.dot_dimension_numbers<[1], [0], [0], [1], [0, 0, 1, 1], [], []>} : vector<8x32xf32>, vector<32x8xf32>, vector<8x8xf32> -> vector<8x8xf32>
    %67 = vector.broadcast %58 : vector<1x8xf32> to vector<8x8xf32>
    %68 = arith.addf %66, %67 : vector<8x8xf32>
    %cst_56 = arith.constant dense<0.000000e+00> : vector<8x8xf32>
    %69 = tpu.matmul %1, %54, %cst_56 {dimension_numbers = #tpu.dot_dimension_numbers<[1], [0], [0], [1], [0, 0, 1, 1], [], []>} : vector<8x32xf32>, vector<32x8xf32>, vector<8x8xf32> -> vector<8x8xf32>
    %70 = vector.broadcast %60 : vector<1x8xf32> to vector<8x8xf32>
    %71 = arith.addf %69, %70 : vector<8x8xf32>
    %72 = tpu.transpose %68, [1, 0] : vector<8x8xf32> -> vector<8x8xf32>
    %cst_57 = arith.constant dense<0.000000e+00> : vector<8x8xf32>
    %73 = tpu.matmul %65, %72, %cst_57 {dimension_numbers = #tpu.dot_dimension_numbers<[1], [0], [0], [1], [0, 0, 1, 1], [], []>} : vector<8x8xf32>, vector<8x8xf32>, vector<8x8xf32> -> vector<8x8xf32>
    %cst_58 = arith.constant dense<0xFF800000> : vector<8xf32>
    %74 = vector.multi_reduction <maximumf>, %73, %cst_58 [1] : vector<8x8xf32> to vector<8xf32>
    %75 = vector.shape_cast %74 : vector<8xf32> to vector<8x1xf32>
    %76 = vector.broadcast %75 : vector<8x1xf32> to vector<8x8xf32>
    %77 = arith.subf %73, %76 : vector<8x8xf32>
    %78 = math.exp %77 : vector<8x8xf32>
    %cst_59 = arith.constant dense<0.000000e+00> : vector<8xf32>
    %79 = vector.multi_reduction <add>, %78, %cst_59 [1] : vector<8x8xf32> to vector<8xf32>
    %80 = vector.shape_cast %79 : vector<8xf32> to vector<8x1xf32>
    %81 = tpu.reciprocal %80 {approx = true} : vector<8x1xf32> -> vector<8x1xf32>
    %82 = vector.broadcast %81 : vector<8x1xf32> to vector<8x8xf32>
    %83 = arith.mulf %78, %82 : vector<8x8xf32>
    %cst_60 = arith.constant dense<0.000000e+00> : vector<8x8xf32>
    %84 = tpu.matmul %83, %71, %cst_60 {dimension_numbers = #tpu.dot_dimension_numbers<[1], [0], [0], [1], [0, 0, 1, 1], [], []>} : vector<8x8xf32>, vector<8x8xf32>, vector<8x8xf32> -> vector<8x8xf32>
    %c1_61 = arith.constant 1 : index
    %c0_62 = arith.constant 0 : index
    %c0_63 = arith.constant 0 : index
    %85 = vector.load %arg7[%c1_61, %c0_62, %c0_63] : memref<16x8x32xf32, #tpu.memory_space<vmem>>, vector<1x8x32xf32>
    %86 = vector.shape_cast %85 : vector<1x8x32xf32> to vector<8x32xf32>
    %cst_64 = arith.constant dense<0.000000e+00> : vector<8x32xf32>
    %87 = tpu.matmul %84, %86, %cst_64 {dimension_numbers = #tpu.dot_dimension_numbers<[1], [0], [0], [1], [0, 0, 1, 1], [], []>} : vector<8x8xf32>, vector<8x32xf32>, vector<8x32xf32> -> vector<8x32xf32>
    %88 = arith.addf %48, %87 : vector<8x32xf32>
    %c2 = arith.constant 2 : index
    %c0_65 = arith.constant 0 : index
    %c0_66 = arith.constant 0 : index
    %89 = vector.load %arg5[%c2, %c0_65, %c0_66] : memref<48x32x8xf32, #tpu.memory_space<vmem>>, vector<1x32x8xf32>
    %90 = vector.shape_cast %89 : vector<1x32x8xf32> to vector<32x8xf32>
    %c6 = arith.constant 6 : index
    %c0_67 = arith.constant 0 : index
    %c0_68 = arith.constant 0 : index
    %91 = vector.load %arg5[%c6, %c0_67, %c0_68] : memref<48x32x8xf32, #tpu.memory_space<vmem>>, vector<1x32x8xf32>
    %92 = vector.shape_cast %91 : vector<1x32x8xf32> to vector<32x8xf32>
    %c10 = arith.constant 10 : index
    %c0_69 = arith.constant 0 : index
    %c0_70 = arith.constant 0 : index
    %93 = vector.load %arg5[%c10, %c0_69, %c0_70] : memref<48x32x8xf32, #tpu.memory_space<vmem>>, vector<1x32x8xf32>
    %94 = vector.shape_cast %93 : vector<1x32x8xf32> to vector<32x8xf32>
    %c2_71 = arith.constant 2 : index
    %c0_72 = arith.constant 0 : index
    %c0_73 = arith.constant 0 : index
    %95 = vector.load %arg6[%c2_71, %c0_72, %c0_73] : memref<48x1x8xf32, #tpu.memory_space<vmem>>, vector<1x1x8xf32>
    %96 = vector.shape_cast %95 : vector<1x1x8xf32> to vector<1x8xf32>
    %c6_74 = arith.constant 6 : index
    %c0_75 = arith.constant 0 : index
    %c0_76 = arith.constant 0 : index
    %97 = vector.load %arg6[%c6_74, %c0_75, %c0_76] : memref<48x1x8xf32, #tpu.memory_space<vmem>>, vector<1x1x8xf32>
    %98 = vector.shape_cast %97 : vector<1x1x8xf32> to vector<1x8xf32>
    %c10_77 = arith.constant 10 : index
    %c0_78 = arith.constant 0 : index
    %c0_79 = arith.constant 0 : index
    %99 = vector.load %arg6[%c10_77, %c0_78, %c0_79] : memref<48x1x8xf32, #tpu.memory_space<vmem>>, vector<1x1x8xf32>
    %100 = vector.shape_cast %99 : vector<1x1x8xf32> to vector<1x8xf32>
    %cst_80 = arith.constant dense<0.000000e+00> : vector<8x8xf32>
    %101 = tpu.matmul %9, %90, %cst_80 {dimension_numbers = #tpu.dot_dimension_numbers<[1], [0], [0], [1], [0, 0, 1, 1], [], []>} : vector<8x32xf32>, vector<32x8xf32>, vector<8x8xf32> -> vector<8x8xf32>
    %102 = vector.broadcast %96 : vector<1x8xf32> to vector<8x8xf32>
    %103 = arith.addf %101, %102 : vector<8x8xf32>
    %cst_81 = arith.constant 0.353553385 : f32
    %104 = vector.broadcast %cst_81 : f32 to vector<8x8xf32>
    %105 = arith.mulf %103, %104 : vector<8x8xf32>
    %cst_82 = arith.constant dense<0.000000e+00> : vector<8x8xf32>
    %106 = tpu.matmul %9, %92, %cst_82 {dimension_numbers = #tpu.dot_dimension_numbers<[1], [0], [0], [1], [0, 0, 1, 1], [], []>} : vector<8x32xf32>, vector<32x8xf32>, vector<8x8xf32> -> vector<8x8xf32>
    %107 = vector.broadcast %98 : vector<1x8xf32> to vector<8x8xf32>
    %108 = arith.addf %106, %107 : vector<8x8xf32>
    %cst_83 = arith.constant dense<0.000000e+00> : vector<8x8xf32>
    %109 = tpu.matmul %1, %94, %cst_83 {dimension_numbers = #tpu.dot_dimension_numbers<[1], [0], [0], [1], [0, 0, 1, 1], [], []>} : vector<8x32xf32>, vector<32x8xf32>, vector<8x8xf32> -> vector<8x8xf32>
    %110 = vector.broadcast %100 : vector<1x8xf32> to vector<8x8xf32>
    %111 = arith.addf %109, %110 : vector<8x8xf32>
    %112 = tpu.transpose %108, [1, 0] : vector<8x8xf32> -> vector<8x8xf32>
    %cst_84 = arith.constant dense<0.000000e+00> : vector<8x8xf32>
    %113 = tpu.matmul %105, %112, %cst_84 {dimension_numbers = #tpu.dot_dimension_numbers<[1], [0], [0], [1], [0, 0, 1, 1], [], []>} : vector<8x8xf32>, vector<8x8xf32>, vector<8x8xf32> -> vector<8x8xf32>
    %cst_85 = arith.constant dense<0xFF800000> : vector<8xf32>
    %114 = vector.multi_reduction <maximumf>, %113, %cst_85 [1] : vector<8x8xf32> to vector<8xf32>
    %115 = vector.shape_cast %114 : vector<8xf32> to vector<8x1xf32>
    %116 = vector.broadcast %115 : vector<8x1xf32> to vector<8x8xf32>
    %117 = arith.subf %113, %116 : vector<8x8xf32>
    %118 = math.exp %117 : vector<8x8xf32>
    %cst_86 = arith.constant dense<0.000000e+00> : vector<8xf32>
    %119 = vector.multi_reduction <add>, %118, %cst_86 [1] : vector<8x8xf32> to vector<8xf32>
    %120 = vector.shape_cast %119 : vector<8xf32> to vector<8x1xf32>
    %121 = tpu.reciprocal %120 {approx = true} : vector<8x1xf32> -> vector<8x1xf32>
    %122 = vector.broadcast %121 : vector<8x1xf32> to vector<8x8xf32>
    %123 = arith.mulf %118, %122 : vector<8x8xf32>
    %cst_87 = arith.constant dense<0.000000e+00> : vector<8x8xf32>
    %124 = tpu.matmul %123, %111, %cst_87 {dimension_numbers = #tpu.dot_dimension_numbers<[1], [0], [0], [1], [0, 0, 1, 1], [], []>} : vector<8x8xf32>, vector<8x8xf32>, vector<8x8xf32> -> vector<8x8xf32>
    %c2_88 = arith.constant 2 : index
    %c0_89 = arith.constant 0 : index
    %c0_90 = arith.constant 0 : index
    %125 = vector.load %arg7[%c2_88, %c0_89, %c0_90] : memref<16x8x32xf32, #tpu.memory_space<vmem>>, vector<1x8x32xf32>
    %126 = vector.shape_cast %125 : vector<1x8x32xf32> to vector<8x32xf32>
    %cst_91 = arith.constant dense<0.000000e+00> : vector<8x32xf32>
    %127 = tpu.matmul %124, %126, %cst_91 {dimension_numbers = #tpu.dot_dimension_numbers<[1], [0], [0], [1], [0, 0, 1, 1], [], []>} : vector<8x8xf32>, vector<8x32xf32>, vector<8x32xf32> -> vector<8x32xf32>
    %128 = arith.addf %88, %127 : vector<8x32xf32>
    %c3 = arith.constant 3 : index
    %c0_92 = arith.constant 0 : index
    %c0_93 = arith.constant 0 : index
    %129 = vector.load %arg5[%c3, %c0_92, %c0_93] : memref<48x32x8xf32, #tpu.memory_space<vmem>>, vector<1x32x8xf32>
    %130 = vector.shape_cast %129 : vector<1x32x8xf32> to vector<32x8xf32>
    %c7 = arith.constant 7 : index
    %c0_94 = arith.constant 0 : index
    %c0_95 = arith.constant 0 : index
    %131 = vector.load %arg5[%c7, %c0_94, %c0_95] : memref<48x32x8xf32, #tpu.memory_space<vmem>>, vector<1x32x8xf32>
    %132 = vector.shape_cast %131 : vector<1x32x8xf32> to vector<32x8xf32>
    %c11 = arith.constant 11 : index
    %c0_96 = arith.constant 0 : index
    %c0_97 = arith.constant 0 : index
    %133 = vector.load %arg5[%c11, %c0_96, %c0_97] : memref<48x32x8xf32, #tpu.memory_space<vmem>>, vector<1x32x8xf32>
    %134 = vector.shape_cast %133 : vector<1x32x8xf32> to vector<32x8xf32>
    %c3_98 = arith.constant 3 : index
    %c0_99 = arith.constant 0 : index
    %c0_100 = arith.constant 0 : index
    %135 = vector.load %arg6[%c3_98, %c0_99, %c0_100] : memref<48x1x8xf32, #tpu.memory_space<vmem>>, vector<1x1x8xf32>
    %136 = vector.shape_cast %135 : vector<1x1x8xf32> to vector<1x8xf32>
    %c7_101 = arith.constant 7 : index
    %c0_102 = arith.constant 0 : index
    %c0_103 = arith.constant 0 : index
    %137 = vector.load %arg6[%c7_101, %c0_102, %c0_103] : memref<48x1x8xf32, #tpu.memory_space<vmem>>, vector<1x1x8xf32>
    %138 = vector.shape_cast %137 : vector<1x1x8xf32> to vector<1x8xf32>
    %c11_104 = arith.constant 11 : index
    %c0_105 = arith.constant 0 : index
    %c0_106 = arith.constant 0 : index
    %139 = vector.load %arg6[%c11_104, %c0_105, %c0_106] : memref<48x1x8xf32, #tpu.memory_space<vmem>>, vector<1x1x8xf32>
    %140 = vector.shape_cast %139 : vector<1x1x8xf32> to vector<1x8xf32>
    %cst_107 = arith.constant dense<0.000000e+00> : vector<8x8xf32>
    %141 = tpu.matmul %9, %130, %cst_107 {dimension_numbers = #tpu.dot_dimension_numbers<[1], [0], [0], [1], [0, 0, 1, 1], [], []>} : vector<8x32xf32>, vector<32x8xf32>, vector<8x8xf32> -> vector<8x8xf32>
    %142 = vector.broadcast %136 : vector<1x8xf32> to vector<8x8xf32>
    %143 = arith.addf %141, %142 : vector<8x8xf32>
    %cst_108 = arith.constant 0.353553385 : f32
    %144 = vector.broadcast %cst_108 : f32 to vector<8x8xf32>
    %145 = arith.mulf %143, %144 : vector<8x8xf32>
    %cst_109 = arith.constant dense<0.000000e+00> : vector<8x8xf32>
    %146 = tpu.matmul %9, %132, %cst_109 {dimension_numbers = #tpu.dot_dimension_numbers<[1], [0], [0], [1], [0, 0, 1, 1], [], []>} : vector<8x32xf32>, vector<32x8xf32>, vector<8x8xf32> -> vector<8x8xf32>
    %147 = vector.broadcast %138 : vector<1x8xf32> to vector<8x8xf32>
    %148 = arith.addf %146, %147 : vector<8x8xf32>
    %cst_110 = arith.constant dense<0.000000e+00> : vector<8x8xf32>
    %149 = tpu.matmul %1, %134, %cst_110 {dimension_numbers = #tpu.dot_dimension_numbers<[1], [0], [0], [1], [0, 0, 1, 1], [], []>} : vector<8x32xf32>, vector<32x8xf32>, vector<8x8xf32> -> vector<8x8xf32>
    %150 = vector.broadcast %140 : vector<1x8xf32> to vector<8x8xf32>
    %151 = arith.addf %149, %150 : vector<8x8xf32>
    %152 = tpu.transpose %148, [1, 0] : vector<8x8xf32> -> vector<8x8xf32>
    %cst_111 = arith.constant dense<0.000000e+00> : vector<8x8xf32>
    %153 = tpu.matmul %145, %152, %cst_111 {dimension_numbers = #tpu.dot_dimension_numbers<[1], [0], [0], [1], [0, 0, 1, 1], [], []>} : vector<8x8xf32>, vector<8x8xf32>, vector<8x8xf32> -> vector<8x8xf32>
    %cst_112 = arith.constant dense<0xFF800000> : vector<8xf32>
    %154 = vector.multi_reduction <maximumf>, %153, %cst_112 [1] : vector<8x8xf32> to vector<8xf32>
    %155 = vector.shape_cast %154 : vector<8xf32> to vector<8x1xf32>
    %156 = vector.broadcast %155 : vector<8x1xf32> to vector<8x8xf32>
    %157 = arith.subf %153, %156 : vector<8x8xf32>
    %158 = math.exp %157 : vector<8x8xf32>
    %cst_113 = arith.constant dense<0.000000e+00> : vector<8xf32>
    %159 = vector.multi_reduction <add>, %158, %cst_113 [1] : vector<8x8xf32> to vector<8xf32>
    %160 = vector.shape_cast %159 : vector<8xf32> to vector<8x1xf32>
    %161 = tpu.reciprocal %160 {approx = true} : vector<8x1xf32> -> vector<8x1xf32>
    %162 = vector.broadcast %161 : vector<8x1xf32> to vector<8x8xf32>
    %163 = arith.mulf %158, %162 : vector<8x8xf32>
    %cst_114 = arith.constant dense<0.000000e+00> : vector<8x8xf32>
    %164 = tpu.matmul %163, %151, %cst_114 {dimension_numbers = #tpu.dot_dimension_numbers<[1], [0], [0], [1], [0, 0, 1, 1], [], []>} : vector<8x8xf32>, vector<8x8xf32>, vector<8x8xf32> -> vector<8x8xf32>
    %c3_115 = arith.constant 3 : index
    %c0_116 = arith.constant 0 : index
    %c0_117 = arith.constant 0 : index
    %165 = vector.load %arg7[%c3_115, %c0_116, %c0_117] : memref<16x8x32xf32, #tpu.memory_space<vmem>>, vector<1x8x32xf32>
    %166 = vector.shape_cast %165 : vector<1x8x32xf32> to vector<8x32xf32>
    %cst_118 = arith.constant dense<0.000000e+00> : vector<8x32xf32>
    %167 = tpu.matmul %164, %166, %cst_118 {dimension_numbers = #tpu.dot_dimension_numbers<[1], [0], [0], [1], [0, 0, 1, 1], [], []>} : vector<8x8xf32>, vector<8x32xf32>, vector<8x32xf32> -> vector<8x32xf32>
    %168 = arith.addf %128, %167 : vector<8x32xf32>
    %c0_119 = arith.constant 0 : index
    %c0_120 = arith.constant 0 : index
    %c0_121 = arith.constant 0 : index
    %169 = vector.load %arg8[%c0_119, %c0_120, %c0_121] : memref<4x1x32xf32, #tpu.memory_space<vmem>>, vector<1x1x32xf32>
    %170 = vector.shape_cast %169 : vector<1x1x32xf32> to vector<1x32xf32>
    %171 = vector.broadcast %170 : vector<1x32xf32> to vector<8x32xf32>
    %172 = arith.addf %168, %171 : vector<8x32xf32>
    %173 = arith.addf %1, %172 : vector<8x32xf32>
    %cst_122 = arith.constant dense<0.000000e+00> : vector<8xf32>
    %174 = vector.multi_reduction <add>, %173, %cst_122 [1] : vector<8x32xf32> to vector<8xf32>
    %175 = vector.shape_cast %174 : vector<8xf32> to vector<8x1xf32>
    %cst_123 = arith.constant 3.200000e+01 : f32
    %176 = vector.broadcast %cst_123 : f32 to vector<8x1xf32>
    %177 = arith.divf %175, %176 : vector<8x1xf32>
    %178 = vector.broadcast %177 : vector<8x1xf32> to vector<8x32xf32>
    %179 = arith.subf %173, %178 : vector<8x32xf32>
    %180 = arith.mulf %179, %179 : vector<8x32xf32>
    %cst_124 = arith.constant dense<0.000000e+00> : vector<8xf32>
    %181 = vector.multi_reduction <add>, %180, %cst_124 [1] : vector<8x32xf32> to vector<8xf32>
    %182 = vector.shape_cast %181 : vector<8xf32> to vector<8x1xf32>
    %cst_125 = arith.constant 3.200000e+01 : f32
    %183 = vector.broadcast %cst_125 : f32 to vector<8x1xf32>
    %184 = arith.divf %182, %183 : vector<8x1xf32>
    %185 = vector.broadcast %177 : vector<8x1xf32> to vector<8x32xf32>
    %186 = arith.subf %173, %185 : vector<8x32xf32>
    %cst_126 = arith.constant 9.99999974E-6 : f32
    %187 = vector.broadcast %cst_126 : f32 to vector<8x1xf32>
    %188 = arith.addf %184, %187 : vector<8x1xf32>
    %189 = math.rsqrt %188 : vector<8x1xf32>
    %190 = vector.broadcast %189 : vector<8x1xf32> to vector<8x32xf32>
    %191 = arith.mulf %186, %190 : vector<8x32xf32>
    %c0_127 = arith.constant 0 : index
    %c0_128 = arith.constant 0 : index
    %c0_129 = arith.constant 0 : index
    %192 = vector.load %arg13[%c0_127, %c0_128, %c0_129] : memref<7x1x32xf32, #tpu.memory_space<vmem>>, vector<1x1x32xf32>
    %193 = vector.shape_cast %192 : vector<1x1x32xf32> to vector<1x32xf32>
    %194 = vector.broadcast %193 : vector<1x32xf32> to vector<8x32xf32>
    %195 = arith.mulf %191, %194 : vector<8x32xf32>
    %c0_130 = arith.constant 0 : index
    %c0_131 = arith.constant 0 : index
    %c0_132 = arith.constant 0 : index
    %196 = vector.load %arg14[%c0_130, %c0_131, %c0_132] : memref<7x1x32xf32, #tpu.memory_space<vmem>>, vector<1x1x32xf32>
    %197 = vector.shape_cast %196 : vector<1x1x32xf32> to vector<1x32xf32>
    %198 = vector.broadcast %197 : vector<1x32xf32> to vector<8x32xf32>
    %199 = arith.addf %195, %198 : vector<8x32xf32>
    %200 = arith.addf %199, %5 : vector<8x32xf32>
    %c12 = arith.constant 12 : index
    %c0_133 = arith.constant 0 : index
    %c0_134 = arith.constant 0 : index
    %201 = vector.load %arg5[%c12, %c0_133, %c0_134] : memref<48x32x8xf32, #tpu.memory_space<vmem>>, vector<1x32x8xf32>
    %202 = vector.shape_cast %201 : vector<1x32x8xf32> to vector<32x8xf32>
    %c16 = arith.constant 16 : index
    %c0_135 = arith.constant 0 : index
    %c0_136 = arith.constant 0 : index
    %203 = vector.load %arg5[%c16, %c0_135, %c0_136] : memref<48x32x8xf32, #tpu.memory_space<vmem>>, vector<1x32x8xf32>
    %204 = vector.shape_cast %203 : vector<1x32x8xf32> to vector<32x8xf32>
    %c20 = arith.constant 20 : index
    %c0_137 = arith.constant 0 : index
    %c0_138 = arith.constant 0 : index
    %205 = vector.load %arg5[%c20, %c0_137, %c0_138] : memref<48x32x8xf32, #tpu.memory_space<vmem>>, vector<1x32x8xf32>
    %206 = vector.shape_cast %205 : vector<1x32x8xf32> to vector<32x8xf32>
    %c12_139 = arith.constant 12 : index
    %c0_140 = arith.constant 0 : index
    %c0_141 = arith.constant 0 : index
    %207 = vector.load %arg6[%c12_139, %c0_140, %c0_141] : memref<48x1x8xf32, #tpu.memory_space<vmem>>, vector<1x1x8xf32>
    %208 = vector.shape_cast %207 : vector<1x1x8xf32> to vector<1x8xf32>
    %c16_142 = arith.constant 16 : index
    %c0_143 = arith.constant 0 : index
    %c0_144 = arith.constant 0 : index
    %209 = vector.load %arg6[%c16_142, %c0_143, %c0_144] : memref<48x1x8xf32, #tpu.memory_space<vmem>>, vector<1x1x8xf32>
    %210 = vector.shape_cast %209 : vector<1x1x8xf32> to vector<1x8xf32>
    %c20_145 = arith.constant 20 : index
    %c0_146 = arith.constant 0 : index
    %c0_147 = arith.constant 0 : index
    %211 = vector.load %arg6[%c20_145, %c0_146, %c0_147] : memref<48x1x8xf32, #tpu.memory_space<vmem>>, vector<1x1x8xf32>
    %212 = vector.shape_cast %211 : vector<1x1x8xf32> to vector<1x8xf32>
    %cst_148 = arith.constant dense<0.000000e+00> : vector<8x8xf32>
    %213 = tpu.matmul %200, %202, %cst_148 {dimension_numbers = #tpu.dot_dimension_numbers<[1], [0], [0], [1], [0, 0, 1, 1], [], []>} : vector<8x32xf32>, vector<32x8xf32>, vector<8x8xf32> -> vector<8x8xf32>
    %214 = vector.broadcast %208 : vector<1x8xf32> to vector<8x8xf32>
    %215 = arith.addf %213, %214 : vector<8x8xf32>
    %cst_149 = arith.constant 0.353553385 : f32
    %216 = vector.broadcast %cst_149 : f32 to vector<8x8xf32>
    %217 = arith.mulf %215, %216 : vector<8x8xf32>
    %cst_150 = arith.constant dense<0.000000e+00> : vector<16x8xf32>
    %218 = tpu.matmul %8, %204, %cst_150 {dimension_numbers = #tpu.dot_dimension_numbers<[1], [0], [0], [1], [0, 0, 1, 1], [], []>} : vector<16x32xf32>, vector<32x8xf32>, vector<16x8xf32> -> vector<16x8xf32>
    %219 = vector.broadcast %210 : vector<1x8xf32> to vector<16x8xf32>
    %220 = arith.addf %218, %219 : vector<16x8xf32>
    %cst_151 = arith.constant dense<0.000000e+00> : vector<16x8xf32>
    %221 = tpu.matmul %3, %206, %cst_151 {dimension_numbers = #tpu.dot_dimension_numbers<[1], [0], [0], [1], [0, 0, 1, 1], [], []>} : vector<16x32xf32>, vector<32x8xf32>, vector<16x8xf32> -> vector<16x8xf32>
    %222 = vector.broadcast %212 : vector<1x8xf32> to vector<16x8xf32>
    %223 = arith.addf %221, %222 : vector<16x8xf32>
    %224 = tpu.transpose %220, [1, 0] : vector<16x8xf32> -> vector<8x16xf32>
    %cst_152 = arith.constant dense<0.000000e+00> : vector<8x16xf32>
    %225 = tpu.matmul %217, %224, %cst_152 {dimension_numbers = #tpu.dot_dimension_numbers<[1], [0], [0], [1], [0, 0, 1, 1], [], []>} : vector<8x8xf32>, vector<8x16xf32>, vector<8x16xf32> -> vector<8x16xf32>
    %cst_153 = arith.constant dense<0xFF800000> : vector<8xf32>
    %226 = vector.multi_reduction <maximumf>, %225, %cst_153 [1] : vector<8x16xf32> to vector<8xf32>
    %227 = vector.shape_cast %226 : vector<8xf32> to vector<8x1xf32>
    %228 = vector.broadcast %227 : vector<8x1xf32> to vector<8x16xf32>
    %229 = arith.subf %225, %228 : vector<8x16xf32>
    %230 = math.exp %229 : vector<8x16xf32>
    %cst_154 = arith.constant dense<0.000000e+00> : vector<8xf32>
    %231 = vector.multi_reduction <add>, %230, %cst_154 [1] : vector<8x16xf32> to vector<8xf32>
    %232 = vector.shape_cast %231 : vector<8xf32> to vector<8x1xf32>
    %233 = tpu.reciprocal %232 {approx = true} : vector<8x1xf32> -> vector<8x1xf32>
    %234 = vector.broadcast %233 : vector<8x1xf32> to vector<8x16xf32>
    %235 = arith.mulf %230, %234 : vector<8x16xf32>
    %cst_155 = arith.constant dense<0.000000e+00> : vector<8x8xf32>
    %236 = tpu.matmul %235, %223, %cst_155 {dimension_numbers = #tpu.dot_dimension_numbers<[1], [0], [0], [1], [0, 0, 1, 1], [], []>} : vector<8x16xf32>, vector<16x8xf32>, vector<8x8xf32> -> vector<8x8xf32>
    %c4_156 = arith.constant 4 : index
    %c0_157 = arith.constant 0 : index
    %c0_158 = arith.constant 0 : index
    %237 = vector.load %arg7[%c4_156, %c0_157, %c0_158] : memref<16x8x32xf32, #tpu.memory_space<vmem>>, vector<1x8x32xf32>
    %238 = vector.shape_cast %237 : vector<1x8x32xf32> to vector<8x32xf32>
    %cst_159 = arith.constant dense<0.000000e+00> : vector<8x32xf32>
    %239 = tpu.matmul %236, %238, %cst_159 {dimension_numbers = #tpu.dot_dimension_numbers<[1], [0], [0], [1], [0, 0, 1, 1], [], []>} : vector<8x8xf32>, vector<8x32xf32>, vector<8x32xf32> -> vector<8x32xf32>
    %c13 = arith.constant 13 : index
    %c0_160 = arith.constant 0 : index
    %c0_161 = arith.constant 0 : index
    %240 = vector.load %arg5[%c13, %c0_160, %c0_161] : memref<48x32x8xf32, #tpu.memory_space<vmem>>, vector<1x32x8xf32>
    %241 = vector.shape_cast %240 : vector<1x32x8xf32> to vector<32x8xf32>
    %c17 = arith.constant 17 : index
    %c0_162 = arith.constant 0 : index
    %c0_163 = arith.constant 0 : index
    %242 = vector.load %arg5[%c17, %c0_162, %c0_163] : memref<48x32x8xf32, #tpu.memory_space<vmem>>, vector<1x32x8xf32>
    %243 = vector.shape_cast %242 : vector<1x32x8xf32> to vector<32x8xf32>
    %c21 = arith.constant 21 : index
    %c0_164 = arith.constant 0 : index
    %c0_165 = arith.constant 0 : index
    %244 = vector.load %arg5[%c21, %c0_164, %c0_165] : memref<48x32x8xf32, #tpu.memory_space<vmem>>, vector<1x32x8xf32>
    %245 = vector.shape_cast %244 : vector<1x32x8xf32> to vector<32x8xf32>
    %c13_166 = arith.constant 13 : index
    %c0_167 = arith.constant 0 : index
    %c0_168 = arith.constant 0 : index
    %246 = vector.load %arg6[%c13_166, %c0_167, %c0_168] : memref<48x1x8xf32, #tpu.memory_space<vmem>>, vector<1x1x8xf32>
    %247 = vector.shape_cast %246 : vector<1x1x8xf32> to vector<1x8xf32>
    %c17_169 = arith.constant 17 : index
    %c0_170 = arith.constant 0 : index
    %c0_171 = arith.constant 0 : index
    %248 = vector.load %arg6[%c17_169, %c0_170, %c0_171] : memref<48x1x8xf32, #tpu.memory_space<vmem>>, vector<1x1x8xf32>
    %249 = vector.shape_cast %248 : vector<1x1x8xf32> to vector<1x8xf32>
    %c21_172 = arith.constant 21 : index
    %c0_173 = arith.constant 0 : index
    %c0_174 = arith.constant 0 : index
    %250 = vector.load %arg6[%c21_172, %c0_173, %c0_174] : memref<48x1x8xf32, #tpu.memory_space<vmem>>, vector<1x1x8xf32>
    %251 = vector.shape_cast %250 : vector<1x1x8xf32> to vector<1x8xf32>
    %cst_175 = arith.constant dense<0.000000e+00> : vector<8x8xf32>
    %252 = tpu.matmul %200, %241, %cst_175 {dimension_numbers = #tpu.dot_dimension_numbers<[1], [0], [0], [1], [0, 0, 1, 1], [], []>} : vector<8x32xf32>, vector<32x8xf32>, vector<8x8xf32> -> vector<8x8xf32>
    %253 = vector.broadcast %247 : vector<1x8xf32> to vector<8x8xf32>
    %254 = arith.addf %252, %253 : vector<8x8xf32>
    %cst_176 = arith.constant 0.353553385 : f32
    %255 = vector.broadcast %cst_176 : f32 to vector<8x8xf32>
    %256 = arith.mulf %254, %255 : vector<8x8xf32>
    %cst_177 = arith.constant dense<0.000000e+00> : vector<16x8xf32>
    %257 = tpu.matmul %8, %243, %cst_177 {dimension_numbers = #tpu.dot_dimension_numbers<[1], [0], [0], [1], [0, 0, 1, 1], [], []>} : vector<16x32xf32>, vector<32x8xf32>, vector<16x8xf32> -> vector<16x8xf32>
    %258 = vector.broadcast %249 : vector<1x8xf32> to vector<16x8xf32>
    %259 = arith.addf %257, %258 : vector<16x8xf32>
    %cst_178 = arith.constant dense<0.000000e+00> : vector<16x8xf32>
    %260 = tpu.matmul %3, %245, %cst_178 {dimension_numbers = #tpu.dot_dimension_numbers<[1], [0], [0], [1], [0, 0, 1, 1], [], []>} : vector<16x32xf32>, vector<32x8xf32>, vector<16x8xf32> -> vector<16x8xf32>
    %261 = vector.broadcast %251 : vector<1x8xf32> to vector<16x8xf32>
    %262 = arith.addf %260, %261 : vector<16x8xf32>
    %263 = tpu.transpose %259, [1, 0] : vector<16x8xf32> -> vector<8x16xf32>
    %cst_179 = arith.constant dense<0.000000e+00> : vector<8x16xf32>
    %264 = tpu.matmul %256, %263, %cst_179 {dimension_numbers = #tpu.dot_dimension_numbers<[1], [0], [0], [1], [0, 0, 1, 1], [], []>} : vector<8x8xf32>, vector<8x16xf32>, vector<8x16xf32> -> vector<8x16xf32>
    %cst_180 = arith.constant dense<0xFF800000> : vector<8xf32>
    %265 = vector.multi_reduction <maximumf>, %264, %cst_180 [1] : vector<8x16xf32> to vector<8xf32>
    %266 = vector.shape_cast %265 : vector<8xf32> to vector<8x1xf32>
    %267 = vector.broadcast %266 : vector<8x1xf32> to vector<8x16xf32>
    %268 = arith.subf %264, %267 : vector<8x16xf32>
    %269 = math.exp %268 : vector<8x16xf32>
    %cst_181 = arith.constant dense<0.000000e+00> : vector<8xf32>
    %270 = vector.multi_reduction <add>, %269, %cst_181 [1] : vector<8x16xf32> to vector<8xf32>
    %271 = vector.shape_cast %270 : vector<8xf32> to vector<8x1xf32>
    %272 = tpu.reciprocal %271 {approx = true} : vector<8x1xf32> -> vector<8x1xf32>
    %273 = vector.broadcast %272 : vector<8x1xf32> to vector<8x16xf32>
    %274 = arith.mulf %269, %273 : vector<8x16xf32>
    %cst_182 = arith.constant dense<0.000000e+00> : vector<8x8xf32>
    %275 = tpu.matmul %274, %262, %cst_182 {dimension_numbers = #tpu.dot_dimension_numbers<[1], [0], [0], [1], [0, 0, 1, 1], [], []>} : vector<8x16xf32>, vector<16x8xf32>, vector<8x8xf32> -> vector<8x8xf32>
    %c5_183 = arith.constant 5 : index
    %c0_184 = arith.constant 0 : index
    %c0_185 = arith.constant 0 : index
    %276 = vector.load %arg7[%c5_183, %c0_184, %c0_185] : memref<16x8x32xf32, #tpu.memory_space<vmem>>, vector<1x8x32xf32>
    %277 = vector.shape_cast %276 : vector<1x8x32xf32> to vector<8x32xf32>
    %cst_186 = arith.constant dense<0.000000e+00> : vector<8x32xf32>
    %278 = tpu.matmul %275, %277, %cst_186 {dimension_numbers = #tpu.dot_dimension_numbers<[1], [0], [0], [1], [0, 0, 1, 1], [], []>} : vector<8x8xf32>, vector<8x32xf32>, vector<8x32xf32> -> vector<8x32xf32>
    %279 = arith.addf %239, %278 : vector<8x32xf32>
    %c14 = arith.constant 14 : index
    %c0_187 = arith.constant 0 : index
    %c0_188 = arith.constant 0 : index
    %280 = vector.load %arg5[%c14, %c0_187, %c0_188] : memref<48x32x8xf32, #tpu.memory_space<vmem>>, vector<1x32x8xf32>
    %281 = vector.shape_cast %280 : vector<1x32x8xf32> to vector<32x8xf32>
    %c18 = arith.constant 18 : index
    %c0_189 = arith.constant 0 : index
    %c0_190 = arith.constant 0 : index
    %282 = vector.load %arg5[%c18, %c0_189, %c0_190] : memref<48x32x8xf32, #tpu.memory_space<vmem>>, vector<1x32x8xf32>
    %283 = vector.shape_cast %282 : vector<1x32x8xf32> to vector<32x8xf32>
    %c22 = arith.constant 22 : index
    %c0_191 = arith.constant 0 : index
    %c0_192 = arith.constant 0 : index
    %284 = vector.load %arg5[%c22, %c0_191, %c0_192] : memref<48x32x8xf32, #tpu.memory_space<vmem>>, vector<1x32x8xf32>
    %285 = vector.shape_cast %284 : vector<1x32x8xf32> to vector<32x8xf32>
    %c14_193 = arith.constant 14 : index
    %c0_194 = arith.constant 0 : index
    %c0_195 = arith.constant 0 : index
    %286 = vector.load %arg6[%c14_193, %c0_194, %c0_195] : memref<48x1x8xf32, #tpu.memory_space<vmem>>, vector<1x1x8xf32>
    %287 = vector.shape_cast %286 : vector<1x1x8xf32> to vector<1x8xf32>
    %c18_196 = arith.constant 18 : index
    %c0_197 = arith.constant 0 : index
    %c0_198 = arith.constant 0 : index
    %288 = vector.load %arg6[%c18_196, %c0_197, %c0_198] : memref<48x1x8xf32, #tpu.memory_space<vmem>>, vector<1x1x8xf32>
    %289 = vector.shape_cast %288 : vector<1x1x8xf32> to vector<1x8xf32>
    %c22_199 = arith.constant 22 : index
    %c0_200 = arith.constant 0 : index
    %c0_201 = arith.constant 0 : index
    %290 = vector.load %arg6[%c22_199, %c0_200, %c0_201] : memref<48x1x8xf32, #tpu.memory_space<vmem>>, vector<1x1x8xf32>
    %291 = vector.shape_cast %290 : vector<1x1x8xf32> to vector<1x8xf32>
    %cst_202 = arith.constant dense<0.000000e+00> : vector<8x8xf32>
    %292 = tpu.matmul %200, %281, %cst_202 {dimension_numbers = #tpu.dot_dimension_numbers<[1], [0], [0], [1], [0, 0, 1, 1], [], []>} : vector<8x32xf32>, vector<32x8xf32>, vector<8x8xf32> -> vector<8x8xf32>
    %293 = vector.broadcast %287 : vector<1x8xf32> to vector<8x8xf32>
    %294 = arith.addf %292, %293 : vector<8x8xf32>
    %cst_203 = arith.constant 0.353553385 : f32
    %295 = vector.broadcast %cst_203 : f32 to vector<8x8xf32>
    %296 = arith.mulf %294, %295 : vector<8x8xf32>
    %cst_204 = arith.constant dense<0.000000e+00> : vector<16x8xf32>
    %297 = tpu.matmul %8, %283, %cst_204 {dimension_numbers = #tpu.dot_dimension_numbers<[1], [0], [0], [1], [0, 0, 1, 1], [], []>} : vector<16x32xf32>, vector<32x8xf32>, vector<16x8xf32> -> vector<16x8xf32>
    %298 = vector.broadcast %289 : vector<1x8xf32> to vector<16x8xf32>
    %299 = arith.addf %297, %298 : vector<16x8xf32>
    %cst_205 = arith.constant dense<0.000000e+00> : vector<16x8xf32>
    %300 = tpu.matmul %3, %285, %cst_205 {dimension_numbers = #tpu.dot_dimension_numbers<[1], [0], [0], [1], [0, 0, 1, 1], [], []>} : vector<16x32xf32>, vector<32x8xf32>, vector<16x8xf32> -> vector<16x8xf32>
    %301 = vector.broadcast %291 : vector<1x8xf32> to vector<16x8xf32>
    %302 = arith.addf %300, %301 : vector<16x8xf32>
    %303 = tpu.transpose %299, [1, 0] : vector<16x8xf32> -> vector<8x16xf32>
    %cst_206 = arith.constant dense<0.000000e+00> : vector<8x16xf32>
    %304 = tpu.matmul %296, %303, %cst_206 {dimension_numbers = #tpu.dot_dimension_numbers<[1], [0], [0], [1], [0, 0, 1, 1], [], []>} : vector<8x8xf32>, vector<8x16xf32>, vector<8x16xf32> -> vector<8x16xf32>
    %cst_207 = arith.constant dense<0xFF800000> : vector<8xf32>
    %305 = vector.multi_reduction <maximumf>, %304, %cst_207 [1] : vector<8x16xf32> to vector<8xf32>
    %306 = vector.shape_cast %305 : vector<8xf32> to vector<8x1xf32>
    %307 = vector.broadcast %306 : vector<8x1xf32> to vector<8x16xf32>
    %308 = arith.subf %304, %307 : vector<8x16xf32>
    %309 = math.exp %308 : vector<8x16xf32>
    %cst_208 = arith.constant dense<0.000000e+00> : vector<8xf32>
    %310 = vector.multi_reduction <add>, %309, %cst_208 [1] : vector<8x16xf32> to vector<8xf32>
    %311 = vector.shape_cast %310 : vector<8xf32> to vector<8x1xf32>
    %312 = tpu.reciprocal %311 {approx = true} : vector<8x1xf32> -> vector<8x1xf32>
    %313 = vector.broadcast %312 : vector<8x1xf32> to vector<8x16xf32>
    %314 = arith.mulf %309, %313 : vector<8x16xf32>
    %cst_209 = arith.constant dense<0.000000e+00> : vector<8x8xf32>
    %315 = tpu.matmul %314, %302, %cst_209 {dimension_numbers = #tpu.dot_dimension_numbers<[1], [0], [0], [1], [0, 0, 1, 1], [], []>} : vector<8x16xf32>, vector<16x8xf32>, vector<8x8xf32> -> vector<8x8xf32>
    %c6_210 = arith.constant 6 : index
    %c0_211 = arith.constant 0 : index
    %c0_212 = arith.constant 0 : index
    %316 = vector.load %arg7[%c6_210, %c0_211, %c0_212] : memref<16x8x32xf32, #tpu.memory_space<vmem>>, vector<1x8x32xf32>
    %317 = vector.shape_cast %316 : vector<1x8x32xf32> to vector<8x32xf32>
    %cst_213 = arith.constant dense<0.000000e+00> : vector<8x32xf32>
    %318 = tpu.matmul %315, %317, %cst_213 {dimension_numbers = #tpu.dot_dimension_numbers<[1], [0], [0], [1], [0, 0, 1, 1], [], []>} : vector<8x8xf32>, vector<8x32xf32>, vector<8x32xf32> -> vector<8x32xf32>
    %319 = arith.addf %279, %318 : vector<8x32xf32>
    %c15 = arith.constant 15 : index
    %c0_214 = arith.constant 0 : index
    %c0_215 = arith.constant 0 : index
    %320 = vector.load %arg5[%c15, %c0_214, %c0_215] : memref<48x32x8xf32, #tpu.memory_space<vmem>>, vector<1x32x8xf32>
    %321 = vector.shape_cast %320 : vector<1x32x8xf32> to vector<32x8xf32>
    %c19 = arith.constant 19 : index
    %c0_216 = arith.constant 0 : index
    %c0_217 = arith.constant 0 : index
    %322 = vector.load %arg5[%c19, %c0_216, %c0_217] : memref<48x32x8xf32, #tpu.memory_space<vmem>>, vector<1x32x8xf32>
    %323 = vector.shape_cast %322 : vector<1x32x8xf32> to vector<32x8xf32>
    %c23 = arith.constant 23 : index
    %c0_218 = arith.constant 0 : index
    %c0_219 = arith.constant 0 : index
    %324 = vector.load %arg5[%c23, %c0_218, %c0_219] : memref<48x32x8xf32, #tpu.memory_space<vmem>>, vector<1x32x8xf32>
    %325 = vector.shape_cast %324 : vector<1x32x8xf32> to vector<32x8xf32>
    %c15_220 = arith.constant 15 : index
    %c0_221 = arith.constant 0 : index
    %c0_222 = arith.constant 0 : index
    %326 = vector.load %arg6[%c15_220, %c0_221, %c0_222] : memref<48x1x8xf32, #tpu.memory_space<vmem>>, vector<1x1x8xf32>
    %327 = vector.shape_cast %326 : vector<1x1x8xf32> to vector<1x8xf32>
    %c19_223 = arith.constant 19 : index
    %c0_224 = arith.constant 0 : index
    %c0_225 = arith.constant 0 : index
    %328 = vector.load %arg6[%c19_223, %c0_224, %c0_225] : memref<48x1x8xf32, #tpu.memory_space<vmem>>, vector<1x1x8xf32>
    %329 = vector.shape_cast %328 : vector<1x1x8xf32> to vector<1x8xf32>
    %c23_226 = arith.constant 23 : index
    %c0_227 = arith.constant 0 : index
    %c0_228 = arith.constant 0 : index
    %330 = vector.load %arg6[%c23_226, %c0_227, %c0_228] : memref<48x1x8xf32, #tpu.memory_space<vmem>>, vector<1x1x8xf32>
    %331 = vector.shape_cast %330 : vector<1x1x8xf32> to vector<1x8xf32>
    %cst_229 = arith.constant dense<0.000000e+00> : vector<8x8xf32>
    %332 = tpu.matmul %200, %321, %cst_229 {dimension_numbers = #tpu.dot_dimension_numbers<[1], [0], [0], [1], [0, 0, 1, 1], [], []>} : vector<8x32xf32>, vector<32x8xf32>, vector<8x8xf32> -> vector<8x8xf32>
    %333 = vector.broadcast %327 : vector<1x8xf32> to vector<8x8xf32>
    %334 = arith.addf %332, %333 : vector<8x8xf32>
    %cst_230 = arith.constant 0.353553385 : f32
    %335 = vector.broadcast %cst_230 : f32 to vector<8x8xf32>
    %336 = arith.mulf %334, %335 : vector<8x8xf32>
    %cst_231 = arith.constant dense<0.000000e+00> : vector<16x8xf32>
    %337 = tpu.matmul %8, %323, %cst_231 {dimension_numbers = #tpu.dot_dimension_numbers<[1], [0], [0], [1], [0, 0, 1, 1], [], []>} : vector<16x32xf32>, vector<32x8xf32>, vector<16x8xf32> -> vector<16x8xf32>
    %338 = vector.broadcast %329 : vector<1x8xf32> to vector<16x8xf32>
    %339 = arith.addf %337, %338 : vector<16x8xf32>
    %cst_232 = arith.constant dense<0.000000e+00> : vector<16x8xf32>
    %340 = tpu.matmul %3, %325, %cst_232 {dimension_numbers = #tpu.dot_dimension_numbers<[1], [0], [0], [1], [0, 0, 1, 1], [], []>} : vector<16x32xf32>, vector<32x8xf32>, vector<16x8xf32> -> vector<16x8xf32>
    %341 = vector.broadcast %331 : vector<1x8xf32> to vector<16x8xf32>
    %342 = arith.addf %340, %341 : vector<16x8xf32>
    %343 = tpu.transpose %339, [1, 0] : vector<16x8xf32> -> vector<8x16xf32>
    %cst_233 = arith.constant dense<0.000000e+00> : vector<8x16xf32>
    %344 = tpu.matmul %336, %343, %cst_233 {dimension_numbers = #tpu.dot_dimension_numbers<[1], [0], [0], [1], [0, 0, 1, 1], [], []>} : vector<8x8xf32>, vector<8x16xf32>, vector<8x16xf32> -> vector<8x16xf32>
    %cst_234 = arith.constant dense<0xFF800000> : vector<8xf32>
    %345 = vector.multi_reduction <maximumf>, %344, %cst_234 [1] : vector<8x16xf32> to vector<8xf32>
    %346 = vector.shape_cast %345 : vector<8xf32> to vector<8x1xf32>
    %347 = vector.broadcast %346 : vector<8x1xf32> to vector<8x16xf32>
    %348 = arith.subf %344, %347 : vector<8x16xf32>
    %349 = math.exp %348 : vector<8x16xf32>
    %cst_235 = arith.constant dense<0.000000e+00> : vector<8xf32>
    %350 = vector.multi_reduction <add>, %349, %cst_235 [1] : vector<8x16xf32> to vector<8xf32>
    %351 = vector.shape_cast %350 : vector<8xf32> to vector<8x1xf32>
    %352 = tpu.reciprocal %351 {approx = true} : vector<8x1xf32> -> vector<8x1xf32>
    %353 = vector.broadcast %352 : vector<8x1xf32> to vector<8x16xf32>
    %354 = arith.mulf %349, %353 : vector<8x16xf32>
    %cst_236 = arith.constant dense<0.000000e+00> : vector<8x8xf32>
    %355 = tpu.matmul %354, %342, %cst_236 {dimension_numbers = #tpu.dot_dimension_numbers<[1], [0], [0], [1], [0, 0, 1, 1], [], []>} : vector<8x16xf32>, vector<16x8xf32>, vector<8x8xf32> -> vector<8x8xf32>
    %c7_237 = arith.constant 7 : index
    %c0_238 = arith.constant 0 : index
    %c0_239 = arith.constant 0 : index
    %356 = vector.load %arg7[%c7_237, %c0_238, %c0_239] : memref<16x8x32xf32, #tpu.memory_space<vmem>>, vector<1x8x32xf32>
    %357 = vector.shape_cast %356 : vector<1x8x32xf32> to vector<8x32xf32>
    %cst_240 = arith.constant dense<0.000000e+00> : vector<8x32xf32>
    %358 = tpu.matmul %355, %357, %cst_240 {dimension_numbers = #tpu.dot_dimension_numbers<[1], [0], [0], [1], [0, 0, 1, 1], [], []>} : vector<8x8xf32>, vector<8x32xf32>, vector<8x32xf32> -> vector<8x32xf32>
    %359 = arith.addf %319, %358 : vector<8x32xf32>
    %c1_241 = arith.constant 1 : index
    %c0_242 = arith.constant 0 : index
    %c0_243 = arith.constant 0 : index
    %360 = vector.load %arg8[%c1_241, %c0_242, %c0_243] : memref<4x1x32xf32, #tpu.memory_space<vmem>>, vector<1x1x32xf32>
    %361 = vector.shape_cast %360 : vector<1x1x32xf32> to vector<1x32xf32>
    %362 = vector.broadcast %361 : vector<1x32xf32> to vector<8x32xf32>
    %363 = arith.addf %359, %362 : vector<8x32xf32>
    %364 = arith.addf %199, %363 : vector<8x32xf32>
    %cst_244 = arith.constant dense<0.000000e+00> : vector<8xf32>
    %365 = vector.multi_reduction <add>, %364, %cst_244 [1] : vector<8x32xf32> to vector<8xf32>
    %366 = vector.shape_cast %365 : vector<8xf32> to vector<8x1xf32>
    %cst_245 = arith.constant 3.200000e+01 : f32
    %367 = vector.broadcast %cst_245 : f32 to vector<8x1xf32>
    %368 = arith.divf %366, %367 : vector<8x1xf32>
    %369 = vector.broadcast %368 : vector<8x1xf32> to vector<8x32xf32>
    %370 = arith.subf %364, %369 : vector<8x32xf32>
    %371 = arith.mulf %370, %370 : vector<8x32xf32>
    %cst_246 = arith.constant dense<0.000000e+00> : vector<8xf32>
    %372 = vector.multi_reduction <add>, %371, %cst_246 [1] : vector<8x32xf32> to vector<8xf32>
    %373 = vector.shape_cast %372 : vector<8xf32> to vector<8x1xf32>
    %cst_247 = arith.constant 3.200000e+01 : f32
    %374 = vector.broadcast %cst_247 : f32 to vector<8x1xf32>
    %375 = arith.divf %373, %374 : vector<8x1xf32>
    %376 = vector.broadcast %368 : vector<8x1xf32> to vector<8x32xf32>
    %377 = arith.subf %364, %376 : vector<8x32xf32>
    %cst_248 = arith.constant 9.99999974E-6 : f32
    %378 = vector.broadcast %cst_248 : f32 to vector<8x1xf32>
    %379 = arith.addf %375, %378 : vector<8x1xf32>
    %380 = math.rsqrt %379 : vector<8x1xf32>
    %381 = vector.broadcast %380 : vector<8x1xf32> to vector<8x32xf32>
    %382 = arith.mulf %377, %381 : vector<8x32xf32>
    %c1_249 = arith.constant 1 : index
    %c0_250 = arith.constant 0 : index
    %c0_251 = arith.constant 0 : index
    %383 = vector.load %arg13[%c1_249, %c0_250, %c0_251] : memref<7x1x32xf32, #tpu.memory_space<vmem>>, vector<1x1x32xf32>
    %384 = vector.shape_cast %383 : vector<1x1x32xf32> to vector<1x32xf32>
    %385 = vector.broadcast %384 : vector<1x32xf32> to vector<8x32xf32>
    %386 = arith.mulf %382, %385 : vector<8x32xf32>
    %c1_252 = arith.constant 1 : index
    %c0_253 = arith.constant 0 : index
    %c0_254 = arith.constant 0 : index
    %387 = vector.load %arg14[%c1_252, %c0_253, %c0_254] : memref<7x1x32xf32, #tpu.memory_space<vmem>>, vector<1x1x32xf32>
    %388 = vector.shape_cast %387 : vector<1x1x32xf32> to vector<1x32xf32>
    %389 = vector.broadcast %388 : vector<1x32xf32> to vector<8x32xf32>
    %390 = arith.addf %386, %389 : vector<8x32xf32>
    %c0_255 = arith.constant 0 : index
    %c0_256 = arith.constant 0 : index
    %c0_257 = arith.constant 0 : index
    %391 = vector.load %arg9[%c0_255, %c0_256, %c0_257] : memref<2x32x64xf32, #tpu.memory_space<vmem>>, vector<1x32x64xf32>
    %392 = vector.shape_cast %391 : vector<1x32x64xf32> to vector<32x64xf32>
    %cst_258 = arith.constant dense<0.000000e+00> : vector<8x64xf32>
    %393 = tpu.matmul %390, %392, %cst_258 {dimension_numbers = #tpu.dot_dimension_numbers<[1], [0], [0], [1], [0, 0, 1, 1], [], []>} : vector<8x32xf32>, vector<32x64xf32>, vector<8x64xf32> -> vector<8x64xf32>
    %c0_259 = arith.constant 0 : index
    %c0_260 = arith.constant 0 : index
    %c0_261 = arith.constant 0 : index
    %394 = vector.load %arg10[%c0_259, %c0_260, %c0_261] : memref<2x1x64xf32, #tpu.memory_space<vmem>>, vector<1x1x64xf32>
    %395 = vector.shape_cast %394 : vector<1x1x64xf32> to vector<1x64xf32>
    %396 = vector.broadcast %395 : vector<1x64xf32> to vector<8x64xf32>
    %397 = arith.addf %393, %396 : vector<8x64xf32>
    %cst_262 = arith.constant 0.000000e+00 : f32
    %398 = vector.broadcast %cst_262 : f32 to vector<8x64xf32>
    %399 = arith.maximumf %397, %398 : vector<8x64xf32>
    %c0_263 = arith.constant 0 : index
    %c0_264 = arith.constant 0 : index
    %c0_265 = arith.constant 0 : index
    %400 = vector.load %arg11[%c0_263, %c0_264, %c0_265] : memref<2x64x32xf32, #tpu.memory_space<vmem>>, vector<1x64x32xf32>
    %401 = vector.shape_cast %400 : vector<1x64x32xf32> to vector<64x32xf32>
    %cst_266 = arith.constant dense<0.000000e+00> : vector<8x32xf32>
    %402 = tpu.matmul %399, %401, %cst_266 {dimension_numbers = #tpu.dot_dimension_numbers<[1], [0], [0], [1], [0, 0, 1, 1], [], []>} : vector<8x64xf32>, vector<64x32xf32>, vector<8x32xf32> -> vector<8x32xf32>
    %c0_267 = arith.constant 0 : index
    %c0_268 = arith.constant 0 : index
    %c0_269 = arith.constant 0 : index
    %403 = vector.load %arg12[%c0_267, %c0_268, %c0_269] : memref<2x1x32xf32, #tpu.memory_space<vmem>>, vector<1x1x32xf32>
    %404 = vector.shape_cast %403 : vector<1x1x32xf32> to vector<1x32xf32>
    %405 = vector.broadcast %404 : vector<1x32xf32> to vector<8x32xf32>
    %406 = arith.addf %402, %405 : vector<8x32xf32>
    %407 = arith.addf %390, %406 : vector<8x32xf32>
    %cst_270 = arith.constant dense<0.000000e+00> : vector<8xf32>
    %408 = vector.multi_reduction <add>, %407, %cst_270 [1] : vector<8x32xf32> to vector<8xf32>
    %409 = vector.shape_cast %408 : vector<8xf32> to vector<8x1xf32>
    %cst_271 = arith.constant 3.200000e+01 : f32
    %410 = vector.broadcast %cst_271 : f32 to vector<8x1xf32>
    %411 = arith.divf %409, %410 : vector<8x1xf32>
    %412 = vector.broadcast %411 : vector<8x1xf32> to vector<8x32xf32>
    %413 = arith.subf %407, %412 : vector<8x32xf32>
    %414 = arith.mulf %413, %413 : vector<8x32xf32>
    %cst_272 = arith.constant dense<0.000000e+00> : vector<8xf32>
    %415 = vector.multi_reduction <add>, %414, %cst_272 [1] : vector<8x32xf32> to vector<8xf32>
    %416 = vector.shape_cast %415 : vector<8xf32> to vector<8x1xf32>
    %cst_273 = arith.constant 3.200000e+01 : f32
    %417 = vector.broadcast %cst_273 : f32 to vector<8x1xf32>
    %418 = arith.divf %416, %417 : vector<8x1xf32>
    %419 = vector.broadcast %411 : vector<8x1xf32> to vector<8x32xf32>
    %420 = arith.subf %407, %419 : vector<8x32xf32>
    %cst_274 = arith.constant 9.99999974E-6 : f32
    %421 = vector.broadcast %cst_274 : f32 to vector<8x1xf32>
    %422 = arith.addf %418, %421 : vector<8x1xf32>
    %423 = math.rsqrt %422 : vector<8x1xf32>
    %424 = vector.broadcast %423 : vector<8x1xf32> to vector<8x32xf32>
    %425 = arith.mulf %420, %424 : vector<8x32xf32>
    %c2_275 = arith.constant 2 : index
    %c0_276 = arith.constant 0 : index
    %c0_277 = arith.constant 0 : index
    %426 = vector.load %arg13[%c2_275, %c0_276, %c0_277] : memref<7x1x32xf32, #tpu.memory_space<vmem>>, vector<1x1x32xf32>
    %427 = vector.shape_cast %426 : vector<1x1x32xf32> to vector<1x32xf32>
    %428 = vector.broadcast %427 : vector<1x32xf32> to vector<8x32xf32>
    %429 = arith.mulf %425, %428 : vector<8x32xf32>
    %c2_278 = arith.constant 2 : index
    %c0_279 = arith.constant 0 : index
    %c0_280 = arith.constant 0 : index
    %430 = vector.load %arg14[%c2_278, %c0_279, %c0_280] : memref<7x1x32xf32, #tpu.memory_space<vmem>>, vector<1x1x32xf32>
    %431 = vector.shape_cast %430 : vector<1x1x32xf32> to vector<1x32xf32>
    %432 = vector.broadcast %431 : vector<1x32xf32> to vector<8x32xf32>
    %433 = arith.addf %429, %432 : vector<8x32xf32>
    %434 = arith.addf %433, %5 : vector<8x32xf32>
    %c24 = arith.constant 24 : index
    %c0_281 = arith.constant 0 : index
    %c0_282 = arith.constant 0 : index
    %435 = vector.load %arg5[%c24, %c0_281, %c0_282] : memref<48x32x8xf32, #tpu.memory_space<vmem>>, vector<1x32x8xf32>
    %436 = vector.shape_cast %435 : vector<1x32x8xf32> to vector<32x8xf32>
    %c28 = arith.constant 28 : index
    %c0_283 = arith.constant 0 : index
    %c0_284 = arith.constant 0 : index
    %437 = vector.load %arg5[%c28, %c0_283, %c0_284] : memref<48x32x8xf32, #tpu.memory_space<vmem>>, vector<1x32x8xf32>
    %438 = vector.shape_cast %437 : vector<1x32x8xf32> to vector<32x8xf32>
    %c32 = arith.constant 32 : index
    %c0_285 = arith.constant 0 : index
    %c0_286 = arith.constant 0 : index
    %439 = vector.load %arg5[%c32, %c0_285, %c0_286] : memref<48x32x8xf32, #tpu.memory_space<vmem>>, vector<1x32x8xf32>
    %440 = vector.shape_cast %439 : vector<1x32x8xf32> to vector<32x8xf32>
    %c24_287 = arith.constant 24 : index
    %c0_288 = arith.constant 0 : index
    %c0_289 = arith.constant 0 : index
    %441 = vector.load %arg6[%c24_287, %c0_288, %c0_289] : memref<48x1x8xf32, #tpu.memory_space<vmem>>, vector<1x1x8xf32>
    %442 = vector.shape_cast %441 : vector<1x1x8xf32> to vector<1x8xf32>
    %c28_290 = arith.constant 28 : index
    %c0_291 = arith.constant 0 : index
    %c0_292 = arith.constant 0 : index
    %443 = vector.load %arg6[%c28_290, %c0_291, %c0_292] : memref<48x1x8xf32, #tpu.memory_space<vmem>>, vector<1x1x8xf32>
    %444 = vector.shape_cast %443 : vector<1x1x8xf32> to vector<1x8xf32>
    %c32_293 = arith.constant 32 : index
    %c0_294 = arith.constant 0 : index
    %c0_295 = arith.constant 0 : index
    %445 = vector.load %arg6[%c32_293, %c0_294, %c0_295] : memref<48x1x8xf32, #tpu.memory_space<vmem>>, vector<1x1x8xf32>
    %446 = vector.shape_cast %445 : vector<1x1x8xf32> to vector<1x8xf32>
    %cst_296 = arith.constant dense<0.000000e+00> : vector<8x8xf32>
    %447 = tpu.matmul %434, %436, %cst_296 {dimension_numbers = #tpu.dot_dimension_numbers<[1], [0], [0], [1], [0, 0, 1, 1], [], []>} : vector<8x32xf32>, vector<32x8xf32>, vector<8x8xf32> -> vector<8x8xf32>
    %448 = vector.broadcast %442 : vector<1x8xf32> to vector<8x8xf32>
    %449 = arith.addf %447, %448 : vector<8x8xf32>
    %cst_297 = arith.constant 0.353553385 : f32
    %450 = vector.broadcast %cst_297 : f32 to vector<8x8xf32>
    %451 = arith.mulf %449, %450 : vector<8x8xf32>
    %cst_298 = arith.constant dense<0.000000e+00> : vector<8x8xf32>
    %452 = tpu.matmul %434, %438, %cst_298 {dimension_numbers = #tpu.dot_dimension_numbers<[1], [0], [0], [1], [0, 0, 1, 1], [], []>} : vector<8x32xf32>, vector<32x8xf32>, vector<8x8xf32> -> vector<8x8xf32>
    %453 = vector.broadcast %444 : vector<1x8xf32> to vector<8x8xf32>
    %454 = arith.addf %452, %453 : vector<8x8xf32>
    %cst_299 = arith.constant dense<0.000000e+00> : vector<8x8xf32>
    %455 = tpu.matmul %433, %440, %cst_299 {dimension_numbers = #tpu.dot_dimension_numbers<[1], [0], [0], [1], [0, 0, 1, 1], [], []>} : vector<8x32xf32>, vector<32x8xf32>, vector<8x8xf32> -> vector<8x8xf32>
    %456 = vector.broadcast %446 : vector<1x8xf32> to vector<8x8xf32>
    %457 = arith.addf %455, %456 : vector<8x8xf32>
    %458 = tpu.transpose %454, [1, 0] : vector<8x8xf32> -> vector<8x8xf32>
    %cst_300 = arith.constant dense<0.000000e+00> : vector<8x8xf32>
    %459 = tpu.matmul %451, %458, %cst_300 {dimension_numbers = #tpu.dot_dimension_numbers<[1], [0], [0], [1], [0, 0, 1, 1], [], []>} : vector<8x8xf32>, vector<8x8xf32>, vector<8x8xf32> -> vector<8x8xf32>
    %cst_301 = arith.constant dense<0xFF800000> : vector<8xf32>
    %460 = vector.multi_reduction <maximumf>, %459, %cst_301 [1] : vector<8x8xf32> to vector<8xf32>
    %461 = vector.shape_cast %460 : vector<8xf32> to vector<8x1xf32>
    %462 = vector.broadcast %461 : vector<8x1xf32> to vector<8x8xf32>
    %463 = arith.subf %459, %462 : vector<8x8xf32>
    %464 = math.exp %463 : vector<8x8xf32>
    %cst_302 = arith.constant dense<0.000000e+00> : vector<8xf32>
    %465 = vector.multi_reduction <add>, %464, %cst_302 [1] : vector<8x8xf32> to vector<8xf32>
    %466 = vector.shape_cast %465 : vector<8xf32> to vector<8x1xf32>
    %467 = tpu.reciprocal %466 {approx = true} : vector<8x1xf32> -> vector<8x1xf32>
    %468 = vector.broadcast %467 : vector<8x1xf32> to vector<8x8xf32>
    %469 = arith.mulf %464, %468 : vector<8x8xf32>
    %cst_303 = arith.constant dense<0.000000e+00> : vector<8x8xf32>
    %470 = tpu.matmul %469, %457, %cst_303 {dimension_numbers = #tpu.dot_dimension_numbers<[1], [0], [0], [1], [0, 0, 1, 1], [], []>} : vector<8x8xf32>, vector<8x8xf32>, vector<8x8xf32> -> vector<8x8xf32>
    %c8_304 = arith.constant 8 : index
    %c0_305 = arith.constant 0 : index
    %c0_306 = arith.constant 0 : index
    %471 = vector.load %arg7[%c8_304, %c0_305, %c0_306] : memref<16x8x32xf32, #tpu.memory_space<vmem>>, vector<1x8x32xf32>
    %472 = vector.shape_cast %471 : vector<1x8x32xf32> to vector<8x32xf32>
    %cst_307 = arith.constant dense<0.000000e+00> : vector<8x32xf32>
    %473 = tpu.matmul %470, %472, %cst_307 {dimension_numbers = #tpu.dot_dimension_numbers<[1], [0], [0], [1], [0, 0, 1, 1], [], []>} : vector<8x8xf32>, vector<8x32xf32>, vector<8x32xf32> -> vector<8x32xf32>
    %c25 = arith.constant 25 : index
    %c0_308 = arith.constant 0 : index
    %c0_309 = arith.constant 0 : index
    %474 = vector.load %arg5[%c25, %c0_308, %c0_309] : memref<48x32x8xf32, #tpu.memory_space<vmem>>, vector<1x32x8xf32>
    %475 = vector.shape_cast %474 : vector<1x32x8xf32> to vector<32x8xf32>
    %c29 = arith.constant 29 : index
    %c0_310 = arith.constant 0 : index
    %c0_311 = arith.constant 0 : index
    %476 = vector.load %arg5[%c29, %c0_310, %c0_311] : memref<48x32x8xf32, #tpu.memory_space<vmem>>, vector<1x32x8xf32>
    %477 = vector.shape_cast %476 : vector<1x32x8xf32> to vector<32x8xf32>
    %c33 = arith.constant 33 : index
    %c0_312 = arith.constant 0 : index
    %c0_313 = arith.constant 0 : index
    %478 = vector.load %arg5[%c33, %c0_312, %c0_313] : memref<48x32x8xf32, #tpu.memory_space<vmem>>, vector<1x32x8xf32>
    %479 = vector.shape_cast %478 : vector<1x32x8xf32> to vector<32x8xf32>
    %c25_314 = arith.constant 25 : index
    %c0_315 = arith.constant 0 : index
    %c0_316 = arith.constant 0 : index
    %480 = vector.load %arg6[%c25_314, %c0_315, %c0_316] : memref<48x1x8xf32, #tpu.memory_space<vmem>>, vector<1x1x8xf32>
    %481 = vector.shape_cast %480 : vector<1x1x8xf32> to vector<1x8xf32>
    %c29_317 = arith.constant 29 : index
    %c0_318 = arith.constant 0 : index
    %c0_319 = arith.constant 0 : index
    %482 = vector.load %arg6[%c29_317, %c0_318, %c0_319] : memref<48x1x8xf32, #tpu.memory_space<vmem>>, vector<1x1x8xf32>
    %483 = vector.shape_cast %482 : vector<1x1x8xf32> to vector<1x8xf32>
    %c33_320 = arith.constant 33 : index
    %c0_321 = arith.constant 0 : index
    %c0_322 = arith.constant 0 : index
    %484 = vector.load %arg6[%c33_320, %c0_321, %c0_322] : memref<48x1x8xf32, #tpu.memory_space<vmem>>, vector<1x1x8xf32>
    %485 = vector.shape_cast %484 : vector<1x1x8xf32> to vector<1x8xf32>
    %cst_323 = arith.constant dense<0.000000e+00> : vector<8x8xf32>
    %486 = tpu.matmul %434, %475, %cst_323 {dimension_numbers = #tpu.dot_dimension_numbers<[1], [0], [0], [1], [0, 0, 1, 1], [], []>} : vector<8x32xf32>, vector<32x8xf32>, vector<8x8xf32> -> vector<8x8xf32>
    %487 = vector.broadcast %481 : vector<1x8xf32> to vector<8x8xf32>
    %488 = arith.addf %486, %487 : vector<8x8xf32>
    %cst_324 = arith.constant 0.353553385 : f32
    %489 = vector.broadcast %cst_324 : f32 to vector<8x8xf32>
    %490 = arith.mulf %488, %489 : vector<8x8xf32>
    %cst_325 = arith.constant dense<0.000000e+00> : vector<8x8xf32>
    %491 = tpu.matmul %434, %477, %cst_325 {dimension_numbers = #tpu.dot_dimension_numbers<[1], [0], [0], [1], [0, 0, 1, 1], [], []>} : vector<8x32xf32>, vector<32x8xf32>, vector<8x8xf32> -> vector<8x8xf32>
    %492 = vector.broadcast %483 : vector<1x8xf32> to vector<8x8xf32>
    %493 = arith.addf %491, %492 : vector<8x8xf32>
    %cst_326 = arith.constant dense<0.000000e+00> : vector<8x8xf32>
    %494 = tpu.matmul %433, %479, %cst_326 {dimension_numbers = #tpu.dot_dimension_numbers<[1], [0], [0], [1], [0, 0, 1, 1], [], []>} : vector<8x32xf32>, vector<32x8xf32>, vector<8x8xf32> -> vector<8x8xf32>
    %495 = vector.broadcast %485 : vector<1x8xf32> to vector<8x8xf32>
    %496 = arith.addf %494, %495 : vector<8x8xf32>
    %497 = tpu.transpose %493, [1, 0] : vector<8x8xf32> -> vector<8x8xf32>
    %cst_327 = arith.constant dense<0.000000e+00> : vector<8x8xf32>
    %498 = tpu.matmul %490, %497, %cst_327 {dimension_numbers = #tpu.dot_dimension_numbers<[1], [0], [0], [1], [0, 0, 1, 1], [], []>} : vector<8x8xf32>, vector<8x8xf32>, vector<8x8xf32> -> vector<8x8xf32>
    %cst_328 = arith.constant dense<0xFF800000> : vector<8xf32>
    %499 = vector.multi_reduction <maximumf>, %498, %cst_328 [1] : vector<8x8xf32> to vector<8xf32>
    %500 = vector.shape_cast %499 : vector<8xf32> to vector<8x1xf32>
    %501 = vector.broadcast %500 : vector<8x1xf32> to vector<8x8xf32>
    %502 = arith.subf %498, %501 : vector<8x8xf32>
    %503 = math.exp %502 : vector<8x8xf32>
    %cst_329 = arith.constant dense<0.000000e+00> : vector<8xf32>
    %504 = vector.multi_reduction <add>, %503, %cst_329 [1] : vector<8x8xf32> to vector<8xf32>
    %505 = vector.shape_cast %504 : vector<8xf32> to vector<8x1xf32>
    %506 = tpu.reciprocal %505 {approx = true} : vector<8x1xf32> -> vector<8x1xf32>
    %507 = vector.broadcast %506 : vector<8x1xf32> to vector<8x8xf32>
    %508 = arith.mulf %503, %507 : vector<8x8xf32>
    %cst_330 = arith.constant dense<0.000000e+00> : vector<8x8xf32>
    %509 = tpu.matmul %508, %496, %cst_330 {dimension_numbers = #tpu.dot_dimension_numbers<[1], [0], [0], [1], [0, 0, 1, 1], [], []>} : vector<8x8xf32>, vector<8x8xf32>, vector<8x8xf32> -> vector<8x8xf32>
    %c9_331 = arith.constant 9 : index
    %c0_332 = arith.constant 0 : index
    %c0_333 = arith.constant 0 : index
    %510 = vector.load %arg7[%c9_331, %c0_332, %c0_333] : memref<16x8x32xf32, #tpu.memory_space<vmem>>, vector<1x8x32xf32>
    %511 = vector.shape_cast %510 : vector<1x8x32xf32> to vector<8x32xf32>
    %cst_334 = arith.constant dense<0.000000e+00> : vector<8x32xf32>
    %512 = tpu.matmul %509, %511, %cst_334 {dimension_numbers = #tpu.dot_dimension_numbers<[1], [0], [0], [1], [0, 0, 1, 1], [], []>} : vector<8x8xf32>, vector<8x32xf32>, vector<8x32xf32> -> vector<8x32xf32>
    %513 = arith.addf %473, %512 : vector<8x32xf32>
    %c26 = arith.constant 26 : index
    %c0_335 = arith.constant 0 : index
    %c0_336 = arith.constant 0 : index
    %514 = vector.load %arg5[%c26, %c0_335, %c0_336] : memref<48x32x8xf32, #tpu.memory_space<vmem>>, vector<1x32x8xf32>
    %515 = vector.shape_cast %514 : vector<1x32x8xf32> to vector<32x8xf32>
    %c30 = arith.constant 30 : index
    %c0_337 = arith.constant 0 : index
    %c0_338 = arith.constant 0 : index
    %516 = vector.load %arg5[%c30, %c0_337, %c0_338] : memref<48x32x8xf32, #tpu.memory_space<vmem>>, vector<1x32x8xf32>
    %517 = vector.shape_cast %516 : vector<1x32x8xf32> to vector<32x8xf32>
    %c34 = arith.constant 34 : index
    %c0_339 = arith.constant 0 : index
    %c0_340 = arith.constant 0 : index
    %518 = vector.load %arg5[%c34, %c0_339, %c0_340] : memref<48x32x8xf32, #tpu.memory_space<vmem>>, vector<1x32x8xf32>
    %519 = vector.shape_cast %518 : vector<1x32x8xf32> to vector<32x8xf32>
    %c26_341 = arith.constant 26 : index
    %c0_342 = arith.constant 0 : index
    %c0_343 = arith.constant 0 : index
    %520 = vector.load %arg6[%c26_341, %c0_342, %c0_343] : memref<48x1x8xf32, #tpu.memory_space<vmem>>, vector<1x1x8xf32>
    %521 = vector.shape_cast %520 : vector<1x1x8xf32> to vector<1x8xf32>
    %c30_344 = arith.constant 30 : index
    %c0_345 = arith.constant 0 : index
    %c0_346 = arith.constant 0 : index
    %522 = vector.load %arg6[%c30_344, %c0_345, %c0_346] : memref<48x1x8xf32, #tpu.memory_space<vmem>>, vector<1x1x8xf32>
    %523 = vector.shape_cast %522 : vector<1x1x8xf32> to vector<1x8xf32>
    %c34_347 = arith.constant 34 : index
    %c0_348 = arith.constant 0 : index
    %c0_349 = arith.constant 0 : index
    %524 = vector.load %arg6[%c34_347, %c0_348, %c0_349] : memref<48x1x8xf32, #tpu.memory_space<vmem>>, vector<1x1x8xf32>
    %525 = vector.shape_cast %524 : vector<1x1x8xf32> to vector<1x8xf32>
    %cst_350 = arith.constant dense<0.000000e+00> : vector<8x8xf32>
    %526 = tpu.matmul %434, %515, %cst_350 {dimension_numbers = #tpu.dot_dimension_numbers<[1], [0], [0], [1], [0, 0, 1, 1], [], []>} : vector<8x32xf32>, vector<32x8xf32>, vector<8x8xf32> -> vector<8x8xf32>
    %527 = vector.broadcast %521 : vector<1x8xf32> to vector<8x8xf32>
    %528 = arith.addf %526, %527 : vector<8x8xf32>
    %cst_351 = arith.constant 0.353553385 : f32
    %529 = vector.broadcast %cst_351 : f32 to vector<8x8xf32>
    %530 = arith.mulf %528, %529 : vector<8x8xf32>
    %cst_352 = arith.constant dense<0.000000e+00> : vector<8x8xf32>
    %531 = tpu.matmul %434, %517, %cst_352 {dimension_numbers = #tpu.dot_dimension_numbers<[1], [0], [0], [1], [0, 0, 1, 1], [], []>} : vector<8x32xf32>, vector<32x8xf32>, vector<8x8xf32> -> vector<8x8xf32>
    %532 = vector.broadcast %523 : vector<1x8xf32> to vector<8x8xf32>
    %533 = arith.addf %531, %532 : vector<8x8xf32>
    %cst_353 = arith.constant dense<0.000000e+00> : vector<8x8xf32>
    %534 = tpu.matmul %433, %519, %cst_353 {dimension_numbers = #tpu.dot_dimension_numbers<[1], [0], [0], [1], [0, 0, 1, 1], [], []>} : vector<8x32xf32>, vector<32x8xf32>, vector<8x8xf32> -> vector<8x8xf32>
    %535 = vector.broadcast %525 : vector<1x8xf32> to vector<8x8xf32>
    %536 = arith.addf %534, %535 : vector<8x8xf32>
    %537 = tpu.transpose %533, [1, 0] : vector<8x8xf32> -> vector<8x8xf32>
    %cst_354 = arith.constant dense<0.000000e+00> : vector<8x8xf32>
    %538 = tpu.matmul %530, %537, %cst_354 {dimension_numbers = #tpu.dot_dimension_numbers<[1], [0], [0], [1], [0, 0, 1, 1], [], []>} : vector<8x8xf32>, vector<8x8xf32>, vector<8x8xf32> -> vector<8x8xf32>
    %cst_355 = arith.constant dense<0xFF800000> : vector<8xf32>
    %539 = vector.multi_reduction <maximumf>, %538, %cst_355 [1] : vector<8x8xf32> to vector<8xf32>
    %540 = vector.shape_cast %539 : vector<8xf32> to vector<8x1xf32>
    %541 = vector.broadcast %540 : vector<8x1xf32> to vector<8x8xf32>
    %542 = arith.subf %538, %541 : vector<8x8xf32>
    %543 = math.exp %542 : vector<8x8xf32>
    %cst_356 = arith.constant dense<0.000000e+00> : vector<8xf32>
    %544 = vector.multi_reduction <add>, %543, %cst_356 [1] : vector<8x8xf32> to vector<8xf32>
    %545 = vector.shape_cast %544 : vector<8xf32> to vector<8x1xf32>
    %546 = tpu.reciprocal %545 {approx = true} : vector<8x1xf32> -> vector<8x1xf32>
    %547 = vector.broadcast %546 : vector<8x1xf32> to vector<8x8xf32>
    %548 = arith.mulf %543, %547 : vector<8x8xf32>
    %cst_357 = arith.constant dense<0.000000e+00> : vector<8x8xf32>
    %549 = tpu.matmul %548, %536, %cst_357 {dimension_numbers = #tpu.dot_dimension_numbers<[1], [0], [0], [1], [0, 0, 1, 1], [], []>} : vector<8x8xf32>, vector<8x8xf32>, vector<8x8xf32> -> vector<8x8xf32>
    %c10_358 = arith.constant 10 : index
    %c0_359 = arith.constant 0 : index
    %c0_360 = arith.constant 0 : index
    %550 = vector.load %arg7[%c10_358, %c0_359, %c0_360] : memref<16x8x32xf32, #tpu.memory_space<vmem>>, vector<1x8x32xf32>
    %551 = vector.shape_cast %550 : vector<1x8x32xf32> to vector<8x32xf32>
    %cst_361 = arith.constant dense<0.000000e+00> : vector<8x32xf32>
    %552 = tpu.matmul %549, %551, %cst_361 {dimension_numbers = #tpu.dot_dimension_numbers<[1], [0], [0], [1], [0, 0, 1, 1], [], []>} : vector<8x8xf32>, vector<8x32xf32>, vector<8x32xf32> -> vector<8x32xf32>
    %553 = arith.addf %513, %552 : vector<8x32xf32>
    %c27 = arith.constant 27 : index
    %c0_362 = arith.constant 0 : index
    %c0_363 = arith.constant 0 : index
    %554 = vector.load %arg5[%c27, %c0_362, %c0_363] : memref<48x32x8xf32, #tpu.memory_space<vmem>>, vector<1x32x8xf32>
    %555 = vector.shape_cast %554 : vector<1x32x8xf32> to vector<32x8xf32>
    %c31 = arith.constant 31 : index
    %c0_364 = arith.constant 0 : index
    %c0_365 = arith.constant 0 : index
    %556 = vector.load %arg5[%c31, %c0_364, %c0_365] : memref<48x32x8xf32, #tpu.memory_space<vmem>>, vector<1x32x8xf32>
    %557 = vector.shape_cast %556 : vector<1x32x8xf32> to vector<32x8xf32>
    %c35 = arith.constant 35 : index
    %c0_366 = arith.constant 0 : index
    %c0_367 = arith.constant 0 : index
    %558 = vector.load %arg5[%c35, %c0_366, %c0_367] : memref<48x32x8xf32, #tpu.memory_space<vmem>>, vector<1x32x8xf32>
    %559 = vector.shape_cast %558 : vector<1x32x8xf32> to vector<32x8xf32>
    %c27_368 = arith.constant 27 : index
    %c0_369 = arith.constant 0 : index
    %c0_370 = arith.constant 0 : index
    %560 = vector.load %arg6[%c27_368, %c0_369, %c0_370] : memref<48x1x8xf32, #tpu.memory_space<vmem>>, vector<1x1x8xf32>
    %561 = vector.shape_cast %560 : vector<1x1x8xf32> to vector<1x8xf32>
    %c31_371 = arith.constant 31 : index
    %c0_372 = arith.constant 0 : index
    %c0_373 = arith.constant 0 : index
    %562 = vector.load %arg6[%c31_371, %c0_372, %c0_373] : memref<48x1x8xf32, #tpu.memory_space<vmem>>, vector<1x1x8xf32>
    %563 = vector.shape_cast %562 : vector<1x1x8xf32> to vector<1x8xf32>
    %c35_374 = arith.constant 35 : index
    %c0_375 = arith.constant 0 : index
    %c0_376 = arith.constant 0 : index
    %564 = vector.load %arg6[%c35_374, %c0_375, %c0_376] : memref<48x1x8xf32, #tpu.memory_space<vmem>>, vector<1x1x8xf32>
    %565 = vector.shape_cast %564 : vector<1x1x8xf32> to vector<1x8xf32>
    %cst_377 = arith.constant dense<0.000000e+00> : vector<8x8xf32>
    %566 = tpu.matmul %434, %555, %cst_377 {dimension_numbers = #tpu.dot_dimension_numbers<[1], [0], [0], [1], [0, 0, 1, 1], [], []>} : vector<8x32xf32>, vector<32x8xf32>, vector<8x8xf32> -> vector<8x8xf32>
    %567 = vector.broadcast %561 : vector<1x8xf32> to vector<8x8xf32>
    %568 = arith.addf %566, %567 : vector<8x8xf32>
    %cst_378 = arith.constant 0.353553385 : f32
    %569 = vector.broadcast %cst_378 : f32 to vector<8x8xf32>
    %570 = arith.mulf %568, %569 : vector<8x8xf32>
    %cst_379 = arith.constant dense<0.000000e+00> : vector<8x8xf32>
    %571 = tpu.matmul %434, %557, %cst_379 {dimension_numbers = #tpu.dot_dimension_numbers<[1], [0], [0], [1], [0, 0, 1, 1], [], []>} : vector<8x32xf32>, vector<32x8xf32>, vector<8x8xf32> -> vector<8x8xf32>
    %572 = vector.broadcast %563 : vector<1x8xf32> to vector<8x8xf32>
    %573 = arith.addf %571, %572 : vector<8x8xf32>
    %cst_380 = arith.constant dense<0.000000e+00> : vector<8x8xf32>
    %574 = tpu.matmul %433, %559, %cst_380 {dimension_numbers = #tpu.dot_dimension_numbers<[1], [0], [0], [1], [0, 0, 1, 1], [], []>} : vector<8x32xf32>, vector<32x8xf32>, vector<8x8xf32> -> vector<8x8xf32>
    %575 = vector.broadcast %565 : vector<1x8xf32> to vector<8x8xf32>
    %576 = arith.addf %574, %575 : vector<8x8xf32>
    %577 = tpu.transpose %573, [1, 0] : vector<8x8xf32> -> vector<8x8xf32>
    %cst_381 = arith.constant dense<0.000000e+00> : vector<8x8xf32>
    %578 = tpu.matmul %570, %577, %cst_381 {dimension_numbers = #tpu.dot_dimension_numbers<[1], [0], [0], [1], [0, 0, 1, 1], [], []>} : vector<8x8xf32>, vector<8x8xf32>, vector<8x8xf32> -> vector<8x8xf32>
    %cst_382 = arith.constant dense<0xFF800000> : vector<8xf32>
    %579 = vector.multi_reduction <maximumf>, %578, %cst_382 [1] : vector<8x8xf32> to vector<8xf32>
    %580 = vector.shape_cast %579 : vector<8xf32> to vector<8x1xf32>
    %581 = vector.broadcast %580 : vector<8x1xf32> to vector<8x8xf32>
    %582 = arith.subf %578, %581 : vector<8x8xf32>
    %583 = math.exp %582 : vector<8x8xf32>
    %cst_383 = arith.constant dense<0.000000e+00> : vector<8xf32>
    %584 = vector.multi_reduction <add>, %583, %cst_383 [1] : vector<8x8xf32> to vector<8xf32>
    %585 = vector.shape_cast %584 : vector<8xf32> to vector<8x1xf32>
    %586 = tpu.reciprocal %585 {approx = true} : vector<8x1xf32> -> vector<8x1xf32>
    %587 = vector.broadcast %586 : vector<8x1xf32> to vector<8x8xf32>
    %588 = arith.mulf %583, %587 : vector<8x8xf32>
    %cst_384 = arith.constant dense<0.000000e+00> : vector<8x8xf32>
    %589 = tpu.matmul %588, %576, %cst_384 {dimension_numbers = #tpu.dot_dimension_numbers<[1], [0], [0], [1], [0, 0, 1, 1], [], []>} : vector<8x8xf32>, vector<8x8xf32>, vector<8x8xf32> -> vector<8x8xf32>
    %c11_385 = arith.constant 11 : index
    %c0_386 = arith.constant 0 : index
    %c0_387 = arith.constant 0 : index
    %590 = vector.load %arg7[%c11_385, %c0_386, %c0_387] : memref<16x8x32xf32, #tpu.memory_space<vmem>>, vector<1x8x32xf32>
    %591 = vector.shape_cast %590 : vector<1x8x32xf32> to vector<8x32xf32>
    %cst_388 = arith.constant dense<0.000000e+00> : vector<8x32xf32>
    %592 = tpu.matmul %589, %591, %cst_388 {dimension_numbers = #tpu.dot_dimension_numbers<[1], [0], [0], [1], [0, 0, 1, 1], [], []>} : vector<8x8xf32>, vector<8x32xf32>, vector<8x32xf32> -> vector<8x32xf32>
    %593 = arith.addf %553, %592 : vector<8x32xf32>
    %c2_389 = arith.constant 2 : index
    %c0_390 = arith.constant 0 : index
    %c0_391 = arith.constant 0 : index
    %594 = vector.load %arg8[%c2_389, %c0_390, %c0_391] : memref<4x1x32xf32, #tpu.memory_space<vmem>>, vector<1x1x32xf32>
    %595 = vector.shape_cast %594 : vector<1x1x32xf32> to vector<1x32xf32>
    %596 = vector.broadcast %595 : vector<1x32xf32> to vector<8x32xf32>
    %597 = arith.addf %593, %596 : vector<8x32xf32>
    %598 = arith.addf %433, %597 : vector<8x32xf32>
    %cst_392 = arith.constant dense<0.000000e+00> : vector<8xf32>
    %599 = vector.multi_reduction <add>, %598, %cst_392 [1] : vector<8x32xf32> to vector<8xf32>
    %600 = vector.shape_cast %599 : vector<8xf32> to vector<8x1xf32>
    %cst_393 = arith.constant 3.200000e+01 : f32
    %601 = vector.broadcast %cst_393 : f32 to vector<8x1xf32>
    %602 = arith.divf %600, %601 : vector<8x1xf32>
    %603 = vector.broadcast %602 : vector<8x1xf32> to vector<8x32xf32>
    %604 = arith.subf %598, %603 : vector<8x32xf32>
    %605 = arith.mulf %604, %604 : vector<8x32xf32>
    %cst_394 = arith.constant dense<0.000000e+00> : vector<8xf32>
    %606 = vector.multi_reduction <add>, %605, %cst_394 [1] : vector<8x32xf32> to vector<8xf32>
    %607 = vector.shape_cast %606 : vector<8xf32> to vector<8x1xf32>
    %cst_395 = arith.constant 3.200000e+01 : f32
    %608 = vector.broadcast %cst_395 : f32 to vector<8x1xf32>
    %609 = arith.divf %607, %608 : vector<8x1xf32>
    %610 = vector.broadcast %602 : vector<8x1xf32> to vector<8x32xf32>
    %611 = arith.subf %598, %610 : vector<8x32xf32>
    %cst_396 = arith.constant 9.99999974E-6 : f32
    %612 = vector.broadcast %cst_396 : f32 to vector<8x1xf32>
    %613 = arith.addf %609, %612 : vector<8x1xf32>
    %614 = math.rsqrt %613 : vector<8x1xf32>
    %615 = vector.broadcast %614 : vector<8x1xf32> to vector<8x32xf32>
    %616 = arith.mulf %611, %615 : vector<8x32xf32>
    %c3_397 = arith.constant 3 : index
    %c0_398 = arith.constant 0 : index
    %c0_399 = arith.constant 0 : index
    %617 = vector.load %arg13[%c3_397, %c0_398, %c0_399] : memref<7x1x32xf32, #tpu.memory_space<vmem>>, vector<1x1x32xf32>
    %618 = vector.shape_cast %617 : vector<1x1x32xf32> to vector<1x32xf32>
    %619 = vector.broadcast %618 : vector<1x32xf32> to vector<8x32xf32>
    %620 = arith.mulf %616, %619 : vector<8x32xf32>
    %c3_400 = arith.constant 3 : index
    %c0_401 = arith.constant 0 : index
    %c0_402 = arith.constant 0 : index
    %621 = vector.load %arg14[%c3_400, %c0_401, %c0_402] : memref<7x1x32xf32, #tpu.memory_space<vmem>>, vector<1x1x32xf32>
    %622 = vector.shape_cast %621 : vector<1x1x32xf32> to vector<1x32xf32>
    %623 = vector.broadcast %622 : vector<1x32xf32> to vector<8x32xf32>
    %624 = arith.addf %620, %623 : vector<8x32xf32>
    %625 = arith.addf %624, %5 : vector<8x32xf32>
    %c36 = arith.constant 36 : index
    %c0_403 = arith.constant 0 : index
    %c0_404 = arith.constant 0 : index
    %626 = vector.load %arg5[%c36, %c0_403, %c0_404] : memref<48x32x8xf32, #tpu.memory_space<vmem>>, vector<1x32x8xf32>
    %627 = vector.shape_cast %626 : vector<1x32x8xf32> to vector<32x8xf32>
    %c40 = arith.constant 40 : index
    %c0_405 = arith.constant 0 : index
    %c0_406 = arith.constant 0 : index
    %628 = vector.load %arg5[%c40, %c0_405, %c0_406] : memref<48x32x8xf32, #tpu.memory_space<vmem>>, vector<1x32x8xf32>
    %629 = vector.shape_cast %628 : vector<1x32x8xf32> to vector<32x8xf32>
    %c44 = arith.constant 44 : index
    %c0_407 = arith.constant 0 : index
    %c0_408 = arith.constant 0 : index
    %630 = vector.load %arg5[%c44, %c0_407, %c0_408] : memref<48x32x8xf32, #tpu.memory_space<vmem>>, vector<1x32x8xf32>
    %631 = vector.shape_cast %630 : vector<1x32x8xf32> to vector<32x8xf32>
    %c36_409 = arith.constant 36 : index
    %c0_410 = arith.constant 0 : index
    %c0_411 = arith.constant 0 : index
    %632 = vector.load %arg6[%c36_409, %c0_410, %c0_411] : memref<48x1x8xf32, #tpu.memory_space<vmem>>, vector<1x1x8xf32>
    %633 = vector.shape_cast %632 : vector<1x1x8xf32> to vector<1x8xf32>
    %c40_412 = arith.constant 40 : index
    %c0_413 = arith.constant 0 : index
    %c0_414 = arith.constant 0 : index
    %634 = vector.load %arg6[%c40_412, %c0_413, %c0_414] : memref<48x1x8xf32, #tpu.memory_space<vmem>>, vector<1x1x8xf32>
    %635 = vector.shape_cast %634 : vector<1x1x8xf32> to vector<1x8xf32>
    %c44_415 = arith.constant 44 : index
    %c0_416 = arith.constant 0 : index
    %c0_417 = arith.constant 0 : index
    %636 = vector.load %arg6[%c44_415, %c0_416, %c0_417] : memref<48x1x8xf32, #tpu.memory_space<vmem>>, vector<1x1x8xf32>
    %637 = vector.shape_cast %636 : vector<1x1x8xf32> to vector<1x8xf32>
    %cst_418 = arith.constant dense<0.000000e+00> : vector<8x8xf32>
    %638 = tpu.matmul %625, %627, %cst_418 {dimension_numbers = #tpu.dot_dimension_numbers<[1], [0], [0], [1], [0, 0, 1, 1], [], []>} : vector<8x32xf32>, vector<32x8xf32>, vector<8x8xf32> -> vector<8x8xf32>
    %639 = vector.broadcast %633 : vector<1x8xf32> to vector<8x8xf32>
    %640 = arith.addf %638, %639 : vector<8x8xf32>
    %cst_419 = arith.constant 0.353553385 : f32
    %641 = vector.broadcast %cst_419 : f32 to vector<8x8xf32>
    %642 = arith.mulf %640, %641 : vector<8x8xf32>
    %cst_420 = arith.constant dense<0.000000e+00> : vector<16x8xf32>
    %643 = tpu.matmul %8, %629, %cst_420 {dimension_numbers = #tpu.dot_dimension_numbers<[1], [0], [0], [1], [0, 0, 1, 1], [], []>} : vector<16x32xf32>, vector<32x8xf32>, vector<16x8xf32> -> vector<16x8xf32>
    %644 = vector.broadcast %635 : vector<1x8xf32> to vector<16x8xf32>
    %645 = arith.addf %643, %644 : vector<16x8xf32>
    %cst_421 = arith.constant dense<0.000000e+00> : vector<16x8xf32>
    %646 = tpu.matmul %3, %631, %cst_421 {dimension_numbers = #tpu.dot_dimension_numbers<[1], [0], [0], [1], [0, 0, 1, 1], [], []>} : vector<16x32xf32>, vector<32x8xf32>, vector<16x8xf32> -> vector<16x8xf32>
    %647 = vector.broadcast %637 : vector<1x8xf32> to vector<16x8xf32>
    %648 = arith.addf %646, %647 : vector<16x8xf32>
    %649 = tpu.transpose %645, [1, 0] : vector<16x8xf32> -> vector<8x16xf32>
    %cst_422 = arith.constant dense<0.000000e+00> : vector<8x16xf32>
    %650 = tpu.matmul %642, %649, %cst_422 {dimension_numbers = #tpu.dot_dimension_numbers<[1], [0], [0], [1], [0, 0, 1, 1], [], []>} : vector<8x8xf32>, vector<8x16xf32>, vector<8x16xf32> -> vector<8x16xf32>
    %cst_423 = arith.constant dense<0xFF800000> : vector<8xf32>
    %651 = vector.multi_reduction <maximumf>, %650, %cst_423 [1] : vector<8x16xf32> to vector<8xf32>
    %652 = vector.shape_cast %651 : vector<8xf32> to vector<8x1xf32>
    %653 = vector.broadcast %652 : vector<8x1xf32> to vector<8x16xf32>
    %654 = arith.subf %650, %653 : vector<8x16xf32>
    %655 = math.exp %654 : vector<8x16xf32>
    %cst_424 = arith.constant dense<0.000000e+00> : vector<8xf32>
    %656 = vector.multi_reduction <add>, %655, %cst_424 [1] : vector<8x16xf32> to vector<8xf32>
    %657 = vector.shape_cast %656 : vector<8xf32> to vector<8x1xf32>
    %658 = tpu.reciprocal %657 {approx = true} : vector<8x1xf32> -> vector<8x1xf32>
    %659 = vector.broadcast %658 : vector<8x1xf32> to vector<8x16xf32>
    %660 = arith.mulf %655, %659 : vector<8x16xf32>
    %cst_425 = arith.constant dense<0.000000e+00> : vector<8x8xf32>
    %661 = tpu.matmul %660, %648, %cst_425 {dimension_numbers = #tpu.dot_dimension_numbers<[1], [0], [0], [1], [0, 0, 1, 1], [], []>} : vector<8x16xf32>, vector<16x8xf32>, vector<8x8xf32> -> vector<8x8xf32>
    %c12_426 = arith.constant 12 : index
    %c0_427 = arith.constant 0 : index
    %c0_428 = arith.constant 0 : index
    %662 = vector.load %arg7[%c12_426, %c0_427, %c0_428] : memref<16x8x32xf32, #tpu.memory_space<vmem>>, vector<1x8x32xf32>
    %663 = vector.shape_cast %662 : vector<1x8x32xf32> to vector<8x32xf32>
    %cst_429 = arith.constant dense<0.000000e+00> : vector<8x32xf32>
    %664 = tpu.matmul %661, %663, %cst_429 {dimension_numbers = #tpu.dot_dimension_numbers<[1], [0], [0], [1], [0, 0, 1, 1], [], []>} : vector<8x8xf32>, vector<8x32xf32>, vector<8x32xf32> -> vector<8x32xf32>
    %c37 = arith.constant 37 : index
    %c0_430 = arith.constant 0 : index
    %c0_431 = arith.constant 0 : index
    %665 = vector.load %arg5[%c37, %c0_430, %c0_431] : memref<48x32x8xf32, #tpu.memory_space<vmem>>, vector<1x32x8xf32>
    %666 = vector.shape_cast %665 : vector<1x32x8xf32> to vector<32x8xf32>
    %c41 = arith.constant 41 : index
    %c0_432 = arith.constant 0 : index
    %c0_433 = arith.constant 0 : index
    %667 = vector.load %arg5[%c41, %c0_432, %c0_433] : memref<48x32x8xf32, #tpu.memory_space<vmem>>, vector<1x32x8xf32>
    %668 = vector.shape_cast %667 : vector<1x32x8xf32> to vector<32x8xf32>
    %c45 = arith.constant 45 : index
    %c0_434 = arith.constant 0 : index
    %c0_435 = arith.constant 0 : index
    %669 = vector.load %arg5[%c45, %c0_434, %c0_435] : memref<48x32x8xf32, #tpu.memory_space<vmem>>, vector<1x32x8xf32>
    %670 = vector.shape_cast %669 : vector<1x32x8xf32> to vector<32x8xf32>
    %c37_436 = arith.constant 37 : index
    %c0_437 = arith.constant 0 : index
    %c0_438 = arith.constant 0 : index
    %671 = vector.load %arg6[%c37_436, %c0_437, %c0_438] : memref<48x1x8xf32, #tpu.memory_space<vmem>>, vector<1x1x8xf32>
    %672 = vector.shape_cast %671 : vector<1x1x8xf32> to vector<1x8xf32>
    %c41_439 = arith.constant 41 : index
    %c0_440 = arith.constant 0 : index
    %c0_441 = arith.constant 0 : index
    %673 = vector.load %arg6[%c41_439, %c0_440, %c0_441] : memref<48x1x8xf32, #tpu.memory_space<vmem>>, vector<1x1x8xf32>
    %674 = vector.shape_cast %673 : vector<1x1x8xf32> to vector<1x8xf32>
    %c45_442 = arith.constant 45 : index
    %c0_443 = arith.constant 0 : index
    %c0_444 = arith.constant 0 : index
    %675 = vector.load %arg6[%c45_442, %c0_443, %c0_444] : memref<48x1x8xf32, #tpu.memory_space<vmem>>, vector<1x1x8xf32>
    %676 = vector.shape_cast %675 : vector<1x1x8xf32> to vector<1x8xf32>
    %cst_445 = arith.constant dense<0.000000e+00> : vector<8x8xf32>
    %677 = tpu.matmul %625, %666, %cst_445 {dimension_numbers = #tpu.dot_dimension_numbers<[1], [0], [0], [1], [0, 0, 1, 1], [], []>} : vector<8x32xf32>, vector<32x8xf32>, vector<8x8xf32> -> vector<8x8xf32>
    %678 = vector.broadcast %672 : vector<1x8xf32> to vector<8x8xf32>
    %679 = arith.addf %677, %678 : vector<8x8xf32>
    %cst_446 = arith.constant 0.353553385 : f32
    %680 = vector.broadcast %cst_446 : f32 to vector<8x8xf32>
    %681 = arith.mulf %679, %680 : vector<8x8xf32>
    %cst_447 = arith.constant dense<0.000000e+00> : vector<16x8xf32>
    %682 = tpu.matmul %8, %668, %cst_447 {dimension_numbers = #tpu.dot_dimension_numbers<[1], [0], [0], [1], [0, 0, 1, 1], [], []>} : vector<16x32xf32>, vector<32x8xf32>, vector<16x8xf32> -> vector<16x8xf32>
    %683 = vector.broadcast %674 : vector<1x8xf32> to vector<16x8xf32>
    %684 = arith.addf %682, %683 : vector<16x8xf32>
    %cst_448 = arith.constant dense<0.000000e+00> : vector<16x8xf32>
    %685 = tpu.matmul %3, %670, %cst_448 {dimension_numbers = #tpu.dot_dimension_numbers<[1], [0], [0], [1], [0, 0, 1, 1], [], []>} : vector<16x32xf32>, vector<32x8xf32>, vector<16x8xf32> -> vector<16x8xf32>
    %686 = vector.broadcast %676 : vector<1x8xf32> to vector<16x8xf32>
    %687 = arith.addf %685, %686 : vector<16x8xf32>
    %688 = tpu.transpose %684, [1, 0] : vector<16x8xf32> -> vector<8x16xf32>
    %cst_449 = arith.constant dense<0.000000e+00> : vector<8x16xf32>
    %689 = tpu.matmul %681, %688, %cst_449 {dimension_numbers = #tpu.dot_dimension_numbers<[1], [0], [0], [1], [0, 0, 1, 1], [], []>} : vector<8x8xf32>, vector<8x16xf32>, vector<8x16xf32> -> vector<8x16xf32>
    %cst_450 = arith.constant dense<0xFF800000> : vector<8xf32>
    %690 = vector.multi_reduction <maximumf>, %689, %cst_450 [1] : vector<8x16xf32> to vector<8xf32>
    %691 = vector.shape_cast %690 : vector<8xf32> to vector<8x1xf32>
    %692 = vector.broadcast %691 : vector<8x1xf32> to vector<8x16xf32>
    %693 = arith.subf %689, %692 : vector<8x16xf32>
    %694 = math.exp %693 : vector<8x16xf32>
    %cst_451 = arith.constant dense<0.000000e+00> : vector<8xf32>
    %695 = vector.multi_reduction <add>, %694, %cst_451 [1] : vector<8x16xf32> to vector<8xf32>
    %696 = vector.shape_cast %695 : vector<8xf32> to vector<8x1xf32>
    %697 = tpu.reciprocal %696 {approx = true} : vector<8x1xf32> -> vector<8x1xf32>
    %698 = vector.broadcast %697 : vector<8x1xf32> to vector<8x16xf32>
    %699 = arith.mulf %694, %698 : vector<8x16xf32>
    %cst_452 = arith.constant dense<0.000000e+00> : vector<8x8xf32>
    %700 = tpu.matmul %699, %687, %cst_452 {dimension_numbers = #tpu.dot_dimension_numbers<[1], [0], [0], [1], [0, 0, 1, 1], [], []>} : vector<8x16xf32>, vector<16x8xf32>, vector<8x8xf32> -> vector<8x8xf32>
    %c13_453 = arith.constant 13 : index
    %c0_454 = arith.constant 0 : index
    %c0_455 = arith.constant 0 : index
    %701 = vector.load %arg7[%c13_453, %c0_454, %c0_455] : memref<16x8x32xf32, #tpu.memory_space<vmem>>, vector<1x8x32xf32>
    %702 = vector.shape_cast %701 : vector<1x8x32xf32> to vector<8x32xf32>
    %cst_456 = arith.constant dense<0.000000e+00> : vector<8x32xf32>
    %703 = tpu.matmul %700, %702, %cst_456 {dimension_numbers = #tpu.dot_dimension_numbers<[1], [0], [0], [1], [0, 0, 1, 1], [], []>} : vector<8x8xf32>, vector<8x32xf32>, vector<8x32xf32> -> vector<8x32xf32>
    %704 = arith.addf %664, %703 : vector<8x32xf32>
    %c38 = arith.constant 38 : index
    %c0_457 = arith.constant 0 : index
    %c0_458 = arith.constant 0 : index
    %705 = vector.load %arg5[%c38, %c0_457, %c0_458] : memref<48x32x8xf32, #tpu.memory_space<vmem>>, vector<1x32x8xf32>
    %706 = vector.shape_cast %705 : vector<1x32x8xf32> to vector<32x8xf32>
    %c42 = arith.constant 42 : index
    %c0_459 = arith.constant 0 : index
    %c0_460 = arith.constant 0 : index
    %707 = vector.load %arg5[%c42, %c0_459, %c0_460] : memref<48x32x8xf32, #tpu.memory_space<vmem>>, vector<1x32x8xf32>
    %708 = vector.shape_cast %707 : vector<1x32x8xf32> to vector<32x8xf32>
    %c46 = arith.constant 46 : index
    %c0_461 = arith.constant 0 : index
    %c0_462 = arith.constant 0 : index
    %709 = vector.load %arg5[%c46, %c0_461, %c0_462] : memref<48x32x8xf32, #tpu.memory_space<vmem>>, vector<1x32x8xf32>
    %710 = vector.shape_cast %709 : vector<1x32x8xf32> to vector<32x8xf32>
    %c38_463 = arith.constant 38 : index
    %c0_464 = arith.constant 0 : index
    %c0_465 = arith.constant 0 : index
    %711 = vector.load %arg6[%c38_463, %c0_464, %c0_465] : memref<48x1x8xf32, #tpu.memory_space<vmem>>, vector<1x1x8xf32>
    %712 = vector.shape_cast %711 : vector<1x1x8xf32> to vector<1x8xf32>
    %c42_466 = arith.constant 42 : index
    %c0_467 = arith.constant 0 : index
    %c0_468 = arith.constant 0 : index
    %713 = vector.load %arg6[%c42_466, %c0_467, %c0_468] : memref<48x1x8xf32, #tpu.memory_space<vmem>>, vector<1x1x8xf32>
    %714 = vector.shape_cast %713 : vector<1x1x8xf32> to vector<1x8xf32>
    %c46_469 = arith.constant 46 : index
    %c0_470 = arith.constant 0 : index
    %c0_471 = arith.constant 0 : index
    %715 = vector.load %arg6[%c46_469, %c0_470, %c0_471] : memref<48x1x8xf32, #tpu.memory_space<vmem>>, vector<1x1x8xf32>
    %716 = vector.shape_cast %715 : vector<1x1x8xf32> to vector<1x8xf32>
    %cst_472 = arith.constant dense<0.000000e+00> : vector<8x8xf32>
    %717 = tpu.matmul %625, %706, %cst_472 {dimension_numbers = #tpu.dot_dimension_numbers<[1], [0], [0], [1], [0, 0, 1, 1], [], []>} : vector<8x32xf32>, vector<32x8xf32>, vector<8x8xf32> -> vector<8x8xf32>
    %718 = vector.broadcast %712 : vector<1x8xf32> to vector<8x8xf32>
    %719 = arith.addf %717, %718 : vector<8x8xf32>
    %cst_473 = arith.constant 0.353553385 : f32
    %720 = vector.broadcast %cst_473 : f32 to vector<8x8xf32>
    %721 = arith.mulf %719, %720 : vector<8x8xf32>
    %cst_474 = arith.constant dense<0.000000e+00> : vector<16x8xf32>
    %722 = tpu.matmul %8, %708, %cst_474 {dimension_numbers = #tpu.dot_dimension_numbers<[1], [0], [0], [1], [0, 0, 1, 1], [], []>} : vector<16x32xf32>, vector<32x8xf32>, vector<16x8xf32> -> vector<16x8xf32>
    %723 = vector.broadcast %714 : vector<1x8xf32> to vector<16x8xf32>
    %724 = arith.addf %722, %723 : vector<16x8xf32>
    %cst_475 = arith.constant dense<0.000000e+00> : vector<16x8xf32>
    %725 = tpu.matmul %3, %710, %cst_475 {dimension_numbers = #tpu.dot_dimension_numbers<[1], [0], [0], [1], [0, 0, 1, 1], [], []>} : vector<16x32xf32>, vector<32x8xf32>, vector<16x8xf32> -> vector<16x8xf32>
    %726 = vector.broadcast %716 : vector<1x8xf32> to vector<16x8xf32>
    %727 = arith.addf %725, %726 : vector<16x8xf32>
    %728 = tpu.transpose %724, [1, 0] : vector<16x8xf32> -> vector<8x16xf32>
    %cst_476 = arith.constant dense<0.000000e+00> : vector<8x16xf32>
    %729 = tpu.matmul %721, %728, %cst_476 {dimension_numbers = #tpu.dot_dimension_numbers<[1], [0], [0], [1], [0, 0, 1, 1], [], []>} : vector<8x8xf32>, vector<8x16xf32>, vector<8x16xf32> -> vector<8x16xf32>
    %cst_477 = arith.constant dense<0xFF800000> : vector<8xf32>
    %730 = vector.multi_reduction <maximumf>, %729, %cst_477 [1] : vector<8x16xf32> to vector<8xf32>
    %731 = vector.shape_cast %730 : vector<8xf32> to vector<8x1xf32>
    %732 = vector.broadcast %731 : vector<8x1xf32> to vector<8x16xf32>
    %733 = arith.subf %729, %732 : vector<8x16xf32>
    %734 = math.exp %733 : vector<8x16xf32>
    %cst_478 = arith.constant dense<0.000000e+00> : vector<8xf32>
    %735 = vector.multi_reduction <add>, %734, %cst_478 [1] : vector<8x16xf32> to vector<8xf32>
    %736 = vector.shape_cast %735 : vector<8xf32> to vector<8x1xf32>
    %737 = tpu.reciprocal %736 {approx = true} : vector<8x1xf32> -> vector<8x1xf32>
    %738 = vector.broadcast %737 : vector<8x1xf32> to vector<8x16xf32>
    %739 = arith.mulf %734, %738 : vector<8x16xf32>
    %cst_479 = arith.constant dense<0.000000e+00> : vector<8x8xf32>
    %740 = tpu.matmul %739, %727, %cst_479 {dimension_numbers = #tpu.dot_dimension_numbers<[1], [0], [0], [1], [0, 0, 1, 1], [], []>} : vector<8x16xf32>, vector<16x8xf32>, vector<8x8xf32> -> vector<8x8xf32>
    %c14_480 = arith.constant 14 : index
    %c0_481 = arith.constant 0 : index
    %c0_482 = arith.constant 0 : index
    %741 = vector.load %arg7[%c14_480, %c0_481, %c0_482] : memref<16x8x32xf32, #tpu.memory_space<vmem>>, vector<1x8x32xf32>
    %742 = vector.shape_cast %741 : vector<1x8x32xf32> to vector<8x32xf32>
    %cst_483 = arith.constant dense<0.000000e+00> : vector<8x32xf32>
    %743 = tpu.matmul %740, %742, %cst_483 {dimension_numbers = #tpu.dot_dimension_numbers<[1], [0], [0], [1], [0, 0, 1, 1], [], []>} : vector<8x8xf32>, vector<8x32xf32>, vector<8x32xf32> -> vector<8x32xf32>
    %744 = arith.addf %704, %743 : vector<8x32xf32>
    %c39 = arith.constant 39 : index
    %c0_484 = arith.constant 0 : index
    %c0_485 = arith.constant 0 : index
    %745 = vector.load %arg5[%c39, %c0_484, %c0_485] : memref<48x32x8xf32, #tpu.memory_space<vmem>>, vector<1x32x8xf32>
    %746 = vector.shape_cast %745 : vector<1x32x8xf32> to vector<32x8xf32>
    %c43 = arith.constant 43 : index
    %c0_486 = arith.constant 0 : index
    %c0_487 = arith.constant 0 : index
    %747 = vector.load %arg5[%c43, %c0_486, %c0_487] : memref<48x32x8xf32, #tpu.memory_space<vmem>>, vector<1x32x8xf32>
    %748 = vector.shape_cast %747 : vector<1x32x8xf32> to vector<32x8xf32>
    %c47 = arith.constant 47 : index
    %c0_488 = arith.constant 0 : index
    %c0_489 = arith.constant 0 : index
    %749 = vector.load %arg5[%c47, %c0_488, %c0_489] : memref<48x32x8xf32, #tpu.memory_space<vmem>>, vector<1x32x8xf32>
    %750 = vector.shape_cast %749 : vector<1x32x8xf32> to vector<32x8xf32>
    %c39_490 = arith.constant 39 : index
    %c0_491 = arith.constant 0 : index
    %c0_492 = arith.constant 0 : index
    %751 = vector.load %arg6[%c39_490, %c0_491, %c0_492] : memref<48x1x8xf32, #tpu.memory_space<vmem>>, vector<1x1x8xf32>
    %752 = vector.shape_cast %751 : vector<1x1x8xf32> to vector<1x8xf32>
    %c43_493 = arith.constant 43 : index
    %c0_494 = arith.constant 0 : index
    %c0_495 = arith.constant 0 : index
    %753 = vector.load %arg6[%c43_493, %c0_494, %c0_495] : memref<48x1x8xf32, #tpu.memory_space<vmem>>, vector<1x1x8xf32>
    %754 = vector.shape_cast %753 : vector<1x1x8xf32> to vector<1x8xf32>
    %c47_496 = arith.constant 47 : index
    %c0_497 = arith.constant 0 : index
    %c0_498 = arith.constant 0 : index
    %755 = vector.load %arg6[%c47_496, %c0_497, %c0_498] : memref<48x1x8xf32, #tpu.memory_space<vmem>>, vector<1x1x8xf32>
    %756 = vector.shape_cast %755 : vector<1x1x8xf32> to vector<1x8xf32>
    %cst_499 = arith.constant dense<0.000000e+00> : vector<8x8xf32>
    %757 = tpu.matmul %625, %746, %cst_499 {dimension_numbers = #tpu.dot_dimension_numbers<[1], [0], [0], [1], [0, 0, 1, 1], [], []>} : vector<8x32xf32>, vector<32x8xf32>, vector<8x8xf32> -> vector<8x8xf32>
    %758 = vector.broadcast %752 : vector<1x8xf32> to vector<8x8xf32>
    %759 = arith.addf %757, %758 : vector<8x8xf32>
    %cst_500 = arith.constant 0.353553385 : f32
    %760 = vector.broadcast %cst_500 : f32 to vector<8x8xf32>
    %761 = arith.mulf %759, %760 : vector<8x8xf32>
    %cst_501 = arith.constant dense<0.000000e+00> : vector<16x8xf32>
    %762 = tpu.matmul %8, %748, %cst_501 {dimension_numbers = #tpu.dot_dimension_numbers<[1], [0], [0], [1], [0, 0, 1, 1], [], []>} : vector<16x32xf32>, vector<32x8xf32>, vector<16x8xf32> -> vector<16x8xf32>
    %763 = vector.broadcast %754 : vector<1x8xf32> to vector<16x8xf32>
    %764 = arith.addf %762, %763 : vector<16x8xf32>
    %cst_502 = arith.constant dense<0.000000e+00> : vector<16x8xf32>
    %765 = tpu.matmul %3, %750, %cst_502 {dimension_numbers = #tpu.dot_dimension_numbers<[1], [0], [0], [1], [0, 0, 1, 1], [], []>} : vector<16x32xf32>, vector<32x8xf32>, vector<16x8xf32> -> vector<16x8xf32>
    %766 = vector.broadcast %756 : vector<1x8xf32> to vector<16x8xf32>
    %767 = arith.addf %765, %766 : vector<16x8xf32>
    %768 = tpu.transpose %764, [1, 0] : vector<16x8xf32> -> vector<8x16xf32>
    %cst_503 = arith.constant dense<0.000000e+00> : vector<8x16xf32>
    %769 = tpu.matmul %761, %768, %cst_503 {dimension_numbers = #tpu.dot_dimension_numbers<[1], [0], [0], [1], [0, 0, 1, 1], [], []>} : vector<8x8xf32>, vector<8x16xf32>, vector<8x16xf32> -> vector<8x16xf32>
    %cst_504 = arith.constant dense<0xFF800000> : vector<8xf32>
    %770 = vector.multi_reduction <maximumf>, %769, %cst_504 [1] : vector<8x16xf32> to vector<8xf32>
    %771 = vector.shape_cast %770 : vector<8xf32> to vector<8x1xf32>
    %772 = vector.broadcast %771 : vector<8x1xf32> to vector<8x16xf32>
    %773 = arith.subf %769, %772 : vector<8x16xf32>
    %774 = math.exp %773 : vector<8x16xf32>
    %cst_505 = arith.constant dense<0.000000e+00> : vector<8xf32>
    %775 = vector.multi_reduction <add>, %774, %cst_505 [1] : vector<8x16xf32> to vector<8xf32>
    %776 = vector.shape_cast %775 : vector<8xf32> to vector<8x1xf32>
    %777 = tpu.reciprocal %776 {approx = true} : vector<8x1xf32> -> vector<8x1xf32>
    %778 = vector.broadcast %777 : vector<8x1xf32> to vector<8x16xf32>
    %779 = arith.mulf %774, %778 : vector<8x16xf32>
    %cst_506 = arith.constant dense<0.000000e+00> : vector<8x8xf32>
    %780 = tpu.matmul %779, %767, %cst_506 {dimension_numbers = #tpu.dot_dimension_numbers<[1], [0], [0], [1], [0, 0, 1, 1], [], []>} : vector<8x16xf32>, vector<16x8xf32>, vector<8x8xf32> -> vector<8x8xf32>
    %c15_507 = arith.constant 15 : index
    %c0_508 = arith.constant 0 : index
    %c0_509 = arith.constant 0 : index
    %781 = vector.load %arg7[%c15_507, %c0_508, %c0_509] : memref<16x8x32xf32, #tpu.memory_space<vmem>>, vector<1x8x32xf32>
    %782 = vector.shape_cast %781 : vector<1x8x32xf32> to vector<8x32xf32>
    %cst_510 = arith.constant dense<0.000000e+00> : vector<8x32xf32>
    %783 = tpu.matmul %780, %782, %cst_510 {dimension_numbers = #tpu.dot_dimension_numbers<[1], [0], [0], [1], [0, 0, 1, 1], [], []>} : vector<8x8xf32>, vector<8x32xf32>, vector<8x32xf32> -> vector<8x32xf32>
    %784 = arith.addf %744, %783 : vector<8x32xf32>
    %c3_511 = arith.constant 3 : index
    %c0_512 = arith.constant 0 : index
    %c0_513 = arith.constant 0 : index
    %785 = vector.load %arg8[%c3_511, %c0_512, %c0_513] : memref<4x1x32xf32, #tpu.memory_space<vmem>>, vector<1x1x32xf32>
    %786 = vector.shape_cast %785 : vector<1x1x32xf32> to vector<1x32xf32>
    %787 = vector.broadcast %786 : vector<1x32xf32> to vector<8x32xf32>
    %788 = arith.addf %784, %787 : vector<8x32xf32>
    %789 = arith.addf %624, %788 : vector<8x32xf32>
    %cst_514 = arith.constant dense<0.000000e+00> : vector<8xf32>
    %790 = vector.multi_reduction <add>, %789, %cst_514 [1] : vector<8x32xf32> to vector<8xf32>
    %791 = vector.shape_cast %790 : vector<8xf32> to vector<8x1xf32>
    %cst_515 = arith.constant 3.200000e+01 : f32
    %792 = vector.broadcast %cst_515 : f32 to vector<8x1xf32>
    %793 = arith.divf %791, %792 : vector<8x1xf32>
    %794 = vector.broadcast %793 : vector<8x1xf32> to vector<8x32xf32>
    %795 = arith.subf %789, %794 : vector<8x32xf32>
    %796 = arith.mulf %795, %795 : vector<8x32xf32>
    %cst_516 = arith.constant dense<0.000000e+00> : vector<8xf32>
    %797 = vector.multi_reduction <add>, %796, %cst_516 [1] : vector<8x32xf32> to vector<8xf32>
    %798 = vector.shape_cast %797 : vector<8xf32> to vector<8x1xf32>
    %cst_517 = arith.constant 3.200000e+01 : f32
    %799 = vector.broadcast %cst_517 : f32 to vector<8x1xf32>
    %800 = arith.divf %798, %799 : vector<8x1xf32>
    %801 = vector.broadcast %793 : vector<8x1xf32> to vector<8x32xf32>
    %802 = arith.subf %789, %801 : vector<8x32xf32>
    %cst_518 = arith.constant 9.99999974E-6 : f32
    %803 = vector.broadcast %cst_518 : f32 to vector<8x1xf32>
    %804 = arith.addf %800, %803 : vector<8x1xf32>
    %805 = math.rsqrt %804 : vector<8x1xf32>
    %806 = vector.broadcast %805 : vector<8x1xf32> to vector<8x32xf32>
    %807 = arith.mulf %802, %806 : vector<8x32xf32>
    %c4_519 = arith.constant 4 : index
    %c0_520 = arith.constant 0 : index
    %c0_521 = arith.constant 0 : index
    %808 = vector.load %arg13[%c4_519, %c0_520, %c0_521] : memref<7x1x32xf32, #tpu.memory_space<vmem>>, vector<1x1x32xf32>
    %809 = vector.shape_cast %808 : vector<1x1x32xf32> to vector<1x32xf32>
    %810 = vector.broadcast %809 : vector<1x32xf32> to vector<8x32xf32>
    %811 = arith.mulf %807, %810 : vector<8x32xf32>
    %c4_522 = arith.constant 4 : index
    %c0_523 = arith.constant 0 : index
    %c0_524 = arith.constant 0 : index
    %812 = vector.load %arg14[%c4_522, %c0_523, %c0_524] : memref<7x1x32xf32, #tpu.memory_space<vmem>>, vector<1x1x32xf32>
    %813 = vector.shape_cast %812 : vector<1x1x32xf32> to vector<1x32xf32>
    %814 = vector.broadcast %813 : vector<1x32xf32> to vector<8x32xf32>
    %815 = arith.addf %811, %814 : vector<8x32xf32>
    %c1_525 = arith.constant 1 : index
    %c0_526 = arith.constant 0 : index
    %c0_527 = arith.constant 0 : index
    %816 = vector.load %arg9[%c1_525, %c0_526, %c0_527] : memref<2x32x64xf32, #tpu.memory_space<vmem>>, vector<1x32x64xf32>
    %817 = vector.shape_cast %816 : vector<1x32x64xf32> to vector<32x64xf32>
    %cst_528 = arith.constant dense<0.000000e+00> : vector<8x64xf32>
    %818 = tpu.matmul %815, %817, %cst_528 {dimension_numbers = #tpu.dot_dimension_numbers<[1], [0], [0], [1], [0, 0, 1, 1], [], []>} : vector<8x32xf32>, vector<32x64xf32>, vector<8x64xf32> -> vector<8x64xf32>
    %c1_529 = arith.constant 1 : index
    %c0_530 = arith.constant 0 : index
    %c0_531 = arith.constant 0 : index
    %819 = vector.load %arg10[%c1_529, %c0_530, %c0_531] : memref<2x1x64xf32, #tpu.memory_space<vmem>>, vector<1x1x64xf32>
    %820 = vector.shape_cast %819 : vector<1x1x64xf32> to vector<1x64xf32>
    %821 = vector.broadcast %820 : vector<1x64xf32> to vector<8x64xf32>
    %822 = arith.addf %818, %821 : vector<8x64xf32>
    %cst_532 = arith.constant 0.000000e+00 : f32
    %823 = vector.broadcast %cst_532 : f32 to vector<8x64xf32>
    %824 = arith.maximumf %822, %823 : vector<8x64xf32>
    %c1_533 = arith.constant 1 : index
    %c0_534 = arith.constant 0 : index
    %c0_535 = arith.constant 0 : index
    %825 = vector.load %arg11[%c1_533, %c0_534, %c0_535] : memref<2x64x32xf32, #tpu.memory_space<vmem>>, vector<1x64x32xf32>
    %826 = vector.shape_cast %825 : vector<1x64x32xf32> to vector<64x32xf32>
    %cst_536 = arith.constant dense<0.000000e+00> : vector<8x32xf32>
    %827 = tpu.matmul %824, %826, %cst_536 {dimension_numbers = #tpu.dot_dimension_numbers<[1], [0], [0], [1], [0, 0, 1, 1], [], []>} : vector<8x64xf32>, vector<64x32xf32>, vector<8x32xf32> -> vector<8x32xf32>
    %c1_537 = arith.constant 1 : index
    %c0_538 = arith.constant 0 : index
    %c0_539 = arith.constant 0 : index
    %828 = vector.load %arg12[%c1_537, %c0_538, %c0_539] : memref<2x1x32xf32, #tpu.memory_space<vmem>>, vector<1x1x32xf32>
    %829 = vector.shape_cast %828 : vector<1x1x32xf32> to vector<1x32xf32>
    %830 = vector.broadcast %829 : vector<1x32xf32> to vector<8x32xf32>
    %831 = arith.addf %827, %830 : vector<8x32xf32>
    %832 = arith.addf %815, %831 : vector<8x32xf32>
    %cst_540 = arith.constant dense<0.000000e+00> : vector<8xf32>
    %833 = vector.multi_reduction <add>, %832, %cst_540 [1] : vector<8x32xf32> to vector<8xf32>
    %834 = vector.shape_cast %833 : vector<8xf32> to vector<8x1xf32>
    %cst_541 = arith.constant 3.200000e+01 : f32
    %835 = vector.broadcast %cst_541 : f32 to vector<8x1xf32>
    %836 = arith.divf %834, %835 : vector<8x1xf32>
    %837 = vector.broadcast %836 : vector<8x1xf32> to vector<8x32xf32>
    %838 = arith.subf %832, %837 : vector<8x32xf32>
    %839 = arith.mulf %838, %838 : vector<8x32xf32>
    %cst_542 = arith.constant dense<0.000000e+00> : vector<8xf32>
    %840 = vector.multi_reduction <add>, %839, %cst_542 [1] : vector<8x32xf32> to vector<8xf32>
    %841 = vector.shape_cast %840 : vector<8xf32> to vector<8x1xf32>
    %cst_543 = arith.constant 3.200000e+01 : f32
    %842 = vector.broadcast %cst_543 : f32 to vector<8x1xf32>
    %843 = arith.divf %841, %842 : vector<8x1xf32>
    %844 = vector.broadcast %836 : vector<8x1xf32> to vector<8x32xf32>
    %845 = arith.subf %832, %844 : vector<8x32xf32>
    %cst_544 = arith.constant 9.99999974E-6 : f32
    %846 = vector.broadcast %cst_544 : f32 to vector<8x1xf32>
    %847 = arith.addf %843, %846 : vector<8x1xf32>
    %848 = math.rsqrt %847 : vector<8x1xf32>
    %849 = vector.broadcast %848 : vector<8x1xf32> to vector<8x32xf32>
    %850 = arith.mulf %845, %849 : vector<8x32xf32>
    %c5_545 = arith.constant 5 : index
    %c0_546 = arith.constant 0 : index
    %c0_547 = arith.constant 0 : index
    %851 = vector.load %arg13[%c5_545, %c0_546, %c0_547] : memref<7x1x32xf32, #tpu.memory_space<vmem>>, vector<1x1x32xf32>
    %852 = vector.shape_cast %851 : vector<1x1x32xf32> to vector<1x32xf32>
    %853 = vector.broadcast %852 : vector<1x32xf32> to vector<8x32xf32>
    %854 = arith.mulf %850, %853 : vector<8x32xf32>
    %c5_548 = arith.constant 5 : index
    %c0_549 = arith.constant 0 : index
    %c0_550 = arith.constant 0 : index
    %855 = vector.load %arg14[%c5_548, %c0_549, %c0_550] : memref<7x1x32xf32, #tpu.memory_space<vmem>>, vector<1x1x32xf32>
    %856 = vector.shape_cast %855 : vector<1x1x32xf32> to vector<1x32xf32>
    %857 = vector.broadcast %856 : vector<1x32xf32> to vector<8x32xf32>
    %858 = arith.addf %854, %857 : vector<8x32xf32>
    %cst_551 = arith.constant dense<0.000000e+00> : vector<8xf32>
    %859 = vector.multi_reduction <add>, %858, %cst_551 [1] : vector<8x32xf32> to vector<8xf32>
    %860 = vector.shape_cast %859 : vector<8xf32> to vector<8x1xf32>
    %cst_552 = arith.constant 3.200000e+01 : f32
    %861 = vector.broadcast %cst_552 : f32 to vector<8x1xf32>
    %862 = arith.divf %860, %861 : vector<8x1xf32>
    %863 = vector.broadcast %862 : vector<8x1xf32> to vector<8x32xf32>
    %864 = arith.subf %858, %863 : vector<8x32xf32>
    %865 = arith.mulf %864, %864 : vector<8x32xf32>
    %cst_553 = arith.constant dense<0.000000e+00> : vector<8xf32>
    %866 = vector.multi_reduction <add>, %865, %cst_553 [1] : vector<8x32xf32> to vector<8xf32>
    %867 = vector.shape_cast %866 : vector<8xf32> to vector<8x1xf32>
    %cst_554 = arith.constant 3.200000e+01 : f32
    %868 = vector.broadcast %cst_554 : f32 to vector<8x1xf32>
    %869 = arith.divf %867, %868 : vector<8x1xf32>
    %870 = vector.broadcast %862 : vector<8x1xf32> to vector<8x32xf32>
    %871 = arith.subf %858, %870 : vector<8x32xf32>
    %cst_555 = arith.constant 9.99999974E-6 : f32
    %872 = vector.broadcast %cst_555 : f32 to vector<8x1xf32>
    %873 = arith.addf %869, %872 : vector<8x1xf32>
    %874 = math.rsqrt %873 : vector<8x1xf32>
    %875 = vector.broadcast %874 : vector<8x1xf32> to vector<8x32xf32>
    %876 = arith.mulf %871, %875 : vector<8x32xf32>
    %c6_556 = arith.constant 6 : index
    %c0_557 = arith.constant 0 : index
    %c0_558 = arith.constant 0 : index
    %877 = vector.load %arg13[%c6_556, %c0_557, %c0_558] : memref<7x1x32xf32, #tpu.memory_space<vmem>>, vector<1x1x32xf32>
    %878 = vector.shape_cast %877 : vector<1x1x32xf32> to vector<1x32xf32>
    %879 = vector.broadcast %878 : vector<1x32xf32> to vector<8x32xf32>
    %880 = arith.mulf %876, %879 : vector<8x32xf32>
    %c6_559 = arith.constant 6 : index
    %c0_560 = arith.constant 0 : index
    %c0_561 = arith.constant 0 : index
    %881 = vector.load %arg14[%c6_559, %c0_560, %c0_561] : memref<7x1x32xf32, #tpu.memory_space<vmem>>, vector<1x1x32xf32>
    %882 = vector.shape_cast %881 : vector<1x1x32xf32> to vector<1x32xf32>
    %883 = vector.broadcast %882 : vector<1x32xf32> to vector<8x32xf32>
    %884 = arith.addf %880, %883 : vector<8x32xf32>
    %c0_562 = arith.constant 0 : index
    %c0_563 = arith.constant 0 : index
    %c0_564 = arith.constant 0 : index
    %885 = vector.load %arg15[%c0_562, %c0_563, %c0_564] : memref<1x8x32xf32, #tpu.memory_space<vmem>>, vector<1x8x32xf32>
    %886 = vector.shape_cast %885 : vector<1x8x32xf32> to vector<8x32xf32>
    %887 = vector.shape_cast %884 : vector<8x32xf32> to vector<1x8x32xf32>
    tpu.vector_store %arg15[%c0_562, %c0_563, %c0_564], %887 {strides = array<i32>} : memref<1x8x32xf32, #tpu.memory_space<vmem>>, vector<1x8x32xf32>,
    return
  }
  func.func @transform_0(%arg0: i32) -> (i32, i32, i32) {
    %c0_i32 = arith.constant 0 : i32
    %c0_i32_0 = arith.constant 0 : i32
    %c0_i32_1 = arith.constant 0 : i32
    return %arg0, %c0_i32, %c0_i32_0 : i32, i32, i32
  }
  func.func @transform_1(%arg0: i32) -> (i32, i32, i32) {
    %c0_i32 = arith.constant 0 : i32
    %c0_i32_0 = arith.constant 0 : i32
    %c0_i32_1 = arith.constant 0 : i32
    return %arg0, %c0_i32, %c0_i32_0 : i32, i32, i32
  }
  func.func @transform_2(%arg0: i32) -> (i32, i32, i32) {
    %c0_i32 = arith.constant 0 : i32
    %c0_i32_0 = arith.constant 0 : i32
    %c0_i32_1 = arith.constant 0 : i32
    return %arg0, %c0_i32, %c0_i32_0 : i32, i32, i32
  }
  func.func @transform_3(%arg0: i32) -> (i32, i32, i32) {
    %c0_i32 = arith.constant 0 : i32
    %c0_i32_0 = arith.constant 0 : i32
    %c0_i32_1 = arith.constant 0 : i32
    return %arg0, %c0_i32, %c0_i32_0 : i32, i32, i32
  }
  func.func @transform_4(%arg0: i32) -> (i32, i32, i32) {
    %c0_i32 = arith.constant 0 : i32
    %c0_i32_0 = arith.constant 0 : i32
    %c0_i32_1 = arith.constant 0 : i32
    %c0_i32_2 = arith.constant 0 : i32
    return %c0_i32, %c0_i32_0, %c0_i32_1 : i32, i32, i32
  }
  func.func @transform_5(%arg0: i32) -> (i32, i32, i32) {
    %c0_i32 = arith.constant 0 : i32
    %c0_i32_0 = arith.constant 0 : i32
    %c0_i32_1 = arith.constant 0 : i32
    %c0_i32_2 = arith.constant 0 : i32
    return %c0_i32, %c0_i32_0, %c0_i32_1 : i32, i32, i32
  }
  func.func @transform_6(%arg0: i32) -> (i32, i32, i32) {
    %c0_i32 = arith.constant 0 : i32
    %c0_i32_0 = arith.constant 0 : i32
    %c0_i32_1 = arith.constant 0 : i32
    %c0_i32_2 = arith.constant 0 : i32
    return %c0_i32, %c0_i32_0, %c0_i32_1 : i32, i32, i32
  }
  func.func @transform_7(%arg0: i32) -> (i32, i32, i32) {
    %c0_i32 = arith.constant 0 : i32
    %c0_i32_0 = arith.constant 0 : i32
    %c0_i32_1 = arith.constant 0 : i32
    %c0_i32_2 = arith.constant 0 : i32
    return %c0_i32, %c0_i32_0, %c0_i32_1 : i32, i32, i32
  }
  func.func @transform_8(%arg0: i32) -> (i32, i32, i32) {
    %c0_i32 = arith.constant 0 : i32
    %c0_i32_0 = arith.constant 0 : i32
    %c0_i32_1 = arith.constant 0 : i32
    %c0_i32_2 = arith.constant 0 : i32
    return %c0_i32, %c0_i32_0, %c0_i32_1 : i32, i32, i32
  }
  func.func @transform_9(%arg0: i32) -> (i32, i32, i32) {
    %c0_i32 = arith.constant 0 : i32
    %c0_i32_0 = arith.constant 0 : i32
    %c0_i32_1 = arith.constant 0 : i32
    %c0_i32_2 = arith.constant 0 : i32
    return %c0_i32, %c0_i32_0, %c0_i32_1 : i32, i32, i32
  }
  func.func @transform_10(%arg0: i32) -> (i32, i32, i32) {
    %c0_i32 = arith.constant 0 : i32
    %c0_i32_0 = arith.constant 0 : i32
    %c0_i32_1 = arith.constant 0 : i32
    %c0_i32_2 = arith.constant 0 : i32
    return %c0_i32, %c0_i32_0, %c0_i32_1 : i32, i32, i32
  }
  func.func @transform_11(%arg0: i32) -> (i32, i32, i32) {
    %c0_i32 = arith.constant 0 : i32
    %c0_i32_0 = arith.constant 0 : i32
    %c0_i32_1 = arith.constant 0 : i32
    %c0_i32_2 = arith.constant 0 : i32
    return %c0_i32, %c0_i32_0, %c0_i32_1 : i32, i32, i32
  }
  func.func @transform_12(%arg0: i32) -> (i32, i32, i32) {
    %c0_i32 = arith.constant 0 : i32
    %c0_i32_0 = arith.constant 0 : i32
    %c0_i32_1 = arith.constant 0 : i32
    %c0_i32_2 = arith.constant 0 : i32
    return %c0_i32, %c0_i32_0, %c0_i32_1 : i32, i32, i32
  }
  func.func @transform_13(%arg0: i32) -> (i32, i32, i32) {
    %c0_i32 = arith.constant 0 : i32
    %c0_i32_0 = arith.constant 0 : i32
    %c0_i32_1 = arith.constant 0 : i32
    %c0_i32_2 = arith.constant 0 : i32
    return %c0_i32, %c0_i32_0, %c0_i32_1 : i32, i32, i32
  }
  func.func @transform_14(%arg0: i32) -> (i32, i32, i32) {
    %c0_i32 = arith.constant 0 : i32
    %c0_i32_0 = arith.constant 0 : i32
    %c0_i32_1 = arith.constant 0 : i32
    return %arg0, %c0_i32, %c0_i32_0 : i32, i32, i32
  }
}

</mosaic_0001>

<bundles_post_ra>
// kernel: transformer_decoder_forward.1
= control target key start
LH: loop header
LB: loop body
LE: loop exit
PB: predicated region body
PF: predicated region fallthrough
CT: control target
= control target key end

     0   :  { %s6095_s0 = inlined_call_operand.vmem [shape: f32[2,8,32], index: 0, kind: input, shape index: {}]   ;;  %s6096_s1 = inlined_call_operand.vmem [shape: f32[2,16,32], index: 1, kind: input, shape index: {}]   ;;  %s6097_s2 = inlined_call_operand.vmem [shape: f32[2,16,32], index: 2, kind: input, shape index: {}]   ;;  %s6098_s3 = inlined_call_operand.vmem [shape: f32[2,8,32], index: 3, kind: input, shape index: {}]   ;;  %s6099_s4 = inlined_call_operand.vmem [shape: f32[48,32,8], index: 4, kind: input, shape index: {}]   ;;  %s6100_s5 = inlined_call_operand.vmem [shape: f32[48,1,8], index: 5, kind: input, shape index: {}]   ;;  %s6101_s6 = inlined_call_operand.vmem [shape: f32[16,8,32], index: 6, kind: input, shape index: {}]   ;;  %s6102_s7 = inlined_call_operand.vmem [shape: f32[4,1,32], index: 7, kind: input, shape index: {}]   ;;  %s6103_s8 = inlined_call_operand.vmem [shape: f32[2,32,64], index: 8, kind: input, shape index: {}]   ;;  %s6104_s9 = inlined_call_operand.vmem [shape: f32[2,1,64], index: 9, kind: input, shape index: {}]   ;;  %s6105_s10 = inlined_call_operand.vmem [shape: f32[2,64,32], index: 10, kind: input, shape index: {}]   ;;  %s6106_s11 = inlined_call_operand.vmem [shape: f32[2,1,32], index: 11, kind: input, shape index: {}]   ;;  %s6107_s12 = inlined_call_operand.vmem [shape: f32[7,1,32], index: 12, kind: input, shape index: {}]   ;;  %s6108_s13 = inlined_call_operand.vmem [shape: f32[7,1,32], index: 13, kind: input, shape index: {}]   ;;  %s6109_s14 = inlined_call_operand.hbm [shape: f32[2,8,32], index: 14, kind: output, shape index: {}]  }
   0x1   :  { %6114 = sst [smem:[#allocation9_spill]] %s6095_s0 }
   0x2   :  { %6115 = sst [smem:[#allocation10_spill]] %s6098_s3 }
   0x3   :  { %19 = vsyncpa [#allocation3], 0 }
   0x4   :  { %21 = vsyncpa [#allocation3 + $0x1], 0  ;;  %s4750_s29 = smov 0   ;;  %s4752_s30 = smov 0  }
   0x5   :  { %s4754_s15 = smov 0   ;;  %s4756_s16 = smov 0  }
   0x6 LB: > { %6116 = sst [smem:[#allocation5_spill]] %s4668_s15  ;;  %s4771_s17 = sadd.s32 4294967295, %s4672_s16   ;;  %s4672_s16 = sphi %s4756_s16, %s6125_s16   ;;  %s4668_s15 = sphi %s4754_s15, %s6127_s15   ;;  %s4664_s30 = sphi %s4752_s30, %s6129_s30   ;;  %s4660_s29 = sphi %s4750_s29, %s6128_s29  }
   0x7   : > { %s3981_s18 = sadd.s32 4294967294, %s4672_s16   ;;  %s4775_s19 = sadd.s32 1, %s4672_s16  }
   0x8   : > { %6117 = sst [smem:[#allocation6_spill]] %s4775_s19  ;;  %s348_s20 = sadd.s32 1, %s4668_s15 }
   0x9   : > { %s345_s21 = ssub.s32 %s4672_s16, %s4775_s19  ;;  %p358_p0 = scmp.ne.s32.totalorder %s4668_s15, %s4664_s30 }
   0xa   : > { %p346_p1 = scmp.eq.s32.totalorder %s345_s21, 0  ;;  %p359_p2 = scmp.eq.s32.totalorder %s4771_s17, 1 }
   0xb   : > { %p364_p3 = scmp.ne.s32.totalorder %s4664_s30, %s4660_s29  ;;  %p365_p4 = scmp.eq.s32.totalorder %s3981_s18, 1 }
   0xc   : > { %s4786_s22 = scalar_select %p346_p1, %s4668_s15, %s348_s20  }
   0xd   : > { %p4788_p5 = por %p359_p2, %p358_p0  ;;  %p4792_p6 = por %p365_p4, %p364_p3 }
   0xe   : > { %6118 = sst [smem:[#allocation7_spill]] %s4786_s22  ;;  %p3984_p7 = scmp.ge.s32.totalorder %s4672_s16, 1 }
   0xf   : > { %s6120_s24 = scalar_select %p4792_p6, 1, 0 }
  0x10   : > { %p443_p8 = scmp.lt.s32.totalorder %s4672_s16, 3 }
  0x11   : > { %6121 = sst [smem:[#allocation8_spill]] %s6120_s24 }
  0x12   : > { %p444_p9 = pnand %p3984_p7, %p443_p8 }
  0x13   : > { %p502_p10 = scmp.lt.s32.totalorder (!%p444_p9), %s4771_s17, 1  ;;  %s6122_s0 = sld [smem:[#allocation9_spill]] (!%p444_p9) }
  0x14   : > { %447 = sbr.rel (%p444_p9) target bundleno = 11364 (0x2c64), region = 76  ;;  %s6123_s3 = sld [smem:[#allocation10_spill]] (!%p444_p9) }
  0x19   : > { %v3995_v0 = vld [vmem:[%s6099_s4 + $0x98] sm:$0xff]  ;;  %v3994_v2 = vld [vmem:[%s6099_s4 + $0x90] sm:$0xff]  ;;  %v3993_v4 = vld [vmem:[%s6099_s4 + $0x88] sm:$0xff]  ;;  %s4821_s18 = scalar_select %p502_p10, %s4771_s17, 1  ;;  %vm551_vm0 = vcmask 261120   ;;  %vm625_vm1 = vcmask 64512  }
  0x1a   : > { %v532_v1 = vld [vmem:[%s6099_s4 + $0x18] sm:$0xff]  ;;  %591 = vmatpush.msra.mxu1 %v3995_v0  ;;  %v531_v3 = vld [vmem:[%s6099_s4 + $0x10] sm:$0xff]  ;;  %v530_v5 = vld [vmem:[%s6099_s4 + $0x8] sm:$0xff]  ;;  %vm1427_vm6 = vcmask 130048   ;;  %vm2129_vm10 = vcmask 523264  }
  0x1b   : > { %567 = vmatpush.msra.mxu0 %v532_v1  ;;  %v3992_v6 = vld [vmem:[%s6099_s4 + $0x80] sm:$0xff]  ;;  %s3986_s21 = sshll.u32 %s4821_s18, 3  ;;  %v3999_v18 = vld [vmem:[%s6099_s4 + $0x118] sm:$0xff]  ;;  %v3998_v19 = vld [vmem:[%s6099_s4 + $0x110] sm:$0xff]  ;;  %s4415_s15 = sshll.u32 %s4821_s18, 4 }
  0x1c   : > { %592 = vmatpush.msra.mxu1 %v3994_v2  ;;  %v529_v7 = vld [vmem:[%s6099_s4] sm:$0xff]  ;;  %s505_s19 = scalar_lea.vmem %s6122_s0, %s3986_s21  ;;  %s4833_s27 = scalar_lea.vmem %s6123_s3, %s3986_s21  ;;  %617 = vmatpush.msra.mxu2 %v3999_v18  ;;  %v3997_v20 = vld [vmem:[%s6099_s4 + $0x108] sm:$0xff]  ;;  %v4015_v24 = vld [vmem:[%s6099_s4 + $0xb8] sm:$0xff] }
  0x1d   : > { %568 = vmatpush.msra.mxu0 %v531_v3  ;;  %v4835_v8 = vld [vmem:[%s505_s19] sm:$0xff]  ;;  %v4011_v25 = vld [vmem:[%s6099_s4 + $0x38] sm:$0xff]  ;;  %v4014_v26 = vld [vmem:[%s6099_s4 + $0xb0] sm:$0xff]  ;;  %s5085_s20 = scalar_lea.vmem %s6096_s1, %s4415_s15  ;;  %s515_s18 = scalar_lea.vmem %s6097_s2, %s4415_s15 }
  0x1e   : > { %593 = vmatpush.msra.mxu1 %v3993_v4  ;;  %v4838_v9 = vld [vmem:[%s4833_s27] sm:$0xff]  ;;  %618 = vmatpush.msra.mxu2 %v3998_v19  ;;  %v4010_v27 = vld [vmem:[%s6099_s4 + $0x30] sm:$0xff]  ;;  %v4013_v28 = vld [vmem:[%s6099_s4 + $0xa8] sm:$0xff]  ;;  %s499_s0 = sand.u32 1, %s4664_s30  }
  0x1f   : > { %569 = vmatpush.msra.mxu0 %v530_v5  ;;  %v4842_v10 = vadd.f32 %v4838_v9, %v4835_v8  ;;  %v4457_v11 = vld [vmem:[%s6100_s5] ss:$0 sm:$0xff]  ;;  %v4458_v12 = vld [vmem:[%s6100_s5 + $0x4] ss:$0 sm:$0xff]  ;;  %v4009_v29 = vld [vmem:[%s6099_s4 + $0x28] sm:$0xff]  ;;  %s3985_s24 = sshll.u32 %s499_s0, 3 }
  0x20   : > { %594 = vmatpush.msra.mxu1 %v3992_v6  ;;  %619 = vmatpush.msra.mxu2 %v3997_v20  ;;  %v3996_v23 = vld [vmem:[%s6099_s4 + $0x100] sm:$0xff]  ;;  %v4459_v37 = vld [vmem:[%s6100_s5 + $0x8] ss:$0 sm:$0xff]  ;;  %v4019_v43 = vld [vmem:[%s6099_s4 + $0x138] sm:$0xff]  ;;  %s501_s26 = scalar_lea.vmem [#allocation2], %s3985_s24  ;;  %s3871_s15 = scalar_lea.sflag [#allocation3], %s499_s0 }
  0x21   : > { %570 = vmatpush.msra.mxu0 %v529_v7  ;;  %4003 = vmatmul.msk.f32.vlgmr.msra.gmra.mxu1 %vm551_vm0, %v4842_v10  ;;  %v4012_v30 = vld [vmem:[%s6099_s4 + $0xa0] sm:$0xff]  ;;  %v4018_v44 = vld [vmem:[%s6099_s4 + $0x130] sm:$0xff]  ;;  %v4017_v45 = vld [vmem:[%s6099_s4 + $0x128] sm:$0xff]  ;;  %s4630_s24 = scalar_lea.hbm %s6109_s14, 16 }
  0x22   : > { %4002 = vmatmul.msk.f32.vlgmr.msra.gmra.mxu0 %vm551_vm0, %v4842_v10  ;;  %620 = vmatpush.msra.mxu2 %v3996_v23  ;;  %v4008_v31 = vld [vmem:[%s6099_s4 + $0x20] sm:$0xff]  ;;  %v4462_v55 = vld [vmem:[%s6100_s5 + $0x9] ss:$0 sm:$0xff]  ;;  %v4035_v2 = vld [vmem:[%s6099_s4 + $0x58] sm:$0xff] }
  0x23   : > { %4004 = vmatmul.msk.f32.vlgmr.msra.gmra.mxu2 %vm551_vm0, %v4835_v8  ;;  %747 = vmatpush.msrb.mxu1 %v4015_v24  ;;  %v4460_v40 = vld [vmem:[%s6100_s5 + $0x5] ss:$0 sm:$0xff]  ;;  %v4461_v48 = vld [vmem:[%s6100_s5 + $0x1] ss:$0 sm:$0xff]  ;;  %v4034_v3 = vld [vmem:[%s6099_s4 + $0x50] sm:$0xff] }
  0x24   : > { %723 = vmatpush.msrb.mxu0 %v4011_v25  ;;  %770 = vmatpush.msrb.mxu2 %v4019_v43  ;;  %v4016_v46 = vld [vmem:[%s6099_s4 + $0x120] sm:$0xff]  ;;  %v4033_v4 = vld [vmem:[%s6099_s4 + $0x48] sm:$0xff]  ;;  %v4039_v5 = vld [vmem:[%s6099_s4 + $0xd8] sm:$0xff] }
  0x25   : > { %748 = vmatpush.msrb.mxu1 %v4014_v26  ;;  %v686_v54 = vld [vmem:[%s6101_s6] sm:$0xff]  ;;  %v4038_v7 = vld [vmem:[%s6099_s4 + $0xd0] sm:$0xff]  ;;  %v4060_v43 = vld [vmem:[%s6099_s4 + $0xe8] sm:$0xff] }
  0x26   : > { %724 = vmatpush.msrb.mxu0 %v4010_v27  ;;  %771 = vmatpush.msrb.mxu2 %v4018_v44  ;;  %v4032_v6 = vld [vmem:[%s6099_s4 + $0x40] sm:$0xff] }
  0x27   : > { %749 = vmatpush.msrb.mxu1 %v4013_v28  ;;  %v4464_v18 = vld [vmem:[%s6100_s5 + $0x2] ss:$0 sm:$0xff]  ;;  %v4463_v20 = vld [vmem:[%s6100_s5 + $0x6] ss:$0 sm:$0xff]  ;;  %v4043_v28 = vld [vmem:[%s6099_s4 + $0x158] sm:$0xff] }
  0x28   : > { %725 = vmatpush.msrb.mxu0 %v4009_v29  ;;  %772 = vmatpush.msrb.mxu2 %v4017_v45  ;;  %v4042_v29 = vld [vmem:[%s6099_s4 + $0x150] sm:$0xff]  ;;  %v4059_v44 = vld [vmem:[%s6099_s4 + $0xe0] sm:$0xff]  ;;  %v4058_v45 = vld [vmem:[%s6099_s4 + $0x78] sm:$0xff] }
  0x29   : > { %750 = vmatpush.msrb.mxu1 %v4012_v30  ;;  %v4041_v30 = vld [vmem:[%s6099_s4 + $0x148] sm:$0xff] }
  0x2a   : > { %726 = vmatpush.msrb.mxu0 %v4008_v31  ;;  %4024 = vmatmul.msk.f32.vlgmr.msrb.gmra.mxu1 %vm551_vm0, %v4842_v10  ;;  %v4040_v31 = vld [vmem:[%s6099_s4 + $0x140] sm:$0xff] }
  0x2b   : > { %4023 = vmatmul.msk.f32.vlgmr.msrb.gmra.mxu0 %vm551_vm0, %v4842_v10  ;;  %773 = vmatpush.msrb.mxu2 %v4016_v46  ;;  %v4057_v46 = vld [vmem:[%s6099_s4 + $0x70] sm:$0xff] }
  0x2c   : > { %4025 = vmatmul.msk.f32.vlgmr.msrb.gmra.mxu2 %vm551_vm0, %v4835_v8 }
  0x2d   : > { %881 = vmatpush.msra.mxu2 %v686_v54 }
  0x9e   : > { %v596_v13 = vpop.f32.mrf.mxu1 }
  0x9f   : > { %v572_v14 = vpop.f32.mrf.mxu0  ;;  %v597_v16 = vadd.f32 %v4458_v12, %v596_v13  ;;  %v4036_v12 = vld [vmem:[%s6099_s4 + $0xc0] sm:$0xff] }
  0xa0   : > { %v573_v15 = vadd.f32 %v4457_v11, %v572_v14  ;;  %v4037_v11 = vld [vmem:[%s6099_s4 + $0xc8] sm:$0xff] }
  0xa1   : > { %4005 = vmatpush.xpose.msk.msra.mxu3 %vm625_vm1, %v597_v16  ;;  %v4029_v16 = vld [vmem:[%s6101_s6 + $0x8] sm:$0xff] }
  0xa2   : > { %v575_v17 = vmul.f32 0.35355338, %v573_v15  ;;  %858 = vmatpush.msra.mxu1 %v4029_v16 }
  0xa4   : > { %4006 = vmatmul.msk.f32.vlgmr.msra.gmra.mxu3 %vm625_vm1, %v575_v17  ;;  %969 = vmatpush.msrb.mxu1 %v4043_v28  ;;  %v4674_v28 = vmov 32.0  }
  0xa6   : > { %v622_v38 = vpop.f32.mrf.mxu2  ;;  %970 = vmatpush.msrb.mxu1 %v4042_v29 }
  0xa7   : > { %v623_v39 = vadd.f32 %v4459_v37, %v622_v38  ;;  %v752_v41 = vpop.f32.mrf.mxu1  ;;  %v4465_v38 = vld [vmem:[%s6100_s5 + $0xa] ss:$0 sm:$0xff] }
  0xa8   : > { %v753_v42 = vadd.f32 %v4460_v40, %v752_v41  ;;  %v728_v50 = vpop.f32.mrf.mxu0  ;;  %971 = vmatpush.msrb.mxu1 %v4041_v30 }
  0xa9   : > { %681 = vmatpush.msrb.mxu3 %v623_v39  ;;  %v729_v52 = vadd.f32 %v4461_v48, %v728_v50  ;;  %v4062_v39 = vld [vmem:[%s6099_s4 + $0xf8] sm:$0xff]  ;;  %v4055_v48 = vld [vmem:[%s6099_s4 + $0x60] sm:$0xff] }
  0xaa   : > { %972 = vmatpush.msrb.mxu1 %v4040_v31 }
  0xab   : > { %4026 = vmatpush.xpose.msk.msra.mxu3 %vm625_vm1, %v753_v42  ;;  %v731_v53 = vmul.f32 0.35355338, %v729_v52  ;;  %v4061_v42 = vld [vmem:[%s6099_s4 + $0xf0] sm:$0xff] }
  0xac   : > { %v4053_v52 = vld [vmem:[%s6101_s6 + $0x10] sm:$0xff] }
  0xaf   : > { %v775_v56 = vpop.f32.mrf.mxu2 }
  0xb0   : > { %v776_v57 = vadd.f32 %v4462_v55, %v775_v56 }
  0xb2   : > { %833 = vmatpush.msra.mxu0 %v776_v57 }
  0xb4   : > { %946 = vmatpush.msrb.mxu0 %v4039_v5 }
  0xb6   : > { %947 = vmatpush.msrb.mxu0 %v4038_v7 }
  0xb8   : > { %948 = vmatpush.msrb.mxu0 %v4037_v11  ;;  %v4468_v11 = vld [vmem:[%s6100_s5 + $0xb] ss:$0 sm:$0xff] }
  0xba   : > { %949 = vmatpush.msrb.mxu0 %v4036_v12 }
 0x127   : > { %v649_v21 = vpop.f32.mrf.mxu3 }
 0x128   : > { %v652_v22 = vsel %vm625_vm1, %v649_v21, -inf }
 0x129   : > { %653 = vmax.xlane.f32.xlu0 %v652_v22 }
 0x19c   : > { %v654_v32 = vpop.xlane.xlu0 %653 }
 0x19d   : > { %v655_v33 = vsub.f32 %v649_v21, %v654_v32 }
 0x19f   : > { %v656_v34 = vmul.f32 1.442695, %v655_v33 }
 0x1a1   : > { %4527 = vpow2.f32 %v656_v34 }
 0x1a7   : > { %v4528_v35 = vpop.eup %4527 }
 0x1a8   : > { %v658_v36 = vsel %vm625_vm1, %v4528_v35, 0.0 }
 0x1a9   : > { %659 = vadd.xlane.f32.xlu0 %v658_v36 }
 0x21c   : > { %v660_v47 = vpop.xlane.xlu0 %659 }
 0x21d   : > { %4529 = vrcp.f32 %v660_v47  ;;  %v4056_v47 = vld [vmem:[%s6099_s4 + $0x68] sm:$0xff] }
 0x223   : > { %v4530_v49 = vpop.eup %4529 }
 0x224   : > { %v662_v51 = vmul.f32 %v4530_v49, %v4528_v35 }
 0x226   : > { %4007 = vmatmul.msk.f32.vlgmr.msrb.gmra.mxu3 %vm625_vm1, %v662_v51 }
 0x227   : > { %922 = vmatpush.msrb.mxu3 %v4035_v2  ;;  %v4063_v2 = vld [vmem:[%s6099_s4 + $0x160] sm:$0xff] }
 0x229   : > { %923 = vmatpush.msrb.mxu3 %v4034_v3 }
 0x22b   : > { %924 = vmatpush.msrb.mxu3 %v4033_v4 }
 0x22d   : > { %925 = vmatpush.msrb.mxu3 %v4032_v6 }
 0x22e   : > { %4027 = vmatmul.msk.f32.vlgmr.msra.gmra.mxu3 %vm625_vm1, %v731_v53  ;;  %v4466_v53 = vld [vmem:[%s6100_s5 + $0x7] ss:$0 sm:$0xff] }
 0x236   : > { %4047 = vmatmul.msk.f32.vlgmr.msrb.gmra.mxu3 %vm551_vm0, %v4842_v10 }
 0x2a9   : > { %v683_v58 = vpop.f32.mrf.mxu3 }
 0x2aa   : > { %4031 = vmatmul.msk.f32.vlgmr.msra.gmra.mxu2 %vm625_vm1, %v683_v58 }
 0x2b1   : > { %v801_v59 = vpop.f32.mrf.mxu3 }
 0x2b2   : > { %v804_v60 = vsel %vm625_vm1, %v801_v59, -inf }
 0x2b3   : > { %805 = vmax.xlane.f32.xlu1 %v804_v60  ;;  %v4066_v60 = vld [vmem:[%s6099_s4 + $0x178] sm:$0xff] }
 0x2b9   : > { %v927_v19 = vpop.f32.mrf.mxu3 }
 0x2ba   : > { %v928_v21 = vadd.f32 %v4464_v18, %v927_v19 }
 0x2bc   : > { %v930_v24 = vmul.f32 0.35355338, %v928_v21  ;;  %v4469_v21 = vld [vmem:[%s6102_s7] ss:$0 sm:$0xff] }
 0x326   : > { %v806_v61 = vpop.xlane.xlu1 %805 }
 0x327   : > { %v807_v62 = vsub.f32 %v801_v59, %v806_v61  ;;  %v4065_v61 = vld [vmem:[%s6099_s4 + $0x170] sm:$0xff] }
 0x329   : > { %v808_v63 = vmul.f32 1.442695, %v807_v62  ;;  %v4064_v62 = vld [vmem:[%s6099_s4 + $0x168] sm:$0xff] }
 0x32b   : > { %4531 = vpow2.f32 %v808_v63 }
 0x32d   : > { %v4976_v25 = vpop.f32.mrf.mxu2 }
 0x331   : > { %v4532_v0 = vpop.eup %4531 }
 0x332   : > { %v810_v1 = vsel %vm625_vm1, %v4532_v0, 0.0 }
 0x333   : > { %811 = vadd.xlane.f32.xlu1 %v810_v1 }
 0x3a6   : > { %v812_v13 = vpop.xlane.xlu1 %811 }
 0x3a7   : > { %4533 = vrcp.f32 %v812_v13 }
 0x3ad   : > { %v4534_v14 = vpop.eup %4533 }
 0x3ae   : > { %v814_v15 = vmul.f32 %v4534_v14, %v4532_v0 }
 0x3b0   : > { %4028 = vmatmul.msk.f32.vlgmr.msra.gmra.mxu0 %vm625_vm1, %v814_v15 }
 0x3b1   : > { %1057 = vmatpush.msra.mxu0 %v4053_v52 }
 0x3b8   : > { %4048 = vmatmul.msk.f32.vlgmr.msrb.gmra.mxu0 %vm551_vm0, %v4842_v10 }
 0x42d   : > { %v835_v17 = vpop.f32.mrf.mxu0 }
 0x42e   : > { %4030 = vmatmul.msk.f32.vlgmr.msra.gmra.mxu1 %vm625_vm1, %v835_v17  ;;  %v4076_v17 = vld [vmem:[%s6101_s6 + $0x18] sm:$0xff] }
 0x42f   : > { %1099 = vmatpush.msra.mxu1 %v4058_v45  ;;  %v5105_v45 = vld [vmem:[%s5085_s20 + $0x8] sm:$0xff] }
 0x431   : > { %1100 = vmatpush.msra.mxu1 %v4057_v46  ;;  %v525_v46 = vld [vmem:[%s515_s18 + $0x8] sm:$0xff] }
 0x433   : > { %1101 = vmatpush.msra.mxu1 %v4056_v47  ;;  %v5108_v47 = vadd.f32 %v525_v46, %v5105_v45  ;;  %v4131_v46 = vld [vmem:[%s6099_s4 + $0x1c8] sm:$0xff] }
 0x435   : > { %v951_v22 = vpop.f32.mrf.mxu0  ;;  %1102 = vmatpush.msra.mxu1 %v4055_v48  ;;  %v4081_v48 = vld [vmem:[%s6099_s4 + $0x198] sm:$0xff] }
 0x436   : > { %v952_v23 = vadd.f32 %v4463_v20, %v951_v22  ;;  %4049 = vmatmul.msk.f32.vlgmr.msrb.gmra.mxu1 %vm551_vm0, %v4835_v8 }
 0x438   : > { %4050 = vmatpush.xpose.msk.msrb.mxu2 %vm625_vm1, %v952_v23 }
 0x43b   : > { %4051 = vmatmul.msk.f32.vlgmr.msrb.gmra.mxu2 %vm625_vm1, %v930_v24 }
 0x43c   : > { %1123 = vmatpush.msra.mxu2 %v4062_v39  ;;  %v4084_v39 = vld [vmem:[%s6099_s4 + $0x210] sm:$0xff] }
 0x43e   : > { %1124 = vmatpush.msra.mxu2 %v4061_v42  ;;  %4070 = vmatmul.msk.f32.vlgmr.msra.gmra.mxu1 %vm551_vm0, %v4842_v10  ;;  %v524_v42 = vld [vmem:[%s515_s18] sm:$0xff] }
 0x440   : > { %1125 = vmatpush.msra.mxu2 %v4060_v43  ;;  %v4082_v43 = vld [vmem:[%s6099_s4 + $0x200] sm:$0xff] }
 0x442   : > { %1126 = vmatpush.msra.mxu2 %v4059_v44 }
 0x443   : > { %4071 = vmatmul.msk.f32.vlgmr.msra.gmra.mxu2 %vm551_vm0, %v4842_v10  ;;  %v4467_v10 = vld [vmem:[%s6100_s5 + $0x3] ss:$0 sm:$0xff] }
 0x444   : > { %1234 = vmatpush.msrb.mxu2 %v4076_v17 }
 0x4ab   : > { %v4994_v37 = vpop.f32.mrf.mxu1 }
 0x4ac   : > { %v884_v19 = vadd.f32 %v4976_v25, %v4994_v37 }
 0x4b3   : > { %v974_v40 = vpop.f32.mrf.mxu1 }
 0x4b4   : > { %v975_v41 = vadd.f32 %v4465_v38, %v974_v40  ;;  %v4085_v38 = vld [vmem:[%s6099_s4 + $0x218] sm:$0xff]  ;;  %v4083_v40 = vld [vmem:[%s6099_s4 + $0x208] sm:$0xff] }
 0x4b6   : > { %1032 = vmatpush.msra.mxu3 %v975_v41  ;;  %v5094_v41 = vld [vmem:[%s5085_s20] sm:$0xff] }
 0x4b7   : > { %v5100_v44 = vadd.f32 %v524_v42, %v5094_v41  ;;  %v4133_v42 = vld [vmem:[%s6099_s4 + $0x1d8] sm:$0xff] }
 0x4b8   : > { %1146 = vmatpush.msrb.mxu3 %v4066_v60  ;;  %v4470_v60 = vld [vmem:[%s6107_s12] ss:$0 sm:$0xff] }
 0x4ba   : > { %1147 = vmatpush.msrb.mxu3 %v4065_v61 }
 0x4bb   : > { %v1104_v56 = vpop.f32.mrf.mxu1 }
 0x4bc   : > { %v1105_v58 = vadd.f32 %v4467_v10, %v1104_v56  ;;  %1148 = vmatpush.msrb.mxu3 %v4064_v62  ;;  %v4471_v62 = vld [vmem:[%s6108_s13] ss:$0 sm:$0xff] }
 0x4be   : > { %v1000_v26 = vpop.f32.mrf.mxu2  ;;  %v1107_v59 = vmul.f32 0.35355338, %v1105_v58  ;;  %1149 = vmatpush.msrb.mxu3 %v4063_v2 }
 0x4bf   : > { %v1003_v27 = vsel %vm625_vm1, %v1000_v26, -inf }
 0x4c0   : > { %1004 = vmax.xlane.f32.xlu2 %v1003_v27 }
 0x4c6   : > { %v1128_v54 = vpop.f32.mrf.mxu2 }
 0x4c7   : > { %v1129_v55 = vadd.f32 %v4466_v53, %v1128_v54 }
 0x4c9   : > { %4073 = vmatpush.xpose.msk.msrb.mxu0 %vm625_vm1, %v1129_v55 }
 0x533   : > { %v1005_v32 = vpop.xlane.xlu2 %1004 }
 0x534   : > { %v1006_v33 = vsub.f32 %v1000_v26, %v1005_v32 }
 0x536   : > { %v1007_v34 = vmul.f32 1.442695, %v1006_v33 }
 0x538   : > { %4535 = vpow2.f32 %v1007_v34 }
 0x53e   : > { %v4536_v35 = vpop.eup %4535 }
 0x53f   : > { %v1009_v36 = vsel %vm625_vm1, %v4536_v35, 0.0 }
 0x540   : > { %1010 = vadd.xlane.f32.xlu2 %v1009_v36 }
 0x5b3   : > { %v1011_v49 = vpop.xlane.xlu2 %1010 }
 0x5b4   : > { %4537 = vrcp.f32 %v1011_v49  ;;  %v4080_v49 = vld [vmem:[%s6099_s4 + $0x190] sm:$0xff] }
 0x5ba   : > { %v4538_v50 = vpop.eup %4537 }
 0x5bb   : > { %v1013_v51 = vmul.f32 %v4538_v50, %v4536_v35  ;;  %v4079_v50 = vld [vmem:[%s6099_s4 + $0x188] sm:$0xff] }
 0x5bd   : > { %4052 = vmatmul.msk.f32.vlgmr.msra.gmra.mxu3 %vm625_vm1, %v1013_v51  ;;  %v4078_v51 = vld [vmem:[%s6099_s4 + $0x180] sm:$0xff] }
 0x5be   : > { %1325 = vmatpush.msra.mxu3 %v4081_v48  ;;  %v4130_v48 = vld [vmem:[%s6099_s4 + $0x1c0] sm:$0xff] }
 0x5c0   : > { %1326 = vmatpush.msra.mxu3 %v4080_v49 }
 0x5c2   : > { %1327 = vmatpush.msra.mxu3 %v4079_v50 }
 0x5c4   : > { %1328 = vmatpush.msra.mxu3 %v4078_v51  ;;  %v4476_v51 = vld [vmem:[%s6100_s5 + $0x11] ss:$0 sm:$0xff] }
 0x5c5   : > { %4072 = vmatmul.msk.f32.vlgmr.msrb.gmra.mxu3 %vm551_vm0, %v4835_v8 }
 0x640   : > { %v1034_v57 = vpop.f32.mrf.mxu3 }
 0x641   : > { %4054 = vmatmul.msk.f32.vlgmr.msra.gmra.mxu0 %vm625_vm1, %v1034_v57 }
 0x642   : > { %1355 = vmatpush.msra.mxu0 %v4085_v38 }
 0x644   : > { %1356 = vmatpush.msra.mxu0 %v4084_v39 }
 0x646   : > { %1357 = vmatpush.msra.mxu0 %v4083_v40 }
 0x648   : > { %v1151_v12 = vpop.f32.mrf.mxu3  ;;  %1358 = vmatpush.msra.mxu0 %v4082_v43  ;;  %v4132_v43 = vld [vmem:[%s6099_s4 + $0x1d0] sm:$0xff] }
 0x649   : > { %4074 = vmatmul.msk.f32.vlgmr.msrb.gmra.mxu0 %vm625_vm1, %v1107_v59  ;;  %v1152_v13 = vadd.f32 %v4468_v11, %v1151_v12  ;;  %v4105_v11 = vld [vmem:[%s6099_s4 + $0x1b0] sm:$0xff]  ;;  %v4104_v12 = vld [vmem:[%s6099_s4 + $0x1a8] sm:$0xff] }
 0x64b   : > { %1209 = vmatpush.msrb.mxu1 %v1152_v13  ;;  %v4103_v13 = vld [vmem:[%s6099_s4 + $0x1a0] sm:$0xff] }
 0x651   : > { %4094 = vmatmul.msk.f32.vlgmr.msra.gmra.mxu0 %vm551_vm0, %v5100_v44 }
 0x659   : > { %4095 = vmatmul.msk.f32.gmra.mxu0 %vm551_vm0, %v5108_v47 }
 0x6be   : > { %v1059_v63 = vpop.f32.mrf.mxu0 }
 0x6bf   : > { %v1062_v20 = vadd.f32 %v1059_v63, %v884_v19  ;;  %v4088_v19 = vld [vmem:[%s6099_s4 + $0x290] sm:$0xff] }
 0x6c6   : > { %v1177_v0 = vpop.f32.mrf.mxu0 }
 0x6c7   : > { %v1180_v1 = vsel %vm625_vm1, %v1177_v0, -inf }
 0x6c8   : > { %1181 = vmax.xlane.f32.xlu0 %v1180_v1 }
 0x73b   : > { %v1182_v3 = vpop.xlane.xlu0 %1181 }
 0x73c   : > { %v1183_v4 = vsub.f32 %v1177_v0, %v1182_v3  ;;  %v1360_v3 = vpop.f32.mrf.mxu0 }
 0x73e   : > { %v1184_v5 = vmul.f32 1.442695, %v1183_v4  ;;  %v4472_v4 = vld [vmem:[%s6100_s5 + $0x10] ss:$0 sm:$0xff] }
 0x740   : > { %4539 = vpow2.f32 %v1184_v5 }
 0x744   : > { %v1363_v5 = vpop.f32.mrf.mxu0 }
 0x746   : > { %v4540_v6 = vpop.eup %4539 }
 0x747   : > { %v1186_v7 = vsel %vm625_vm1, %v4540_v6, 0.0 }
 0x748   : > { %1187 = vadd.xlane.f32.xlu1 %v1186_v7  ;;  %v1361_v7 = vadd.f32 %v4472_v4, %v1360_v3 }
 0x7bb   : > { %v1188_v14 = vpop.xlane.xlu1 %1187 }
 0x7bc   : > { %4541 = vrcp.f32 %v1188_v14  ;;  %v4473_v14 = vld [vmem:[%s6100_s5 + $0xc] ss:$0 sm:$0xff] }
 0x7bd   : > { %4543 = vrcp.f32 %v4674_v28 }
 0x7c2   : > { %v4542_v15 = vpop.eup %4541 }
 0x7c3   : > { %v1190_v16 = vmul.f32 %v4542_v15, %v4540_v6  ;;  %v4544_v29 = vpop.eup %4543  ;;  %v1364_v6 = vadd.f32 %v4472_v4, %v1363_v5  ;;  %v4134_v5 = vld [vmem:[%s6099_s4 + $0x240] sm:$0xff] }
 0x7c4   : > { %v1250_v30 = vmul.f32 32.0, %v4544_v29  ;;  %vm1254_vm2 = vweird.f32 %v4544_v29 }
 0x7c5   : > { %4075 = vmatmul.msk.f32.vlgmr.msrb.gmra.mxu1 %vm625_vm1, %v1190_v16  ;;  %4098 = vmatpush.xpose.msk.msra.mxu2 %vm625_vm1, %v1364_v6 }
 0x7c6   : > { %v1251_v31 = vsub.f32 1.0, %v1250_v30 }
 0x7c8   : > { %v1252_v25 = vmul.f32 %v4544_v29, %v1251_v31 }
 0x7c9   : > { %4099 = vmatpush.xpose.msk.msra.mxu2 %vm625_vm1, %v1361_v7  ;;  %v4478_v7 = vld [vmem:[%s6100_s5 + $0x15] ss:$0 sm:$0xff] }
 0x7ca   : > { %v1253_v32 = vadd.f32 %v4544_v29, %v1252_v25 }
 0x7cc   : > { %v5071_v33 = vsel %vm1254_vm2, %v4544_v29, %v1253_v32 }
 0x842   : > { %v1211_v18 = vpop.f32.mrf.mxu1 }
 0x843   : > { %4077 = vmatmul.msk.f32.vlgmr.msrb.gmra.mxu2 %vm625_vm1, %v1211_v18  ;;  %v4089_v18 = vld [vmem:[%s6099_s4 + $0x298] sm:$0xff] }
 0x844   : > { %1387 = vmatpush.msra.mxu1 %v4089_v18  ;;  %v4102_v18 = vld [vmem:[%s6101_s6 + $0x20] sm:$0xff] }
 0x846   : > { %1388 = vmatpush.msra.mxu1 %v4088_v19 }
 0x8c6   : > { %v1236_v22 = vpop.f32.mrf.mxu2 }
 0x8c7   : > { %v1239_v23 = vadd.f32 %v1236_v22, %v1062_v20  ;;  %v4087_v20 = vld [vmem:[%s6099_s4 + $0x288] sm:$0xff] }
 0x8c8   : > { %1389 = vmatpush.msra.mxu1 %v4087_v20 }
 0x8c9   : > { %v1244_v24 = vadd.f32 %v4469_v21, %v1239_v23  ;;  %v4086_v21 = vld [vmem:[%s6099_s4 + $0x280] sm:$0xff] }
 0x8ca   : > { %1390 = vmatpush.msra.mxu1 %v4086_v21  ;;  %v4479_v21 = vld [vmem:[%s6100_s5 + $0x12] ss:$0 sm:$0xff] }
 0x8cb   : > { %v1245_v26 = vadd.f32 %v1244_v24, %v4835_v8  ;;  %4096 = vmatmul.msk.f32.vlgmr.msra.gmra.mxu1 %vm551_vm0, %v5094_v41 }
 0x8cd   : > { %v1246_v27 = vsel %vm551_vm0, %v1245_v26, 0.0 }
 0x8ce   : > { %1247 = vadd.xlane.f32.xlu2 %v1246_v27  ;;  %v4475_v27 = vld [vmem:[%s6100_s5 + $0x14] ss:$0 sm:$0xff] }
 0x8d3   : > { %4097 = vmatmul.msk.f32.gmra.mxu1 %vm551_vm0, %v5105_v45 }
 0x941   : > { %v1248_v34 = vpop.xlane.xlu2 %1247 }
 0x942   : > { %v1256_v35 = vmul.f32 %v5071_v33, %v1248_v34 }
 0x944   : > { %v1257_v36 = vsub.f32 %v1245_v26, %v1256_v35  ;;  %v4110_v35 = vld [vmem:[%s6099_s4 + $0x238] sm:$0xff] }
 0x946   : > { %v1258_v37 = vmul.f32 %v1257_v36, %v1257_v36 }
 0x948   : > { %v1259_v8 = vsel %vm551_vm0, %v1258_v37, 0.0  ;;  %v1392_v24 = vpop.f32.mrf.mxu1  ;;  %v4108_v37 = vld [vmem:[%s6099_s4 + $0x228] sm:$0xff] }
 0x949   : > { %1260 = vadd.xlane.f32.xlu0 %v1259_v8  ;;  %v1393_v31 = vadd.f32 %v4475_v27, %v1392_v24  ;;  %v4107_v8 = vld [vmem:[%s6099_s4 + $0x220] sm:$0xff] }
 0x950   : > { %v1395_v30 = vpop.f32.mrf.mxu1 }
 0x951   : > { %v1396_v25 = vadd.f32 %v4475_v27, %v1395_v30 }
 0x953   : > { %1456 = vmatpush.msrb.mxu3 %v1396_v25  ;;  %v4127_v25 = vld [vmem:[%s6101_s6 + $0x28] sm:$0xff] }
 0x955   : > { %1457 = vmatpush.msrb.mxu3 %v1393_v31 }
 0x9bc   : > { %v1261_v52 = vpop.xlane.xlu0 %1260 }
 0x9bd   : > { %v1262_v53 = vmul.f32 %v1261_v52, %v5071_v33  ;;  %v4474_v52 = vld [vmem:[%s6100_s5 + $0xd] ss:$0 sm:$0xff] }
 0x9bf   : > { %v1263_v54 = vadd.f32 1e-05, %v1262_v53 }
 0x9c1   : > { %4545 = vrsqrt.f32 %v1263_v54  ;;  %vm1270_vm4 = vweird.f32 %v1263_v54 }
 0x9c7   : > { %v4546_v55 = vpop.eup %4545 }
 0x9c8   : > { %v1265_v10 = vmul.f32 %v4546_v55, %v1263_v54  ;;  %vm1271_vm3 = vweird.f32 %v4546_v55 }
 0x9c9   : > { %vm1272_vm5 = vmor %vm1270_vm4, %vm1271_vm3 }
 0x9ca   : > { %v1266_v56 = vmul.f32 %v4546_v55, %v1265_v10 }
 0x9cc   : > { %v1267_v57 = vmul.f32 0.5, %v1266_v56 }
 0x9ce   : > { %v1268_v58 = vsub.f32 1.5, %v1267_v57 }
 0x9d0   : > { %v1269_v59 = vmul.f32 %v4546_v55, %v1268_v58  ;;  %v4114_v58 = vld [vmem:[%s6099_s4 + $0x2b8] sm:$0xff] }
 0x9d1   : > { %1550 = vmatpush.msrb.mxu0 %v4114_v58  ;;  %v4159_v58 = vld [vmem:[%s6099_s4 + $0x1f8] sm:$0xff] }
 0x9d2   : > { %v1273_v61 = vsel %vm1272_vm5, %v4546_v55, %v1269_v59  ;;  %v4113_v59 = vld [vmem:[%s6099_s4 + $0x2b0] sm:$0xff] }
 0x9d3   : > { %v1274_v63 = vmul.f32 %v1273_v61, %v1257_v36  ;;  %v4109_v36 = vld [vmem:[%s6099_s4 + $0x230] sm:$0xff]  ;;  %1551 = vmatpush.msrb.mxu0 %v4113_v59  ;;  %v4111_v61 = vld [vmem:[%s6099_s4 + $0x2a0] sm:$0xff] }
 0x9d4   : > { %v4158_v59 = vld [vmem:[%s6099_s4 + $0x1f0] sm:$0xff] }
 0x9d5   : > { %v1279_v0 = vmul.f32 %v4470_v60, %v1274_v63  ;;  %v4112_v60 = vld [vmem:[%s6099_s4 + $0x2a8] sm:$0xff]  ;;  %v4136_v63 = vld [vmem:[%s6099_s4 + $0x250] sm:$0xff] }
 0x9d6   : > { %1552 = vmatpush.msrb.mxu0 %v4112_v60  ;;  %v4157_v60 = vld [vmem:[%s6099_s4 + $0x1e8] sm:$0xff] }
 0x9d7   : > { %v5131_v1 = vadd.f32 %v4471_v62, %v1279_v0  ;;  %v4137_v62 = vld [vmem:[%s6099_s4 + $0x258] sm:$0xff]  ;;  %v4135_v0 = vld [vmem:[%s6099_s4 + $0x248] sm:$0xff] }
 0x9d8   : > { %1553 = vmatpush.msrb.mxu0 %v4111_v61  ;;  %v4156_v61 = vld [vmem:[%s6099_s4 + $0x1e0] sm:$0xff] }
 0x9d9   : > { %v5135_v2 = vadd.f32 %v5131_v1, %v4838_v9  ;;  %v4106_v9 = vld [vmem:[%s6099_s4 + $0x1b8] sm:$0xff]  ;;  %4121 = vmatmul.msk.f32.vlgmr.msrb.gmra.mxu0 %vm551_vm0, %v5094_v41 }
 0x9da   : > { %1500 = vmatpush.msrb.mxu2 %v4106_v9  ;;  %1732 = vmatpush.msra.mxu0 %v4137_v62 }
 0x9db   : > { %4093 = vmatmul.msk.f32.vlgmr.msra.gmra.mxu3 %vm551_vm0, %v5135_v2 }
 0x9dc   : > { %1501 = vmatpush.msrb.mxu2 %v4105_v11  ;;  %1524 = vmatpush.msra.mxu3 %v4110_v35  ;;  %v4139_v35 = vld [vmem:[%s6099_s4 + $0x2c8] sm:$0xff] }
 0x9dd   : > { %1733 = vmatpush.msra.mxu0 %v4136_v63  ;;  %v4154_v63 = vld [vmem:[%s6101_s6 + $0x30] sm:$0xff] }
 0x9de   : > { %1502 = vmatpush.msrb.mxu2 %v4104_v12  ;;  %1525 = vmatpush.msra.mxu3 %v4109_v36  ;;  %v4138_v36 = vld [vmem:[%s6099_s4 + $0x2c0] sm:$0xff] }
 0x9df   : > { %1734 = vmatpush.msra.mxu0 %v4135_v0  ;;  %v4481_v0 = vld [vmem:[%s6100_s5 + $0x13] ss:$0 sm:$0xff] }
 0x9e0   : > { %1503 = vmatpush.msrb.mxu2 %v4103_v13  ;;  %1526 = vmatpush.msra.mxu3 %v4108_v37 }
 0x9e1   : > { %4122 = vmatmul.msk.f32.gmra.mxu0 %vm551_vm0, %v5105_v45 }
 0x9e2   : > { %1527 = vmatpush.msra.mxu3 %v4107_v8  ;;  %1735 = vmatpush.msra.mxu0 %v4134_v5 }
 0x9e9   : > { %4146 = vmatmul.msk.f32.vlgmr.msra.gmra.mxu0 %vm551_vm0, %v5100_v44 }
 0x9f1   : > { %4147 = vmatmul.msk.f32.gmra.mxu0 %vm551_vm0, %v5108_v47 }
 0xa56   : > { %v1555_v6 = vpop.f32.mrf.mxu0 }
 0xa57   : > { %v1556_v11 = vadd.f32 %v4478_v7, %v1555_v6 }
 0xa5e   : > { %v1330_v15 = vpop.f32.mrf.mxu3  ;;  %v1558_v9 = vpop.f32.mrf.mxu0 }
 0xa5f   : > { %v1331_v16 = vadd.f32 %v4473_v14, %v1330_v15  ;;  %v1559_v12 = vadd.f32 %v4478_v7, %v1558_v9 }
 0xa61   : > { %v1333_v17 = vmul.f32 0.35355338, %v1331_v16 }
 0xa63   : > { %4100 = vmatmul.msk.f32.vlgmr.msra.gmra.mxu2 %vm625_vm1, %v1333_v17 }
 0xa64   : > { %1618 = vmatpush.msra.mxu2 %v1559_v12  ;;  %v4482_v12 = vld [vmem:[%s6100_s5 + $0xf] ss:$0 sm:$0xff] }
 0xa66   : > { %1619 = vmatpush.msra.mxu2 %v1556_v11  ;;  %v1737_v19 = vpop.f32.mrf.mxu0 }
 0xa67   : > { %v1738_v27 = vadd.f32 %v4479_v21, %v1737_v19 }
 0xa6b   : > { %4118 = vmatmul.msk.f32.vlgmr.msrb.gmra.mxu2 %vm551_vm0, %v5135_v2 }
 0xa6c   : > { %1667 = vmatpush.msrb.mxu2 %v4102_v18  ;;  %v4164_v18 = vld [vmem:[%s6099_s4 + $0x2e0] sm:$0xff] }
 0xae6   : > { %v1424_v22 = vpop.f32.mrf.mxu2 }
 0xae7   : > { %v1428_v23 = vsel %vm1427_vm6, %v1424_v22, -inf }
 0xae8   : > { %1429 = vmax.xlane.f32.xlu1 %v1428_v23 }
 0xaee   : > { %v1505_v54 = vpop.f32.mrf.mxu2 }
 0xaef   : > { %v1506_v10 = vadd.f32 %v4474_v52, %v1505_v54 }
 0xaf1   : > { %v1508_v57 = vmul.f32 0.35355338, %v1506_v10 }
 0xb5b   : > { %v1430_v26 = vpop.xlane.xlu1 %1429 }
 0xb5c   : > { %v1431_v28 = vsub.f32 %v1424_v22, %v1430_v26  ;;  %v1740_v22 = vpop.f32.mrf.mxu0 }
 0xb5d   : > { %v1741_v24 = vadd.f32 %v4479_v21, %v1740_v22 }
 0xb5e   : > { %v1432_v29 = vmul.f32 1.442695, %v1431_v28  ;;  %v4477_v28 = vld [vmem:[%s6100_s5 + $0xe] ss:$0 sm:$0xff] }
 0xb60   : > { %4547 = vpow2.f32 %v1432_v29 }
 0xb66   : > { %v4548_v32 = vpop.eup %4547 }
 0xb67   : > { %v1434_v34 = vsel %vm1427_vm6, %v4548_v32, 0.0 }
 0xb68   : > { %1435 = vadd.xlane.f32.xlu2 %v1434_v34  ;;  %v4140_v34 = vld [vmem:[%s6099_s4 + $0x2d0] sm:$0xff] }
 0xbdb   : > { %v1436_v38 = vpop.xlane.xlu2 %1435 }
 0xbdc   : > { %4549 = vrcp.f32 %v1436_v38 }
 0xbe2   : > { %v4550_v39 = vpop.eup %4549 }
 0xbe3   : > { %v1438_v40 = vmul.f32 %v4550_v39, %v4548_v32  ;;  %v4141_v32 = vld [vmem:[%s6099_s4 + $0x2d8] sm:$0xff] }
 0xbe5   : > { %4101 = vmatmul.msk.f32.vlgmr.msrb.gmra.mxu3 %vm1427_vm6, %v1438_v40  ;;  %v4163_v40 = vld [vmem:[%s6099_s4 + $0x278] sm:$0xff] }
 0xbe6   : > { %1708 = vmatpush.msrb.mxu3 %v4133_v42  ;;  %v4162_v42 = vld [vmem:[%s6099_s4 + $0x270] sm:$0xff]  ;;  %1918 = vmatpush.msrb.mxu0 %v4163_v40 }
 0xbe8   : > { %1709 = vmatpush.msrb.mxu3 %v4132_v43  ;;  %v4161_v43 = vld [vmem:[%s6099_s4 + $0x268] sm:$0xff]  ;;  %1919 = vmatpush.msrb.mxu0 %v4162_v42 }
 0xbea   : > { %1710 = vmatpush.msrb.mxu3 %v4131_v46  ;;  %v4160_v46 = vld [vmem:[%s6099_s4 + $0x260] sm:$0xff]  ;;  %1920 = vmatpush.msrb.mxu0 %v4161_v43 }
 0xbec   : > { %1711 = vmatpush.msrb.mxu3 %v4130_v48  ;;  %1921 = vmatpush.msrb.mxu0 %v4160_v46 }
 0xbed   : > { %4119 = vmatmul.msk.f32.vlgmr.msra.gmra.mxu3 %vm551_vm0, %v5100_v44  ;;  %4172 = vmatmul.msk.f32.vlgmr.msrb.gmra.mxu0 %vm551_vm0, %v5100_v44 }
 0xbf5   : > { %4120 = vmatmul.msk.f32.gmra.mxu3 %vm551_vm0, %v5108_v47  ;;  %4173 = vmatmul.msk.f32.gmra.mxu0 %vm551_vm0, %v5108_v47 }
 0xbfd   : > { %4145 = vmatmul.msk.f32.vlgmr.msrb.gmra.mxu3 %vm551_vm0, %v5135_v2 }
 0xc68   : > { %v5214_v49 = vpop.f32.mrf.mxu3 }
 0xc6a   : > { %v1923_v62 = vpop.f32.mrf.mxu0 }
 0xc6b   : > { %v1924_v5 = vadd.f32 %v4481_v0, %v1923_v62 }
 0xc70   : > { %v1529_v50 = vpop.f32.mrf.mxu3 }
 0xc71   : > { %v1530_v56 = vadd.f32 %v4476_v51, %v1529_v50 }
 0xc78   : > { %v1532_v53 = vpop.f32.mrf.mxu3 }
 0xc79   : > { %v1533_v55 = vadd.f32 %v4476_v51, %v1532_v53  ;;  %v4480_v53 = vld [vmem:[%s6100_s5 + $0x16] ss:$0 sm:$0xff] }
 0xc7b   : > { %4123 = vmatpush.xpose.msk.msrb.mxu1 %vm625_vm1, %v1533_v55 }
 0xc7f   : > { %4124 = vmatpush.xpose.msk.msrb.mxu1 %vm625_vm1, %v1530_v56 }
 0xc80   : > { %v1713_v29 = vpop.f32.mrf.mxu3 }
 0xc81   : > { %v1714_v30 = vadd.f32 %v4477_v28, %v1713_v29 }
 0xc82   : > { %4125 = vmatmul.msk.f32.vlgmr.msrb.gmra.mxu1 %vm625_vm1, %v1508_v57 }
 0xc83   : > { %v1716_v31 = vmul.f32 0.35355338, %v1714_v30  ;;  %1644 = vmatpush.msra.mxu1 %v4127_v25 }
 0xc85   : > { %1758 = vmatpush.msrb.mxu1 %v4141_v32 }
 0xc87   : > { %1759 = vmatpush.msrb.mxu1 %v4140_v34 }
 0xc89   : > { %1760 = vmatpush.msrb.mxu1 %v4139_v35 }
 0xc8b   : > { %1761 = vmatpush.msrb.mxu1 %v4138_v36  ;;  %v4180_v36 = vld [vmem:[%s6101_s6 + $0x38] sm:$0xff] }
 0xcff   : > { %v1587_v3 = vpop.f32.mrf.mxu1 }
 0xd00   : > { %v1590_v4 = vsel %vm1427_vm6, %v1587_v3, -inf }
 0xd01   : > { %1591 = vmax.xlane.f32.xlu0 %v1590_v4 }
 0xd74   : > { %v1592_v13 = vpop.xlane.xlu0 %1591 }
 0xd75   : > { %v1593_v14 = vsub.f32 %v1587_v3, %v1592_v13  ;;  %v1926_v3 = vpop.f32.mrf.mxu0 }
 0xd76   : > { %v1927_v4 = vadd.f32 %v4481_v0, %v1926_v3 }
 0xd77   : > { %v1594_v15 = vmul.f32 1.442695, %v1593_v14 }
 0xd79   : > { %4551 = vpow2.f32 %v1594_v15 }
 0xd7f   : > { %v4552_v16 = vpop.eup %4551 }
 0xd80   : > { %v1596_v17 = vsel %vm1427_vm6, %v4552_v16, 0.0 }
 0xd81   : > { %1597 = vadd.xlane.f32.xlu1 %v1596_v17  ;;  %v4165_v17 = vld [vmem:[%s6099_s4 + $0x2e8] sm:$0xff] }
 0xdf4   : > { %v1598_v20 = vpop.xlane.xlu1 %1597 }
 0xdf5   : > { %4553 = vrcp.f32 %v1598_v20 }
 0xdfb   : > { %v4554_v23 = vpop.eup %4553 }
 0xdfc   : > { %v1600_v26 = vmul.f32 %v4554_v23, %v4552_v16  ;;  %v4167_v16 = vld [vmem:[%s6099_s4 + $0x2f8] sm:$0xff] }
 0xdfe   : > { %4126 = vmatmul.msk.f32.vlgmr.msra.gmra.mxu2 %vm1427_vm6, %v1600_v26  ;;  %v4483_v26 = vld [vmem:[%s6100_s5 + $0x17] ss:$0 sm:$0xff] }
 0xdff   : > { %4150 = vmatpush.xpose.msk.msra.mxu2 %vm625_vm1, %v1741_v24 }
 0xe03   : > { %4151 = vmatpush.xpose.msk.msra.mxu2 %vm625_vm1, %v1738_v27 }
 0xe06   : > { %4129 = vmatmul.msk.f32.vlgmr.msrb.gmra.mxu2 %vm625_vm1, %v5214_v49 }
 0xe07   : > { %1852 = vmatpush.msrb.mxu2 %v4154_v63 }
 0xe0e   : > { %4152 = vmatmul.msk.f32.vlgmr.msra.gmra.mxu2 %vm625_vm1, %v1716_v31 }
 0xe0f   : > { %4176 = vmatpush.xpose.msk.msra.mxu2 %vm625_vm1, %v1927_v4 }
 0xe13   : > { %4177 = vmatpush.xpose.msk.msra.mxu2 %vm625_vm1, %v1924_v5 }
 0xe81   : > { %v1621_v37 = vpop.f32.mrf.mxu2 }
 0xe82   : > { %4128 = vmatmul.msk.f32.vlgmr.msra.gmra.mxu1 %vm625_vm1, %v1621_v37 }
 0xe83   : > { %1944 = vmatpush.msra.mxu1 %v4167_v16  ;;  %v2117_v16 = vld [vmem:[%s6105_s10] sm:$0xff] }
 0xe89   : > { %v5293_v8 = vpop.f32.mrf.mxu2 }
 0xe8a   : > { %4148 = vmatmul.msk.f32.vlgmr.msrb.gmra.mxu1 %vm551_vm0, %v5094_v41 }
 0xe91   : > { %v1795_v38 = vpop.f32.mrf.mxu2 }
 0xe92   : > { %v1798_v39 = vsel %vm1427_vm6, %v1795_v38, -inf  ;;  %4149 = vmatmul.msk.f32.gmra.mxu1 %vm551_vm0, %v5105_v45 }
 0xe93   : > { %1799 = vmax.xlane.f32.xlu2 %v1798_v39 }
 0xeff   : > { %v1646_v48 = vpop.f32.mrf.mxu1 }
 0xf00   : > { %v1670_v19 = vadd.f32 %v5293_v8, %v1646_v48  ;;  %v4484_v8 = vld [vmem:[%s6102_s7 + $0x1] ss:$0 sm:$0xff] }
 0xf06   : > { %v1800_v49 = vpop.xlane.xlu2 %1799 }
 0xf07   : > { %v1801_v50 = vsub.f32 %v1795_v38, %v1800_v49  ;;  %v1763_v51 = vpop.f32.mrf.mxu1 }
 0xf08   : > { %v1764_v55 = vadd.f32 %v4480_v53, %v1763_v51 }
 0xf09   : > { %v1802_v52 = vmul.f32 1.442695, %v1801_v50 }
 0xf0b   : > { %4555 = vpow2.f32 %v1802_v52  ;;  %v2088_v52 = vld [vmem:[%s6103_s8 + $0x18] sm:$0xff] }
 0xf0f   : > { %v1766_v54 = vpop.f32.mrf.mxu1 }
 0xf10   : > { %v1767_v10 = vadd.f32 %v4480_v53, %v1766_v54  ;;  %v2086_v53 = vld [vmem:[%s6103_s8 + $0x8] sm:$0xff]  ;;  %v2085_v54 = vld [vmem:[%s6103_s8] sm:$0xff] }
 0xf11   : > { %v4556_v56 = vpop.eup %4555 }
 0xf12   : > { %v1804_v57 = vsel %vm1427_vm6, %v4556_v56, 0.0  ;;  %1826 = vmatpush.msra.mxu3 %v1767_v10  ;;  %v2123_v10 = vld [vmem:[%s6105_s10 + $0x30] sm:$0xff] }
 0xf13   : > { %1805 = vadd.xlane.f32.xlu0 %v1804_v57 }
 0xf14   : > { %1827 = vmatpush.msra.mxu3 %v1764_v55  ;;  %v2124_v55 = vld [vmem:[%s6105_s10 + $0x38] sm:$0xff] }
 0xf15   : > { %2141 = vmatpush.msra.mxu0 %v2124_v55 }
 0xf16   : > { %1894 = vmatpush.msrb.mxu3 %v4159_v58 }
 0xf17   : > { %2142 = vmatpush.msra.mxu0 %v2123_v10 }
 0xf18   : > { %1895 = vmatpush.msrb.mxu3 %v4158_v59  ;;  %v2121_v59 = vld [vmem:[%s6105_s10 + $0x20] sm:$0xff] }
 0xf1a   : > { %1896 = vmatpush.msrb.mxu3 %v4157_v60 }
 0xf1c   : > { %1897 = vmatpush.msrb.mxu3 %v4156_v61  ;;  %v2120_v61 = vld [vmem:[%s6105_s10 + $0x18] sm:$0xff] }
 0xf86   : > { %v1806_v6 = vpop.xlane.xlu0 %1805 }
 0xf87   : > { %4557 = vrcp.f32 %v1806_v6  ;;  %v4485_v6 = vld [vmem:[%s6107_s12 + $0x1] ss:$0 sm:$0xff] }
 0xf8d   : > { %v4558_v7 = vpop.eup %4557 }
 0xf8e   : > { %v1808_v9 = vmul.f32 %v4558_v7, %v4556_v56  ;;  %v2122_v56 = vld [vmem:[%s6105_s10 + $0x28] sm:$0xff] }
 0xf8f   : > { %2143 = vmatpush.msra.mxu0 %v2122_v56 }
 0xf90   : > { %4153 = vmatmul.msk.f32.vlgmr.msra.gmra.mxu3 %vm1427_vm6, %v1808_v9 }
 0xf91   : > { %2144 = vmatpush.msra.mxu0 %v2121_v59  ;;  %v4489_v59 = vld [vmem:[%s6107_s12 + $0x2] ss:$0 sm:$0xff] }
 0xf93   : > { %2145 = vmatpush.msra.mxu0 %v2120_v61  ;;  %v4490_v61 = vld [vmem:[%s6108_s13 + $0x2] ss:$0 sm:$0xff] }
 0xf98   : > { %4171 = vmatmul.msk.f32.vlgmr.msrb.gmra.mxu3 %vm551_vm0, %v5135_v2  ;;  %v4166_v2 = vld [vmem:[%s6099_s4 + $0x2f0] sm:$0xff] }
 0xf99   : > { %1945 = vmatpush.msra.mxu1 %v4166_v2  ;;  %v4487_v2 = vld [vmem:[%s6104_s9] ss:$0 sm:$0xff] }
 0xf9b   : > { %1946 = vmatpush.msra.mxu1 %v4165_v17 }
 0xf9d   : > { %1947 = vmatpush.msra.mxu1 %v4164_v18 }
 0xf9e   : > { %4174 = vmatmul.msk.f32.vlgmr.msra.gmra.mxu1 %vm551_vm0, %v5094_v41 }
 0xfa6   : > { %4175 = vmatmul.msk.f32.gmra.mxu1 %vm551_vm0, %v5105_v45 }
0x1013   : > { %v1829_v11 = vpop.f32.mrf.mxu3 }
0x1014   : > { %4155 = vmatmul.msk.f32.vlgmr.msrb.gmra.mxu2 %vm625_vm1, %v1829_v11  ;;  %v4486_v11 = vld [vmem:[%s6108_s13 + $0x1] ss:$0 sm:$0xff] }
0x1015   : > { %2038 = vmatpush.msrb.mxu2 %v4180_v36  ;;  %v4190_v36 = vld [vmem:[%s6099_s4 + $0x308] sm:$0xff] }
0x101b   : > { %v1899_v13 = vpop.f32.mrf.mxu3  ;;  %v1949_v24 = vpop.f32.mrf.mxu1 }
0x101c   : > { %v1900_v14 = vadd.f32 %v4482_v12, %v1899_v13  ;;  %v1950_v28 = vadd.f32 %v4483_v26, %v1949_v24 }
0x101e   : > { %v1902_v15 = vmul.f32 0.35355338, %v1900_v14  ;;  %v2119_v14 = vld [vmem:[%s6105_s10 + $0x10] sm:$0xff] }
0x101f   : > { %2146 = vmatpush.msra.mxu0 %v2119_v14 }
0x1020   : > { %4178 = vmatmul.msk.f32.vlgmr.msra.gmra.mxu2 %vm625_vm1, %v1902_v15  ;;  %v2118_v15 = vld [vmem:[%s6105_s10 + $0x8] sm:$0xff] }
0x1021   : > { %2147 = vmatpush.msra.mxu0 %v2118_v15 }
0x1023   : > { %v1952_v27 = vpop.f32.mrf.mxu1  ;;  %2148 = vmatpush.msra.mxu0 %v2117_v16  ;;  %v4222_v16 = vld [vmem:[%s6099_s4 + $0x438] sm:$0xff] }
0x1024   : > { %v1953_v29 = vadd.f32 %v4483_v26, %v1952_v27 }
0x1026   : > { %2012 = vmatpush.msra.mxu3 %v1953_v29 }
0x1028   : > { %2013 = vmatpush.msra.mxu3 %v1950_v28 }
0x102a   : > { %2108 = vmatpush.msrb.mxu3 %v2088_v52 }
0x1097   : > { %v1854_v20 = vpop.f32.mrf.mxu2 }
0x1098   : > { %v1857_v21 = vadd.f32 %v1854_v20, %v1670_v19  ;;  %v4488_v20 = vld [vmem:[%s6106_s11] ss:$0 sm:$0xff] }
0x10a3   : > { %v1981_v22 = vpop.f32.mrf.mxu2 }
0x10a4   : > { %v1984_v23 = vsel %vm1427_vm6, %v1981_v22, -inf }
0x10a5   : > { %1985 = vmax.xlane.f32.xlu1 %v1984_v23 }
0x1118   : > { %v1986_v41 = vpop.xlane.xlu1 %1985 }
0x1119   : > { %v1987_v45 = vsub.f32 %v1981_v22, %v1986_v41 }
0x111b   : > { %v1988_v30 = vmul.f32 1.442695, %v1987_v45  ;;  %v4200_v45 = vld [vmem:[%s6099_s4 + $0x418] sm:$0xff] }
0x111d   : > { %4559 = vpow2.f32 %v1988_v30  ;;  %v4192_v30 = vld [vmem:[%s6099_s4 + $0x318] sm:$0xff] }
0x111e   : > { %2228 = vmatpush.msrb.mxu1 %v4192_v30 }
0x1123   : > { %v4560_v31 = vpop.eup %4559 }
0x1124   : > { %v1990_v25 = vsel %vm1427_vm6, %v4560_v31, 0.0 }
0x1125   : > { %1991 = vadd.xlane.f32.xlu2 %v1990_v25  ;;  %v4199_v25 = vld [vmem:[%s6099_s4 + $0x410] sm:$0xff] }
0x1198   : > { %v1992_v32 = vpop.xlane.xlu2 %1991 }
0x1199   : > { %4561 = vrcp.f32 %v1992_v32  ;;  %v4191_v32 = vld [vmem:[%s6099_s4 + $0x310] sm:$0xff] }
0x119a   : > { %2229 = vmatpush.msrb.mxu1 %v4191_v32 }
0x119c   : > { %2230 = vmatpush.msrb.mxu1 %v4190_v36  ;;  %v4238_v36 = vld [vmem:[%s6099_s4 + $0x358] sm:$0xff] }
0x119f   : > { %v4562_v34 = vpop.eup %4561 }
0x11a0   : > { %v1994_v35 = vmul.f32 %v4562_v34, %v4560_v31  ;;  %v4196_v31 = vld [vmem:[%s6099_s4 + $0x398] sm:$0xff]  ;;  %v4195_v34 = vld [vmem:[%s6099_s4 + $0x390] sm:$0xff] }
0x11a1   : > { %2252 = vmatpush.msra.mxu2 %v4196_v31 }
0x11a2   : > { %4179 = vmatmul.msk.f32.vlgmr.msra.gmra.mxu3 %vm1427_vm6, %v1994_v35  ;;  %v4198_v35 = vld [vmem:[%s6099_s4 + $0x408] sm:$0xff] }
0x11a3   : > { %2253 = vmatpush.msra.mxu2 %v4195_v34  ;;  %v4495_v34 = vld [vmem:[%s6100_s5 + $0x19] ss:$0 sm:$0xff] }
0x1225   : > { %v2015_v37 = vpop.f32.mrf.mxu3 }
0x1226   : > { %4181 = vmatmul.msk.f32.vlgmr.msrb.gmra.mxu2 %vm625_vm1, %v2015_v37  ;;  %v4194_v37 = vld [vmem:[%s6099_s4 + $0x388] sm:$0xff] }
0x1227   : > { %2254 = vmatpush.msra.mxu2 %v4194_v37 }
0x12a9   : > { %v2040_v38 = vpop.f32.mrf.mxu2 }
0x12aa   : > { %v2043_v39 = vadd.f32 %v2040_v38, %v1857_v21  ;;  %v4189_v38 = vld [vmem:[%s6099_s4 + $0x300] sm:$0xff] }
0x12ab   : > { %2231 = vmatpush.msrb.mxu1 %v4189_v38 }
0x12ac   : > { %v2049_v40 = vadd.f32 %v4484_v8, %v2043_v39  ;;  %v4197_v8 = vld [vmem:[%s6099_s4 + $0x400] sm:$0xff] }
0x12ad   : > { %v4193_v39 = vld [vmem:[%s6099_s4 + $0x380] sm:$0xff] }
0x12ae   : > { %v2050_v42 = vadd.f32 %v2049_v40, %v5131_v1  ;;  %v2087_v1 = vld [vmem:[%s6103_s8 + $0x10] sm:$0xff]  ;;  %v4218_v40 = vld [vmem:[%s6099_s4 + $0x3b8] sm:$0xff]  ;;  %2255 = vmatpush.msra.mxu2 %v4193_v39  ;;  %v4236_v39 = vld [vmem:[%s6099_s4 + $0x348] sm:$0xff] }
0x12af   : > { %2109 = vmatpush.msrb.mxu3 %v2087_v1  ;;  %v4215_v1 = vld [vmem:[%s6099_s4 + $0x3a0] sm:$0xff] }
0x12b0   : > { %v2051_v43 = vsel %vm551_vm0, %v2050_v42, 0.0 }
0x12b1   : > { %2052 = vadd.xlane.f32.xlu0 %v2051_v43  ;;  %2110 = vmatpush.msrb.mxu3 %v2086_v53  ;;  %v4217_v43 = vld [vmem:[%s6099_s4 + $0x3b0] sm:$0xff]  ;;  %v4211_v53 = vld [vmem:[%s6099_s4 + $0x320] sm:$0xff] }
0x12b3   : > { %2111 = vmatpush.msrb.mxu3 %v2085_v54 }
0x12b5   : > { %2278 = vmatpush.msra.mxu3 %v4200_v45 }
0x12b7   : > { %2279 = vmatpush.msra.mxu3 %v4199_v25 }
0x12b9   : > { %2280 = vmatpush.msra.mxu3 %v4198_v35 }
0x12bb   : > { %2281 = vmatpush.msra.mxu3 %v4197_v8  ;;  %v4237_v8 = vld [vmem:[%s6099_s4 + $0x350] sm:$0xff] }
0x1324   : > { %v2053_v46 = vpop.xlane.xlu0 %2052 }
0x1325   : > { %v2054_v48 = vmul.f32 %v2053_v46, %v5071_v33  ;;  %v4213_v46 = vld [vmem:[%s6099_s4 + $0x330] sm:$0xff] }
0x1327   : > { %v2055_v49 = vsub.f32 %v2050_v42, %v2054_v48  ;;  %v4214_v42 = vld [vmem:[%s6099_s4 + $0x338] sm:$0xff] }
0x1328   : > { %2384 = vmatpush.msrb.mxu2 %v4214_v42 }
0x1329   : > { %v2056_v50 = vmul.f32 %v2055_v49, %v2055_v49 }
0x132a   : > { %2385 = vmatpush.msrb.mxu2 %v4213_v46 }
0x132b   : > { %v2057_v51 = vsel %vm551_vm0, %v2056_v50, 0.0  ;;  %v4216_v50 = vld [vmem:[%s6099_s4 + $0x3a8] sm:$0xff] }
0x132c   : > { %2058 = vadd.xlane.f32.xlu1 %v2057_v51  ;;  %v4212_v51 = vld [vmem:[%s6099_s4 + $0x328] sm:$0xff] }
0x132d   : > { %2386 = vmatpush.msrb.mxu2 %v4212_v51 }
0x132f   : > { %2387 = vmatpush.msrb.mxu2 %v4211_v53 }
0x139f   : > { %v2059_v57 = vpop.xlane.xlu1 %2058 }
0x13a0   : > { %v2060_v58 = vmul.f32 %v2059_v57, %v5071_v33 }
0x13a2   : > { %v2061_v60 = vadd.f32 1e-05, %v2060_v58 }
0x13a4   : > { %4563 = vrsqrt.f32 %v2061_v60  ;;  %vm2068_vm8 = vweird.f32 %v2061_v60 }
0x13aa   : > { %v4564_v62 = vpop.eup %4563 }
0x13ab   : > { %v2063_v63 = vmul.f32 %v4564_v62, %v2061_v60  ;;  %vm2069_vm7 = vweird.f32 %v4564_v62 }
0x13ac   : > { %vm2070_vm9 = vmor %vm2068_vm8, %vm2069_vm7 }
0x13ad   : > { %v2064_v0 = vmul.f32 %v4564_v62, %v2063_v63 }
0x13af   : > { %v2065_v3 = vmul.f32 0.5, %v2064_v0 }
0x13b1   : > { %v2066_v4 = vsub.f32 1.5, %v2065_v3  ;;  %v5508_v3 = vld [vmem:[%s4833_s27] sm:$0xff] }
0x13b3   : > { %v2067_v5 = vmul.f32 %v4564_v62, %v2066_v4 }
0x13b5   : > { %v2071_v7 = vsel %vm2070_vm9, %v4564_v62, %v2067_v5  ;;  %v4492_v5 = vld [vmem:[%s6100_s5 + $0x20] ss:$0 sm:$0xff] }
0x13b6   : > { %v2072_v9 = vmul.f32 %v2071_v7, %v2055_v49 }
0x13b8   : > { %v2078_v12 = vmul.f32 %v4485_v6, %v2072_v9  ;;  %v4491_v6 = vld [vmem:[%s6100_s5 + $0x18] ss:$0 sm:$0xff]  ;;  %v4493_v9 = vld [vmem:[%s6100_s5 + $0x1c] ss:$0 sm:$0xff] }
0x13ba   : > { %v2084_v13 = vadd.f32 %v4486_v11, %v2078_v12 }
0x13bc   : > { %4185 = vmatmul.msk.f32.vlgmr.msrb.gmra.mxu3 %vm551_vm0, %v2084_v13 }
0x13bd   : > { %2408 = vmatpush.msrb.mxu3 %v4218_v40  ;;  %v4235_v40 = vld [vmem:[%s6099_s4 + $0x340] sm:$0xff] }
0x13bf   : > { %2409 = vmatpush.msrb.mxu3 %v4217_v43  ;;  %v4210_v43 = vld [vmem:[%s6101_s6 + $0x40] sm:$0xff] }
0x13c1   : > { %2410 = vmatpush.msrb.mxu3 %v4216_v50 }
0x13c3   : > { %2411 = vmatpush.msrb.mxu3 %v4215_v1 }
0x143f   : > { %v2113_v17 = vpop.f32.mrf.mxu3 }
0x1440   : > { %v2114_v18 = vadd.f32 %v4487_v2, %v2113_v17  ;;  %v4494_v2 = vld [vmem:[%s6100_s5 + $0x1d] ss:$0 sm:$0xff] }
0x1442   : > { %v2116_v19 = vmax.f32 %v2114_v18, 0.0  ;;  %v4221_v18 = vld [vmem:[%s6099_s4 + $0x430] sm:$0xff] }
0x1444   : > { %4186 = vmatmul.msk.f32.vlgmr.msra.gmra.mxu0 %vm2129_vm10, %v2116_v19 }
0x14c1   : > { %v2150_v21 = vpop.f32.mrf.mxu0 }
0x14c2   : > { %v2151_v22 = vadd.f32 %v4488_v20, %v2150_v21  ;;  %v4220_v20 = vld [vmem:[%s6099_s4 + $0x428] sm:$0xff] }
0x14c4   : > { %v2153_v23 = vadd.f32 %v2151_v22, %v2084_v13  ;;  %v4219_v22 = vld [vmem:[%s6099_s4 + $0x420] sm:$0xff] }
0x14c6   : > { %v2154_v24 = vsel %vm551_vm0, %v2153_v23, 0.0 }
0x14c7   : > { %2155 = vadd.xlane.f32.xlu2 %v2154_v24 }
0x153a   : > { %v2156_v26 = vpop.xlane.xlu2 %2155 }
0x153b   : > { %v2157_v27 = vmul.f32 %v2156_v26, %v5071_v33  ;;  %v4496_v26 = vld [vmem:[%s6100_s5 + $0x21] ss:$0 sm:$0xff] }
0x153d   : > { %v2158_v28 = vsub.f32 %v2153_v23, %v2157_v27 }
0x153f   : > { %v2159_v29 = vmul.f32 %v2158_v28, %v2158_v28 }
0x1541   : > { %v2160_v41 = vsel %vm551_vm0, %v2159_v29, 0.0 }
0x1542   : > { %2161 = vadd.xlane.f32.xlu0 %v2160_v41 }
0x15b5   : > { %v2162_v48 = vpop.xlane.xlu0 %2161 }
0x15b6   : > { %v2163_v49 = vmul.f32 %v2162_v48, %v5071_v33 }
0x15b8   : > { %v2164_v52 = vadd.f32 1e-05, %v2163_v49 }
0x15ba   : > { %4565 = vrsqrt.f32 %v2164_v52  ;;  %vm2171_vm12 = vweird.f32 %v2164_v52 }
0x15c0   : > { %v4566_v54 = vpop.eup %4565 }
0x15c1   : > { %v2166_v55 = vmul.f32 %v4566_v54, %v2164_v52  ;;  %vm2172_vm11 = vweird.f32 %v4566_v54 }
0x15c2   : > { %vm2173_vm13 = vmor %vm2171_vm12, %vm2172_vm11 }
0x15c3   : > { %v2167_v10 = vmul.f32 %v4566_v54, %v2166_v55  ;;  %v4241_v55 = vld [vmem:[%s6099_s4 + $0x3d0] sm:$0xff] }
0x15c5   : > { %v2168_v56 = vmul.f32 0.5, %v2167_v10  ;;  %v4240_v10 = vld [vmem:[%s6099_s4 + $0x3c8] sm:$0xff] }
0x15c7   : > { %v2169_v57 = vsub.f32 1.5, %v2168_v56  ;;  %v4239_v56 = vld [vmem:[%s6099_s4 + $0x3c0] sm:$0xff] }
0x15c9   : > { %v2170_v58 = vmul.f32 %v4566_v54, %v2169_v57 }
0x15cb   : > { %v2174_v60 = vsel %vm2173_vm13, %v4566_v54, %v2170_v58  ;;  %v4242_v54 = vld [vmem:[%s6099_s4 + $0x3d8] sm:$0xff] }
0x15cc   : > { %v2175_v62 = vmul.f32 %v2174_v60, %v2158_v28  ;;  %v4232_v60 = vld [vmem:[%s6101_s6 + $0x48] sm:$0xff] }
0x15ce   : > { %v2181_v63 = vmul.f32 %v4489_v59, %v2175_v62  ;;  %v4245_v62 = vld [vmem:[%s6099_s4 + $0x450] sm:$0xff] }
0x15d0   : > { %v5503_v0 = vadd.f32 %v4490_v61, %v2181_v63  ;;  %v4246_v61 = vld [vmem:[%s6099_s4 + $0x458] sm:$0xff]  ;;  %v4244_v63 = vld [vmem:[%s6099_s4 + $0x448] sm:$0xff] }
0x15d2   : > { %4206 = vmatmul.msk.f32.vlgmr.msra.gmra.mxu3 %vm551_vm0, %v5503_v0  ;;  %v5512_v4 = vadd.f32 %v5508_v3, %v5503_v0 }
0x15d3   : > { %2519 = vmatpush.msra.mxu3 %v4232_v60 }
0x15d4   : > { %4204 = vmatmul.msk.f32.vlgmr.msrb.gmra.mxu1 %vm551_vm0, %v5512_v4  ;;  %4205 = vmatmul.msk.f32.vlgmr.msra.gmra.mxu2 %vm551_vm0, %v5512_v4 }
0x15da   : > { %4227 = vmatmul.msk.f32.vlgmr.msrb.gmra.mxu3 %vm551_vm0, %v5512_v4 }
0x15db   : > { %2630 = vmatpush.msrb.mxu3 %v4246_v61 }
0x15dc   : > { %4226 = vmatmul.msk.f32.vlgmr.msrb.gmra.mxu2 %vm551_vm0, %v5512_v4 }
0x15dd   : > { %2631 = vmatpush.msrb.mxu3 %v4245_v62 }
0x15df   : > { %2632 = vmatpush.msrb.mxu3 %v4244_v63 }
0x1651   : > { %v2233_v7 = vpop.f32.mrf.mxu1 }
0x1652   : > { %v2234_v13 = vadd.f32 %v4491_v6, %v2233_v7  ;;  %v4261_v6 = vld [vmem:[%s6099_s4 + $0x378] sm:$0xff] }
0x1654   : > { %v2236_v17 = vmul.f32 0.35355338, %v2234_v13 }
0x1655   : > { %v2283_v11 = vpop.f32.mrf.mxu3 }
0x1656   : > { %v2284_v12 = vadd.f32 %v4492_v5, %v2283_v11  ;;  %v4243_v5 = vld [vmem:[%s6099_s4 + $0x440] sm:$0xff]  ;;  %v4259_v11 = vld [vmem:[%s6099_s4 + $0x368] sm:$0xff] }
0x1657   : > { %v2257_v14 = vpop.f32.mrf.mxu2  ;;  %2633 = vmatpush.msrb.mxu3 %v4243_v5 }
0x1658   : > { %v2258_v15 = vadd.f32 %v4493_v9, %v2257_v14  ;;  %2341 = vmatpush.msra.mxu1 %v2284_v12  ;;  %v4260_v9 = vld [vmem:[%s6099_s4 + $0x370] sm:$0xff]  ;;  %v4497_v12 = vld [vmem:[%s6100_s5 + $0x1a] ss:$0 sm:$0xff]  ;;  %v4498_v14 = vld [vmem:[%s6100_s5 + $0x1e] ss:$0 sm:$0xff] }
0x165a   : > { %4207 = vmatpush.xpose.msk.msrb.mxu0 %vm625_vm1, %v2258_v15  ;;  %v4258_v15 = vld [vmem:[%s6099_s4 + $0x360] sm:$0xff] }
0x165d   : > { %4208 = vmatmul.msk.f32.vlgmr.msrb.gmra.mxu0 %vm625_vm1, %v2236_v17  ;;  %v2413_v19 = vpop.f32.mrf.mxu3 }
0x165e   : > { %2431 = vmatpush.msra.mxu0 %v4222_v16  ;;  %v2414_v21 = vadd.f32 %v4494_v2, %v2413_v19 }
0x165f   : > { %v2389_v37 = vpop.f32.mrf.mxu2 }
0x1660   : > { %2432 = vmatpush.msra.mxu0 %v4221_v18  ;;  %4229 = vmatpush.xpose.msk.msrb.mxu1 %vm625_vm1, %v2414_v21  ;;  %v2390_v38 = vadd.f32 %v4495_v34, %v2389_v37  ;;  %v4265_v18 = vld [vmem:[%s6099_s4 + $0x3f8] sm:$0xff]  ;;  %v4263_v21 = vld [vmem:[%s6099_s4 + $0x3e8] sm:$0xff] }
0x1662   : > { %2433 = vmatpush.msra.mxu0 %v4220_v20  ;;  %v2392_v42 = vmul.f32 0.35355338, %v2390_v38  ;;  %v4264_v20 = vld [vmem:[%s6099_s4 + $0x3f0] sm:$0xff] }
0x1663   : > { %v4268_v38 = vld [vmem:[%s6099_s4 + $0x470] sm:$0xff] }
0x1664   : > { %2434 = vmatpush.msra.mxu0 %v4219_v22  ;;  %v4262_v22 = vld [vmem:[%s6099_s4 + $0x3e0] sm:$0xff] }
0x1665   : > { %4228 = vmatmul.msk.f32.vlgmr.msra.gmra.mxu0 %vm551_vm0, %v5503_v0 }
0x1666   : > { %2542 = vmatpush.msrb.mxu0 %v4210_v43 }
0x16da   : > { %v2309_v23 = vpop.f32.mrf.mxu0 }
0x16db   : > { %v2312_v24 = vsel %vm625_vm1, %v2309_v23, -inf }
0x16dc   : > { %2313 = vmax.xlane.f32.xlu1 %v2312_v24 }
0x16e2   : > { %v2436_v27 = vpop.f32.mrf.mxu0 }
0x16e3   : > { %v2437_v28 = vadd.f32 %v4496_v26, %v2436_v27 }
0x16e5   : > { %2494 = vmatpush.msra.mxu2 %v2437_v28  ;;  %v4499_v28 = vld [vmem:[%s6100_s5 + $0x22] ss:$0 sm:$0xff] }
0x16e7   : > { %2607 = vmatpush.msrb.mxu2 %v4242_v54 }
0x16e9   : > { %2608 = vmatpush.msrb.mxu2 %v4241_v55 }
0x16eb   : > { %2609 = vmatpush.msrb.mxu2 %v4240_v10 }
0x16ed   : > { %2610 = vmatpush.msrb.mxu2 %v4239_v56 }
0x174f   : > { %v2314_v29 = vpop.xlane.xlu1 %2313 }
0x1750   : > { %v2315_v41 = vsub.f32 %v2309_v23, %v2314_v29  ;;  %v4256_v23 = vld [vmem:[%s6101_s6 + $0x50] sm:$0xff] }
0x1752   : > { %v2316_v45 = vmul.f32 1.442695, %v2315_v41 }
0x1754   : > { %4567 = vpow2.f32 %v2316_v45 }
0x175a   : > { %v4568_v30 = vpop.eup %4567 }
0x175b   : > { %v2318_v31 = vsel %vm625_vm1, %v4568_v30, 0.0 }
0x175c   : > { %2319 = vadd.xlane.f32.xlu2 %v2318_v31 }
0x17cf   : > { %v2320_v25 = vpop.xlane.xlu2 %2319 }
0x17d0   : > { %4569 = vrcp.f32 %v2320_v25 }
0x17d6   : > { %v4570_v32 = vpop.eup %4569 }
0x17d7   : > { %v2322_v35 = vmul.f32 %v4570_v32, %v4568_v30 }
0x17d9   : > { %4209 = vmatmul.msk.f32.vlgmr.msra.gmra.mxu1 %vm625_vm1, %v2322_v35 }
0x17da   : > { %2583 = vmatpush.msra.mxu1 %v4238_v36 }
0x17dc   : > { %2584 = vmatpush.msra.mxu1 %v4237_v8  ;;  %v4269_v8 = vld [vmem:[%s6099_s4 + $0x478] sm:$0xff] }
0x17de   : > { %2585 = vmatpush.msra.mxu1 %v4236_v39  ;;  %v4267_v39 = vld [vmem:[%s6099_s4 + $0x468] sm:$0xff] }
0x17e0   : > { %2586 = vmatpush.msra.mxu1 %v4235_v40  ;;  %v4266_v40 = vld [vmem:[%s6099_s4 + $0x460] sm:$0xff] }
0x17e1   : > { %4230 = vmatmul.msk.f32.vlgmr.msrb.gmra.mxu1 %vm625_vm1, %v2392_v42 }
0x17e9   : > { %4250 = vmatmul.msk.f32.vlgmr.msra.gmra.mxu1 %vm551_vm0, %v5512_v4 }
0x1856   : > { %v2343_v46 = vpop.f32.mrf.mxu1 }
0x1857   : > { %4234 = vmatmul.msk.f32.vlgmr.msrb.gmra.mxu0 %vm625_vm1, %v2343_v46 }
0x185e   : > { %v2462_v48 = vpop.f32.mrf.mxu1 }
0x185f   : > { %v2465_v49 = vsel %vm625_vm1, %v2462_v48, -inf }
0x1860   : > { %2466 = vmax.xlane.f32.xlu0 %v2465_v49 }
0x1866   : > { %v2588_v13 = vpop.f32.mrf.mxu1 }
0x1867   : > { %v2589_v16 = vadd.f32 %v4497_v12, %v2588_v13 }
0x1869   : > { %v2591_v19 = vmul.f32 0.35355338, %v2589_v16 }
0x18d3   : > { %v2467_v50 = vpop.xlane.xlu0 %2466 }
0x18d4   : > { %v2468_v51 = vsub.f32 %v2462_v48, %v2467_v50  ;;  %v2544_v24 = vpop.f32.mrf.mxu0  ;;  %v4501_v48 = vld [vmem:[%s6100_s5 + $0x1b] ss:$0 sm:$0xff] }
0x18d6   : > { %v2469_v52 = vmul.f32 1.442695, %v2468_v51 }
0x18d8   : > { %4571 = vpow2.f32 %v2469_v52  ;;  %v4502_v52 = vld [vmem:[%s6100_s5 + $0x23] ss:$0 sm:$0xff] }
0x18de   : > { %v4572_v1 = vpop.eup %4571 }
0x18df   : > { %v2471_v53 = vsel %vm625_vm1, %v4572_v1, 0.0 }
0x18e0   : > { %2472 = vadd.xlane.f32.xlu1 %v2471_v53 }
0x1953   : > { %v2473_v57 = vpop.xlane.xlu1 %2472 }
0x1954   : > { %4573 = vrcp.f32 %v2473_v57 }
0x195a   : > { %v4574_v58 = vpop.eup %4573 }
0x195b   : > { %v2475_v59 = vmul.f32 %v4574_v58, %v4572_v1 }
0x195d   : > { %4231 = vmatmul.msk.f32.vlgmr.msra.gmra.mxu2 %vm625_vm1, %v2475_v59 }
0x195e   : > { %2718 = vmatpush.msra.mxu2 %v4256_v23 }
0x1965   : > { %4251 = vmatmul.msk.f32.vlgmr.msrb.gmra.mxu2 %vm551_vm0, %v5512_v4 }
0x19e0   : > { %v2496_v7 = vpop.f32.mrf.mxu2 }
0x19e1   : > { %4233 = vmatmul.msk.f32.vlgmr.msra.gmra.mxu3 %vm625_vm1, %v2496_v7  ;;  %v4279_v7 = vld [vmem:[%s6101_s6 + $0x58] sm:$0xff] }
0x19e2   : > { %2760 = vmatpush.msra.mxu3 %v4261_v6 }
0x19e4   : > { %2761 = vmatpush.msra.mxu3 %v4260_v9 }
0x19e6   : > { %2762 = vmatpush.msra.mxu3 %v4259_v11  ;;  %v4503_v11 = vld [vmem:[%s6102_s7 + $0x2] ss:$0 sm:$0xff] }
0x19e8   : > { %v2612_v2 = vpop.f32.mrf.mxu2  ;;  %2763 = vmatpush.msra.mxu3 %v4258_v15 }
0x19e9   : > { %v2613_v17 = vadd.f32 %v4498_v14, %v2612_v2  ;;  %4252 = vmatmul.msk.f32.vlgmr.msrb.gmra.mxu3 %vm551_vm0, %v5503_v0  ;;  %v4291_v2 = vld [vmem:[%s6099_s4 + $0x518] sm:$0xff] }
0x19eb   : > { %4253 = vmatpush.xpose.msk.msra.mxu0 %vm625_vm1, %v2613_v17  ;;  %v4290_v17 = vld [vmem:[%s6099_s4 + $0x510] sm:$0xff] }
0x19ee   : > { %4254 = vmatmul.msk.f32.vlgmr.msra.gmra.mxu0 %vm625_vm1, %v2591_v19 }
0x19ef   : > { %2784 = vmatpush.msrb.mxu0 %v4265_v18  ;;  %v4289_v18 = vld [vmem:[%s6099_s4 + $0x508] sm:$0xff] }
0x19f1   : > { %2785 = vmatpush.msrb.mxu0 %v4264_v20  ;;  %4273 = vmatmul.msk.f32.vlgmr.msra.gmra.mxu3 %vm551_vm0, %v5512_v4 }
0x19f3   : > { %2786 = vmatpush.msrb.mxu0 %v4263_v21 }
0x19f5   : > { %2787 = vmatpush.msrb.mxu0 %v4262_v22 }
0x19f6   : > { %4274 = vmatmul.msk.f32.vlgmr.msrb.gmra.mxu0 %vm551_vm0, %v5512_v4  ;;  %v4500_v4 = vld [vmem:[%s6100_s5 + $0x1f] ss:$0 sm:$0xff] }
0x19f7   : > { %2895 = vmatpush.msra.mxu0 %v4279_v7 }
0x1a64   : > { %v2521_v26 = vpop.f32.mrf.mxu3 }
0x1a65   : > { %v2545_v27 = vadd.f32 %v2544_v24, %v2521_v26  ;;  %v4287_v24 = vld [vmem:[%s6099_s4 + $0x498] sm:$0xff]  ;;  %v4286_v26 = vld [vmem:[%s6099_s4 + $0x490] sm:$0xff] }
0x1a6b   : > { %v2661_v29 = vpop.f32.mrf.mxu0 }
0x1a6c   : > { %v2635_v41 = vpop.f32.mrf.mxu3  ;;  %v2664_v45 = vsel %vm625_vm1, %v2661_v29, -inf }
0x1a6d   : > { %v2636_v30 = vadd.f32 %v4499_v28, %v2635_v41  ;;  %2665 = vmax.xlane.f32.xlu2 %v2664_v45  ;;  %v4284_v28 = vld [vmem:[%s6099_s4 + $0x480] sm:$0xff] }
0x1a6f   : > { %2693 = vmatpush.msrb.mxu1 %v2636_v30 }
0x1a71   : > { %2807 = vmatpush.msra.mxu1 %v4269_v8 }
0x1a73   : > { %v2789_v31 = vpop.f32.mrf.mxu0  ;;  %2808 = vmatpush.msra.mxu1 %v4268_v38 }
0x1a74   : > { %v2790_v25 = vadd.f32 %v4500_v4, %v2789_v31  ;;  %v2765_v49 = vpop.f32.mrf.mxu3  ;;  %v4506_v4 = vld [vmem:[%s6100_s5 + $0x28] ss:$0 sm:$0xff] }
0x1a75   : > { %2809 = vmatpush.msra.mxu1 %v4267_v39  ;;  %v2766_v51 = vadd.f32 %v4501_v48, %v2765_v49  ;;  %v4504_v39 = vld [vmem:[%s6107_s12 + $0x3] ss:$0 sm:$0xff] }
0x1a76   : > { %4276 = vmatpush.xpose.msk.msrb.mxu2 %vm625_vm1, %v2790_v25 }
0x1a77   : > { %2810 = vmatpush.msra.mxu1 %v4266_v40  ;;  %v2768_v1 = vmul.f32 0.35355338, %v2766_v51  ;;  %v4311_v51 = vld [vmem:[%s6099_s4 + $0x4b0] sm:$0xff] }
0x1ae0   : > { %v2666_v32 = vpop.xlane.xlu2 %2665 }
0x1ae1   : > { %v2667_v34 = vsub.f32 %v2661_v29, %v2666_v32 }
0x1ae3   : > { %v2668_v35 = vmul.f32 1.442695, %v2667_v34 }
0x1ae5   : > { %4575 = vpow2.f32 %v2668_v35 }
0x1aeb   : > { %v4576_v36 = vpop.eup %4575 }
0x1aec   : > { %v2670_v37 = vsel %vm625_vm1, %v4576_v36, 0.0 }
0x1aed   : > { %2671 = vadd.xlane.f32.xlu0 %v2670_v37 }
0x1b60   : > { %v2672_v42 = vpop.xlane.xlu0 %2671 }
0x1b61   : > { %4577 = vrcp.f32 %v2672_v42  ;;  %v4505_v42 = vld [vmem:[%s6108_s13 + $0x3] ss:$0 sm:$0xff] }
0x1b67   : > { %v4578_v43 = vpop.eup %4577 }
0x1b68   : > { %v2674_v46 = vmul.f32 %v4578_v43, %v4576_v36 }
0x1b6a   : > { %4255 = vmatmul.msk.f32.vlgmr.msrb.gmra.mxu1 %vm625_vm1, %v2674_v46 }
0x1b6b   : > { %2982 = vmatpush.msrb.mxu1 %v4287_v24  ;;  %v4336_v24 = vld [vmem:[%s6099_s4 + $0x4c0] sm:$0xff] }
0x1b6d   : > { %2983 = vmatpush.msrb.mxu1 %v4286_v26 }
0x1b72   : > { %4275 = vmatmul.msk.f32.vlgmr.msra.gmra.mxu1 %vm551_vm0, %v5503_v0 }
0x1be7   : > { %v2695_v50 = vpop.f32.mrf.mxu1 }
0x1be8   : > { %4257 = vmatmul.msk.f32.vlgmr.msra.gmra.mxu2 %vm625_vm1, %v2695_v50  ;;  %v4312_v50 = vld [vmem:[%s6099_s4 + $0x4b8] sm:$0xff] }
0x1be9   : > { %3006 = vmatpush.msra.mxu2 %v4291_v2  ;;  %v4315_v2 = vld [vmem:[%s6099_s4 + $0x530] sm:$0xff] }
0x1beb   : > { %3007 = vmatpush.msra.mxu2 %v4290_v17  ;;  %v4314_v17 = vld [vmem:[%s6099_s4 + $0x528] sm:$0xff] }
0x1bed   : > { %3008 = vmatpush.msra.mxu2 %v4289_v18  ;;  %v4313_v18 = vld [vmem:[%s6099_s4 + $0x520] sm:$0xff] }
0x1bef   : > { %v2812_v53 = vpop.f32.mrf.mxu1 }
0x1bf0   : > { %v2813_v54 = vadd.f32 %v4502_v52, %v2812_v53  ;;  %4277 = vmatmul.msk.f32.vlgmr.msrb.gmra.mxu2 %vm625_vm1, %v2768_v1  ;;  %v4310_v52 = vld [vmem:[%s6099_s4 + $0x4a8] sm:$0xff]  ;;  %v4507_v1 = vld [vmem:[%s6100_s5 + $0x24] ss:$0 sm:$0xff] }
0x1bf2   : > { %2870 = vmatpush.msrb.mxu3 %v2813_v54 }
0x1c6b   : > { %v2720_v55 = vpop.f32.mrf.mxu2 }
0x1c6c   : > { %v2723_v10 = vadd.f32 %v2720_v55, %v2545_v27  ;;  %v4285_v27 = vld [vmem:[%s6099_s4 + $0x488] sm:$0xff] }
0x1c6d   : > { %2984 = vmatpush.msrb.mxu1 %v4285_v27 }
0x1c6f   : > { %2985 = vmatpush.msrb.mxu1 %v4284_v28  ;;  %v4510_v28 = vld [vmem:[%s6100_s5 + $0x29] ss:$0 sm:$0xff] }
0x1c73   : > { %v2838_v56 = vpop.f32.mrf.mxu2 }
0x1c74   : > { %v2841_v57 = vsel %vm625_vm1, %v2838_v56, -inf }
0x1c75   : > { %2842 = vmax.xlane.f32.xlu1 %v2841_v57  ;;  %v4293_v57 = vld [vmem:[%s6099_s4 + $0x588] sm:$0xff] }
0x1ce8   : > { %v2843_v58 = vpop.xlane.xlu1 %2842 }
0x1ce9   : > { %v2844_v59 = vsub.f32 %v2838_v56, %v2843_v58  ;;  %v4294_v56 = vld [vmem:[%s6099_s4 + $0x590] sm:$0xff]  ;;  %v4292_v58 = vld [vmem:[%s6099_s4 + $0x580] sm:$0xff] }
0x1ceb   : > { %v2845_v60 = vmul.f32 1.442695, %v2844_v59  ;;  %v5778_v59 = vld [vmem:[%s5085_s20] sm:$0xff] }
0x1ced   : > { %4579 = vpow2.f32 %v2845_v60  ;;  %v5783_v60 = vld [vmem:[%s5085_s20 + $0x8] sm:$0xff]  ;;  %s4412_s20 = sshll.u32 %s4771_s17, 3  ;;  %s3883_s17 = sshll.u32 %s501_s26, 4  ;;  %s3884_s17 = int_to_ptr.vmem [resolvable:$true] %s3883_s17 }
0x1cee   : > { %s3881_s18 = scalar_lea.hbm %s6109_s14, %s4412_s20 }
0x1cef   : > { %s3885_s3 = sshll.u32 %s3881_s18, 4  ;;  %s3886_s3 = int_to_ptr.hbm [resolvable:$true] %s3885_s3 }
0x1cf0   : > { %s4624_s28 = sshra.s32 %s3886_s3, 4  ;;  %s4625_s28 = int_to_ptr.hbm [resolvable:$true] %s4624_s28 }
0x1cf1   : > { %s4626_s20 = scalar_lea.hbm %s4625_s28, 8  ;;  %p4631_p0 = scmp.lt.s32.totalorder %s4625_s28, %s6109_s14 }
0x1cf2   : > { %p4627_p11 = scmp.ne.s32.totalorder %s4625_s28, %s4626_s20  ;;  %p4632_p1 = scmp.lt.s32.totalorder %s4630_s24, %s4626_s20 }
0x1cf3   : > { %v4580_v61 = vpop.eup %4579 }
0x1cf4   : > { %v2847_v62 = vsel %vm625_vm1, %v4580_v61, 0.0  ;;  %p4628_p12 = pnand %p4627_p11, %p4788_p5  ;;  %p4633_p2 = por %p4632_p1, %p4631_p0 }
0x1cf5   : > { %2848 = vadd.xlane.f32.xlu2 %v2847_v62 }
0x1cf6   : > { %p4629_p13 = pneg %p4628_p12 }
0x1cf8   : > { %p4634_p3 = pnand %p4633_p2, %p4629_p13 }
0x1d68   : > { %v2849_v63 = vpop.xlane.xlu2 %2848 }
0x1d69   : > { %4581 = vrcp.f32 %v2849_v63 }
0x1d6f   : > { %v4582_v5 = vpop.eup %4581 }
0x1d70   : > { %v2851_v6 = vmul.f32 %v4582_v5, %v4580_v61 }
0x1d72   : > { %4278 = vmatmul.msk.f32.vlgmr.msrb.gmra.mxu3 %vm625_vm1, %v2851_v6 }
0x1df5   : > { %v2872_v9 = vpop.f32.mrf.mxu3 }
0x1df6   : > { %4280 = vmatmul.msk.f32.vlgmr.msra.gmra.mxu0 %vm625_vm1, %v2872_v9  ;;  %v4509_v9 = vld [vmem:[%s6100_s5 + $0x2c] ss:$0 sm:$0xff] }
0x1e73   : > { %v2897_v12 = vpop.f32.mrf.mxu0 }
0x1e74   : > { %v2900_v13 = vadd.f32 %v2897_v12, %v2723_v10  ;;  %v4295_v10 = vld [vmem:[%s6099_s4 + $0x598] sm:$0xff] }
0x1e75   : > { %3032 = vmatpush.msra.mxu3 %v4295_v10  ;;  %v4308_v10 = vld [vmem:[%s6101_s6 + $0x60] sm:$0xff] }
0x1e76   : > { %v2906_v14 = vadd.f32 %v4503_v11, %v2900_v13 }
0x1e77   : > { %3033 = vmatpush.msra.mxu3 %v4294_v56 }
0x1e78   : > { %v2907_v15 = vadd.f32 %v2906_v14, %v5503_v0  ;;  %v4288_v0 = vld [vmem:[%s6099_s4 + $0x500] sm:$0xff] }
0x1e79   : > { %3009 = vmatpush.msra.mxu2 %v4288_v0  ;;  %3034 = vmatpush.msra.mxu3 %v4293_v57 }
0x1e7a   : > { %v2908_v16 = vsel %vm551_vm0, %v2907_v15, 0.0  ;;  %4300 = vmatmul.msk.f32.vlgmr.msra.gmra.mxu2 %vm551_vm0, %v5100_v44 }
0x1e7b   : > { %2909 = vadd.xlane.f32.xlu0 %v2908_v16  ;;  %3035 = vmatpush.msra.mxu3 %v4292_v58  ;;  %v4316_v16 = vld [vmem:[%s6099_s4 + $0x538] sm:$0xff]  ;;  %v4513_v58 = vld [vmem:[%s6100_s5 + $0x2a] ss:$0 sm:$0xff] }
0x1e7c   : > { %4302 = vmatmul.msk.f32.vlgmr.msra.gmra.mxu3 %vm551_vm0, %v5778_v59 }
0x1e82   : > { %4301 = vmatmul.msk.f32.gmra.mxu2 %vm551_vm0, %v5108_v47 }
0x1e84   : > { %4303 = vmatmul.msk.f32.gmra.mxu3 %vm551_vm0, %v5783_v60 }
0x1eee   : > { %v2910_v19 = vpop.xlane.xlu0 %2909 }
0x1eef   : > { %v2911_v20 = vmul.f32 %v2910_v19, %v5071_v33 }
0x1ef1   : > { %v2912_v21 = vsub.f32 %v2907_v15, %v2911_v20 }
0x1ef3   : > { %v2913_v22 = vmul.f32 %v2912_v21, %v2912_v21 }
0x1ef5   : > { %v2914_v23 = vsel %vm551_vm0, %v2913_v22, 0.0  ;;  %v4338_v22 = vld [vmem:[%s6099_s4 + $0x4d0] sm:$0xff] }
0x1ef6   : > { %2915 = vadd.xlane.f32.xlu1 %v2914_v23  ;;  %v4337_v23 = vld [vmem:[%s6099_s4 + $0x4c8] sm:$0xff] }
0x1efd   : > { %v3011_v29 = vpop.f32.mrf.mxu2 }
0x1efe   : > { %v3012_v32 = vadd.f32 %v4506_v4, %v3011_v29  ;;  %v4508_v29 = vld [vmem:[%s6100_s5 + $0x25] ss:$0 sm:$0xff] }
0x1eff   : > { %v3037_v6 = vpop.f32.mrf.mxu3 }
0x1f00   : > { %v3038_v12 = vadd.f32 %v4509_v9, %v3037_v6 }
0x1f05   : > { %v3014_v31 = vpop.f32.mrf.mxu2 }
0x1f06   : > { %v3015_v25 = vadd.f32 %v4506_v4, %v3014_v31 }
0x1f07   : > { %v3040_v11 = vpop.f32.mrf.mxu3 }
0x1f08   : > { %4304 = vmatpush.xpose.msk.msrb.mxu0 %vm625_vm1, %v3015_v25  ;;  %v3041_v13 = vadd.f32 %v4509_v9, %v3040_v11 }
0x1f0a   : > { %3100 = vmatpush.msra.mxu1 %v3041_v13  ;;  %v4333_v13 = vld [vmem:[%s6101_s6 + $0x68] sm:$0xff] }
0x1f0c   : > { %4305 = vmatpush.xpose.msk.msrb.mxu0 %vm625_vm1, %v3012_v32  ;;  %3101 = vmatpush.msra.mxu1 %v3038_v12  ;;  %v4320_v32 = vld [vmem:[%s6099_s4 + $0x5b8] sm:$0xff] }
0x1f0d   : > { %3194 = vmatpush.msrb.mxu2 %v4320_v32  ;;  %v4363_v32 = vld [vmem:[%s6099_s4 + $0x4e8] sm:$0xff] }
0x1f10   : > { %3144 = vmatpush.msra.mxu0 %v4312_v50 }
0x1f12   : > { %3145 = vmatpush.msra.mxu0 %v4311_v51 }
0x1f14   : > { %3146 = vmatpush.msra.mxu0 %v4310_v52 }
0x1f69   : > { %v2916_v41 = vpop.xlane.xlu1 %2915 }
0x1f6a   : > { %v2917_v45 = vmul.f32 %v2916_v41, %v5071_v33 }
0x1f6c   : > { %v2918_v30 = vadd.f32 1e-05, %v2917_v45 }
0x1f6e   : > { %4583 = vrsqrt.f32 %v2918_v30  ;;  %vm2925_vm15 = vweird.f32 %v2918_v30 }
0x1f74   : > { %v4584_v34 = vpop.eup %4583 }
0x1f75   : > { %v2920_v35 = vmul.f32 %v4584_v34, %v2918_v30  ;;  %vm2926_vm14 = vweird.f32 %v4584_v34 }
0x1f76   : > { %vm2927_vm2 = vmor %vm2925_vm15, %vm2926_vm14 }
0x1f77   : > { %v2921_v36 = vmul.f32 %v4584_v34, %v2920_v35  ;;  %v4318_v35 = vld [vmem:[%s6099_s4 + $0x5a8] sm:$0xff] }
0x1f79   : > { %v2922_v37 = vmul.f32 0.5, %v2921_v36  ;;  %v4317_v36 = vld [vmem:[%s6099_s4 + $0x5a0] sm:$0xff] }
0x1f7b   : > { %v2923_v8 = vsub.f32 1.5, %v2922_v37  ;;  %v4343_v37 = vld [vmem:[%s6099_s4 + $0x558] sm:$0xff] }
0x1f7d   : > { %v2924_v38 = vmul.f32 %v4584_v34, %v2923_v8  ;;  %v4342_v8 = vld [vmem:[%s6099_s4 + $0x550] sm:$0xff] }
0x1f7f   : > { %v2928_v40 = vsel %vm2927_vm2, %v4584_v34, %v2924_v38  ;;  %v4319_v34 = vld [vmem:[%s6099_s4 + $0x5b0] sm:$0xff]  ;;  %v4341_v38 = vld [vmem:[%s6099_s4 + $0x548] sm:$0xff] }
0x1f80   : > { %v2929_v43 = vmul.f32 %v2928_v40, %v2912_v21  ;;  %v4339_v21 = vld [vmem:[%s6099_s4 + $0x4d8] sm:$0xff]  ;;  %3195 = vmatpush.msrb.mxu2 %v4319_v34  ;;  %v4362_v34 = vld [vmem:[%s6099_s4 + $0x4e0] sm:$0xff] }
0x1f82   : > { %v2935_v46 = vmul.f32 %v4504_v39, %v2929_v43  ;;  %3196 = vmatpush.msrb.mxu2 %v4318_v35  ;;  %v4340_v39 = vld [vmem:[%s6099_s4 + $0x540] sm:$0xff] }
0x1f84   : > { %v5739_v48 = vadd.f32 %v4505_v42, %v2935_v46  ;;  %3197 = vmatpush.msrb.mxu2 %v4317_v36  ;;  %v4512_v46 = vld [vmem:[%s6100_s5 + $0x2d] ss:$0 sm:$0xff] }
0x1f85   : > { %4327 = vmatmul.msk.f32.vlgmr.msrb.gmra.mxu2 %vm551_vm0, %v5778_v59 }
0x1f86   : > { %v5743_v49 = vadd.f32 %v5508_v3, %v5739_v48  ;;  %v4309_v3 = vld [vmem:[%s6099_s4 + $0x4a0] sm:$0xff]  ;;  %3376 = vmatpush.msra.mxu2 %v4343_v37 }
0x1f87   : > { %3147 = vmatpush.msra.mxu0 %v4309_v3 }
0x1f88   : > { %4299 = vmatmul.msk.f32.vlgmr.msrb.gmra.mxu1 %vm551_vm0, %v5743_v49  ;;  %3377 = vmatpush.msra.mxu2 %v4342_v8 }
0x1f89   : > { %3168 = vmatpush.msrb.mxu1 %v4316_v16  ;;  %v4345_v16 = vld [vmem:[%s6099_s4 + $0x5c8] sm:$0xff] }
0x1f8a   : > { %3378 = vmatpush.msra.mxu2 %v4341_v38  ;;  %v4515_v38 = vld [vmem:[%s6100_s5 + $0x2b] ss:$0 sm:$0xff] }
0x1f8b   : > { %3169 = vmatpush.msrb.mxu1 %v4315_v2  ;;  %v4344_v2 = vld [vmem:[%s6099_s4 + $0x5c0] sm:$0xff] }
0x1f8c   : > { %3379 = vmatpush.msra.mxu2 %v4340_v39 }
0x1f8d   : > { %3170 = vmatpush.msrb.mxu1 %v4314_v17  ;;  %4328 = vmatmul.msk.f32.gmra.mxu2 %vm551_vm0, %v5783_v60 }
0x1f8f   : > { %3171 = vmatpush.msrb.mxu1 %v4313_v18 }
0x1f95   : > { %4352 = vmatmul.msk.f32.vlgmr.msra.gmra.mxu2 %vm551_vm0, %v5100_v44 }
0x1f9d   : > { %4353 = vmatmul.msk.f32.gmra.mxu2 %vm551_vm0, %v5108_v47 }
0x2005   : > { %v2987_v53 = vpop.f32.mrf.mxu1 }
0x2006   : > { %v2988_v54 = vadd.f32 %v4507_v1, %v2987_v53 }
0x2008   : > { %v2990_v55 = vmul.f32 0.35355338, %v2988_v54  ;;  %v3199_v43 = vpop.f32.mrf.mxu2 }
0x2009   : > { %v3200_v3 = vadd.f32 %v4512_v46, %v3199_v43 }
0x200a   : > { %4306 = vmatmul.msk.f32.vlgmr.msrb.gmra.mxu0 %vm625_vm1, %v2990_v55 }
0x2010   : > { %v3202_v51 = vpop.f32.mrf.mxu2 }
0x2011   : > { %v3203_v1 = vadd.f32 %v4512_v46, %v3202_v51 }
0x2012   : > { %4324 = vmatmul.msk.f32.vlgmr.msra.gmra.mxu0 %vm551_vm0, %v5743_v49 }
0x2013   : > { %3262 = vmatpush.msrb.mxu0 %v3203_v1  ;;  %v4372_v1 = vld [vmem:[%s6099_s4 + $0x5f0] sm:$0xff] }
0x2015   : > { %3263 = vmatpush.msrb.mxu0 %v3200_v3  ;;  %v4373_v3 = vld [vmem:[%s6099_s4 + $0x5f8] sm:$0xff] }
0x2017   : > { %3311 = vmatpush.msra.mxu0 %v4308_v10 }
0x2018   : > { %v3381_v56 = vpop.f32.mrf.mxu2 }
0x2019   : > { %v3382_v6 = vadd.f32 %v4513_v58, %v3381_v56 }
0x2087   : > { %v3069_v61 = vpop.f32.mrf.mxu0 }
0x2088   : > { %v3072_v62 = vsel %vm1427_vm6, %v3069_v61, -inf }
0x2089   : > { %3073 = vmax.xlane.f32.xlu2 %v3072_v62 }
0x208f   : > { %v3149_v45 = vpop.f32.mrf.mxu0 }
0x2090   : > { %v3150_v4 = vadd.f32 %v4508_v29, %v3149_v45 }
0x2092   : > { %v3152_v25 = vmul.f32 0.35355338, %v3150_v4 }
0x20fc   : > { %v3074_v63 = vpop.xlane.xlu2 %3073 }
0x20fd   : > { %v3075_v5 = vsub.f32 %v3069_v61, %v3074_v63  ;;  %v3384_v61 = vpop.f32.mrf.mxu2 }
0x20fe   : > { %v3385_v63 = vadd.f32 %v4513_v58, %v3384_v61 }
0x20ff   : > { %v3076_v7 = vmul.f32 1.442695, %v3075_v5 }
0x2101   : > { %4585 = vpow2.f32 %v3076_v7  ;;  %v4511_v7 = vld [vmem:[%s6100_s5 + $0x26] ss:$0 sm:$0xff] }
0x2107   : > { %v4586_v14 = vpop.eup %4585 }
0x2108   : > { %v3078_v15 = vsel %vm1427_vm6, %v4586_v14, 0.0 }
0x2109   : > { %3079 = vadd.xlane.f32.xlu0 %v3078_v15  ;;  %v4346_v15 = vld [vmem:[%s6099_s4 + $0x5d0] sm:$0xff] }
0x217c   : > { %v3080_v0 = vpop.xlane.xlu0 %3079 }
0x217d   : > { %4587 = vrcp.f32 %v3080_v0 }
0x2183   : > { %v4588_v19 = vpop.eup %4587 }
0x2184   : > { %v3082_v20 = vmul.f32 %v4588_v19, %v4586_v14  ;;  %v4347_v14 = vld [vmem:[%s6099_s4 + $0x5d8] sm:$0xff] }
0x2186   : > { %4307 = vmatmul.msk.f32.vlgmr.msra.gmra.mxu1 %vm1427_vm6, %v3082_v20  ;;  %v4369_v20 = vld [vmem:[%s6099_s4 + $0x578] sm:$0xff] }
0x2187   : > { %3352 = vmatpush.msra.mxu1 %v4339_v21  ;;  %v4368_v21 = vld [vmem:[%s6099_s4 + $0x570] sm:$0xff]  ;;  %3562 = vmatpush.msrb.mxu2 %v4369_v20 }
0x2189   : > { %3353 = vmatpush.msra.mxu1 %v4338_v22  ;;  %v4367_v22 = vld [vmem:[%s6099_s4 + $0x568] sm:$0xff]  ;;  %3563 = vmatpush.msrb.mxu2 %v4368_v21 }
0x218b   : > { %3354 = vmatpush.msra.mxu1 %v4337_v23  ;;  %v4366_v23 = vld [vmem:[%s6099_s4 + $0x560] sm:$0xff]  ;;  %3564 = vmatpush.msrb.mxu2 %v4367_v22 }
0x218d   : > { %3355 = vmatpush.msra.mxu1 %v4336_v24  ;;  %3565 = vmatpush.msrb.mxu2 %v4366_v23 }
0x218e   : > { %4325 = vmatmul.msk.f32.vlgmr.msrb.gmra.mxu1 %vm551_vm0, %v5100_v44  ;;  %4378 = vmatmul.msk.f32.vlgmr.msrb.gmra.mxu2 %vm551_vm0, %v5100_v44 }
0x2196   : > { %4326 = vmatmul.msk.f32.gmra.mxu1 %vm551_vm0, %v5108_v47  ;;  %4379 = vmatmul.msk.f32.gmra.mxu2 %vm551_vm0, %v5108_v47  ;;  %v4365_v47 = vld [vmem:[%s6099_s4 + $0x4f8] sm:$0xff] }
0x219e   : > { %4351 = vmatmul.msk.f32.vlgmr.msra.gmra.mxu1 %vm551_vm0, %v5743_v49 }
0x2203   : > { %v5823_v26 = vpop.f32.mrf.mxu1 }
0x220b   : > { %v3173_v27 = vpop.f32.mrf.mxu1 }
0x220c   : > { %v3174_v31 = vadd.f32 %v4510_v28, %v3173_v27 }
0x2211   : > { %v3567_v8 = vpop.f32.mrf.mxu2 }
0x2212   : > { %v3568_v43 = vadd.f32 %v4515_v38, %v3567_v8 }
0x2213   : > { %v3176_v41 = vpop.f32.mrf.mxu1 }
0x2214   : > { %v3177_v30 = vadd.f32 %v4510_v28, %v3176_v41 }
0x2216   : > { %4329 = vmatpush.xpose.msk.msrb.mxu3 %vm625_vm1, %v3177_v30  ;;  %v4514_v30 = vld [vmem:[%s6100_s5 + $0x2e] ss:$0 sm:$0xff] }
0x2219   : > { %v3570_v39 = vpop.f32.mrf.mxu2 }
0x221a   : > { %4330 = vmatpush.xpose.msk.msrb.mxu3 %vm625_vm1, %v3174_v31 }
0x221b   : > { %v3357_v9 = vpop.f32.mrf.mxu1 }
0x221c   : > { %v3358_v11 = vadd.f32 %v4511_v7, %v3357_v9 }
0x221d   : > { %4331 = vmatmul.msk.f32.vlgmr.msrb.gmra.mxu3 %vm625_vm1, %v3152_v25  ;;  %v4364_v25 = vld [vmem:[%s6099_s4 + $0x4f0] sm:$0xff] }
0x221e   : > { %v3360_v12 = vmul.f32 0.35355338, %v3358_v11  ;;  %3288 = vmatpush.msra.mxu3 %v4333_v13 }
0x2220   : > { %3402 = vmatpush.msrb.mxu3 %v4347_v14 }
0x2222   : > { %3403 = vmatpush.msrb.mxu3 %v4346_v15  ;;  %v4386_v15 = vld [vmem:[%s6101_s6 + $0x78] sm:$0xff] }
0x2224   : > { %3404 = vmatpush.msrb.mxu3 %v4345_v16 }
0x2226   : > { %3405 = vmatpush.msrb.mxu3 %v4344_v2  ;;  %v4518_v2 = vld [vmem:[%s6102_s7 + $0x3] ss:$0 sm:$0xff] }
0x22a0   : > { %v3231_v40 = vpop.f32.mrf.mxu3 }
0x22a1   : > { %v3234_v42 = vsel %vm1427_vm6, %v3231_v40, -inf }
0x22a2   : > { %3235 = vmax.xlane.f32.xlu1 %v3234_v42  ;;  %v4360_v42 = vld [vmem:[%s6101_s6 + $0x70] sm:$0xff] }
0x2315   : > { %v3236_v50 = vpop.xlane.xlu1 %3235 }
0x2316   : > { %v3237_v52 = vsub.f32 %v3231_v40, %v3236_v50  ;;  %v3571_v40 = vadd.f32 %v4515_v38, %v3570_v39  ;;  %v4519_v38 = vld [vmem:[%s6107_s12 + $0x4] ss:$0 sm:$0xff] }
0x2318   : > { %v3238_v53 = vmul.f32 1.442695, %v3237_v52 }
0x231a   : > { %4589 = vpow2.f32 %v3238_v53  ;;  %v4371_v53 = vld [vmem:[%s6099_s4 + $0x5e8] sm:$0xff] }
0x2320   : > { %v4590_v54 = vpop.eup %4589 }
0x2321   : > { %v3240_v55 = vsel %vm1427_vm6, %v4590_v54, 0.0 }
0x2322   : > { %3241 = vadd.xlane.f32.xlu2 %v3240_v55 }
0x2395   : > { %v3242_v57 = vpop.xlane.xlu2 %3241 }
0x2396   : > { %4591 = vrcp.f32 %v3242_v57 }
0x239c   : > { %v4592_v62 = vpop.eup %4591 }
0x239d   : > { %v3244_v5 = vmul.f32 %v4592_v62, %v4590_v54  ;;  %v4370_v54 = vld [vmem:[%s6099_s4 + $0x5e0] sm:$0xff]  ;;  %v4517_v62 = vld [vmem:[%s6100_s5 + $0x2f] ss:$0 sm:$0xff] }
0x239f   : > { %4332 = vmatmul.msk.f32.vlgmr.msrb.gmra.mxu0 %vm1427_vm6, %v3244_v5 }
0x23a0   : > { %4356 = vmatpush.xpose.msk.msrb.mxu0 %vm625_vm1, %v3385_v63 }
0x23a4   : > { %4357 = vmatpush.xpose.msk.msrb.mxu0 %vm625_vm1, %v3382_v6 }
0x23a7   : > { %4335 = vmatmul.msk.f32.vlgmr.msra.gmra.mxu0 %vm625_vm1, %v5823_v26 }
0x23a8   : > { %3496 = vmatpush.msra.mxu0 %v4360_v42 }
0x23af   : > { %4358 = vmatmul.msk.f32.vlgmr.msrb.gmra.mxu0 %vm625_vm1, %v3360_v12 }
0x23b0   : > { %4382 = vmatpush.xpose.msk.msrb.mxu0 %vm625_vm1, %v3571_v40  ;;  %v4520_v40 = vld [vmem:[%s6108_s13 + $0x4] ss:$0 sm:$0xff] }
0x23b4   : > { %4383 = vmatpush.xpose.msk.msrb.mxu0 %vm625_vm1, %v3568_v43 }
0x241c   : > { %v3265_v17 = vpop.f32.mrf.mxu0 }
0x241d   : > { %4334 = vmatmul.msk.f32.vlgmr.msra.gmra.mxu3 %vm625_vm1, %v3265_v17 }
0x241e   : > { %3588 = vmatpush.msra.mxu3 %v4373_v3 }
0x2420   : > { %3589 = vmatpush.msra.mxu3 %v4372_v1 }
0x2422   : > { %3590 = vmatpush.msra.mxu3 %v4371_v53 }
0x2424   : > { %v5902_v18 = vpop.f32.mrf.mxu0  ;;  %3591 = vmatpush.msra.mxu3 %v4370_v54  ;;  %v4522_v54 = vld [vmem:[%s6106_s11 + $0x1] ss:$0 sm:$0xff] }
0x2425   : > { %4354 = vmatmul.msk.f32.vlgmr.msrb.gmra.mxu3 %vm551_vm0, %v5778_v59 }
0x242c   : > { %v3439_v0 = vpop.f32.mrf.mxu0 }
0x242d   : > { %v3442_v19 = vsel %vm1427_vm6, %v3439_v0, -inf  ;;  %4355 = vmatmul.msk.f32.gmra.mxu3 %vm551_vm0, %v5783_v60 }
0x242e   : > { %3443 = vmax.xlane.f32.xlu0 %v3442_v19 }
0x2435   : > { %4380 = vmatmul.msk.f32.vlgmr.msra.gmra.mxu3 %vm551_vm0, %v5778_v59 }
0x243d   : > { %4381 = vmatmul.msk.f32.gmra.mxu3 %vm551_vm0, %v5783_v60 }
0x24a0   : > { %v3290_v24 = vpop.f32.mrf.mxu3 }
0x24a1   : > { %v3444_v26 = vpop.xlane.xlu0 %3443  ;;  %v3314_v55 = vadd.f32 %v5902_v18, %v3290_v24 }
0x24a2   : > { %v3445_v27 = vsub.f32 %v3439_v0, %v3444_v26 }
0x24a4   : > { %v3446_v28 = vmul.f32 1.442695, %v3445_v27  ;;  %v4394_v27 = vld [vmem:[%s6103_s8 + $0x38] sm:$0xff] }
0x24a6   : > { %4593 = vpow2.f32 %v3446_v28  ;;  %v4392_v28 = vld [vmem:[%s6103_s8 + $0x28] sm:$0xff] }
0x24a8   : > { %v3407_v29 = vpop.f32.mrf.mxu3 }
0x24a9   : > { %v3408_v31 = vadd.f32 %v4514_v30, %v3407_v29  ;;  %v4391_v29 = vld [vmem:[%s6103_s8 + $0x20] sm:$0xff] }
0x24ac   : > { %v4594_v41 = vpop.eup %4593 }
0x24ad   : > { %v3448_v45 = vsel %vm1427_vm6, %v4594_v41, 0.0 }
0x24ae   : > { %3449 = vadd.xlane.f32.xlu1 %v3448_v45  ;;  %v4403_v45 = vld [vmem:[%s6105_s10 + $0x70] sm:$0xff] }
0x24b0   : > { %v3410_v4 = vpop.f32.mrf.mxu3 }
0x24b1   : > { %v3411_v44 = vadd.f32 %v4514_v30, %v3410_v4  ;;  %v4402_v30 = vld [vmem:[%s6105_s10 + $0x68] sm:$0xff] }
0x24b3   : > { %3470 = vmatpush.msrb.mxu1 %v3411_v44  ;;  %v4401_v44 = vld [vmem:[%s6105_s10 + $0x60] sm:$0xff] }
0x24b5   : > { %3471 = vmatpush.msrb.mxu1 %v3408_v31 }
0x24b7   : > { %3538 = vmatpush.msra.mxu1 %v4365_v47 }
0x24b8   : > { %v3593_v61 = vpop.f32.mrf.mxu3 }
0x24b9   : > { %3539 = vmatpush.msra.mxu1 %v4364_v25  ;;  %v3594_v59 = vadd.f32 %v4517_v62, %v3593_v61  ;;  %v4400_v25 = vld [vmem:[%s6105_s10 + $0x58] sm:$0xff] }
0x24bb   : > { %3540 = vmatpush.msra.mxu1 %v4363_v32 }
0x24bd   : > { %3541 = vmatpush.msra.mxu1 %v4362_v34 }
0x24c0   : > { %v3596_v5 = vpop.f32.mrf.mxu3 }
0x24c1   : > { %v3597_v7 = vadd.f32 %v4517_v62, %v3596_v5 }
0x2521   : > { %v3450_v35 = vpop.xlane.xlu1 %3449 }
0x2522   : > { %4595 = vrcp.f32 %v3450_v35 }
0x2528   : > { %v4596_v36 = vpop.eup %4595 }
0x2529   : > { %v3452_v37 = vmul.f32 %v4596_v36, %v4594_v41  ;;  %v4404_v41 = vld [vmem:[%s6105_s10 + $0x78] sm:$0xff] }
0x252a   : > { %3788 = vmatpush.msra.mxu2 %v4404_v41 }
0x252b   : > { %4359 = vmatmul.msk.f32.vlgmr.msrb.gmra.mxu1 %vm1427_vm6, %v3452_v37 }
0x252c   : > { %3656 = vmatpush.msrb.mxu1 %v3597_v7  ;;  %3789 = vmatpush.msra.mxu2 %v4403_v45 }
0x252e   : > { %3657 = vmatpush.msrb.mxu1 %v3594_v59  ;;  %3790 = vmatpush.msra.mxu2 %v4402_v30 }
0x2530   : > { %3791 = vmatpush.msra.mxu2 %v4401_v44 }
0x2532   : > { %3792 = vmatpush.msra.mxu2 %v4400_v25 }
0x2533   : > { %4377 = vmatmul.msk.f32.vlgmr.msra.gmra.mxu1 %vm551_vm0, %v5743_v49  ;;  %v4516_v49 = vld [vmem:[%s6100_s5 + $0x27] ss:$0 sm:$0xff] }
0x2534   : > { %3754 = vmatpush.msra.mxu1 %v4394_v27 }
0x25a8   : > { %v3473_v46 = vpop.f32.mrf.mxu1 }
0x25a9   : > { %4361 = vmatmul.msk.f32.vlgmr.msra.gmra.mxu0 %vm625_vm1, %v3473_v46 }
0x25aa   : > { %3682 = vmatpush.msra.mxu0 %v4386_v15  ;;  %v4523_v15 = vld [vmem:[%s6107_s12 + $0x5] ss:$0 sm:$0xff] }
0x25b0   : > { %v3543_v50 = vpop.f32.mrf.mxu1 }
0x25b1   : > { %v3544_v51 = vadd.f32 %v4516_v49, %v3543_v50  ;;  %v4399_v49 = vld [vmem:[%s6105_s10 + $0x50] sm:$0xff]  ;;  %v4398_v50 = vld [vmem:[%s6105_s10 + $0x48] sm:$0xff] }
0x25b2   : > { %3793 = vmatpush.msra.mxu2 %v4399_v49 }
0x25b3   : > { %v3546_v52 = vmul.f32 0.35355338, %v3544_v51  ;;  %v4397_v51 = vld [vmem:[%s6105_s10 + $0x40] sm:$0xff] }
0x25b4   : > { %3794 = vmatpush.msra.mxu2 %v4398_v50 }
0x25b5   : > { %4384 = vmatmul.msk.f32.vlgmr.msrb.gmra.mxu0 %vm625_vm1, %v3546_v52  ;;  %v4521_v52 = vld [vmem:[%s6104_s9 + $0x1] ss:$0 sm:$0xff] }
0x25b6   : > { %3795 = vmatpush.msra.mxu2 %v4397_v51 }
0x2626   : > { %v3498_v10 = vpop.f32.mrf.mxu0 }
0x2627   : > { %v3501_v56 = vadd.f32 %v3498_v10, %v3314_v55 }
0x2632   : > { %v3625_v57 = vpop.f32.mrf.mxu0 }
0x2633   : > { %v3628_v58 = vsel %vm1427_vm6, %v3625_v57, -inf }
0x2634   : > { %3629 = vmax.xlane.f32.xlu2 %v3628_v58 }
0x26a7   : > { %v3630_v63 = vpop.xlane.xlu2 %3629 }
0x26a8   : > { %v3631_v6 = vsub.f32 %v3625_v57, %v3630_v63 }
0x26aa   : > { %v3632_v9 = vmul.f32 1.442695, %v3631_v6 }
0x26ac   : > { %4597 = vpow2.f32 %v3632_v9 }
0x26b2   : > { %v4598_v60 = vpop.eup %4597 }
0x26b3   : > { %v3634_v11 = vsel %vm1427_vm6, %v4598_v60, 0.0 }
0x26b4   : > { %3635 = vadd.xlane.f32.xlu0 %v3634_v11 }
0x2727   : > { %v3636_v12 = vpop.xlane.xlu0 %3635 }
0x2728   : > { %4599 = vrcp.f32 %v3636_v12 }
0x272e   : > { %v4600_v13 = vpop.eup %4599 }
0x272f   : > { %v3638_v14 = vmul.f32 %v4600_v13, %v4598_v60 }
0x2731   : > { %4385 = vmatmul.msk.f32.vlgmr.msrb.gmra.mxu1 %vm1427_vm6, %v3638_v14 }
0x27ae   : > { %v3659_v16 = vpop.f32.mrf.mxu1 }
0x27af   : > { %4387 = vmatmul.msk.f32.vlgmr.msra.gmra.mxu0 %vm625_vm1, %v3659_v16 }
0x282c   : > { %v3684_v17 = vpop.f32.mrf.mxu0 }
0x282d   : > { %v3687_v18 = vadd.f32 %v3684_v17, %v3501_v56  ;;  %v4524_v17 = vld [vmem:[%s6108_s13 + $0x5] ss:$0 sm:$0xff] }
0x282f   : > { %v3693_v0 = vadd.f32 %v4518_v2, %v3687_v18 }
0x2831   : > { %v3694_v19 = vadd.f32 %v3693_v0, %v5739_v48  ;;  %v4393_v48 = vld [vmem:[%s6103_s8 + $0x30] sm:$0xff] }
0x2832   : > { %3755 = vmatpush.msra.mxu1 %v4393_v48 }
0x2833   : > { %v3695_v20 = vsel %vm551_vm0, %v3694_v19, 0.0 }
0x2834   : > { %3696 = vadd.xlane.f32.xlu1 %v3695_v20  ;;  %3756 = vmatpush.msra.mxu1 %v4392_v28 }
0x2836   : > { %3757 = vmatpush.msra.mxu1 %v4391_v29 }
0x28a7   : > { %v3697_v21 = vpop.xlane.xlu1 %3696 }
0x28a8   : > { %v3698_v22 = vmul.f32 %v3697_v21, %v5071_v33 }
0x28aa   : > { %v3699_v23 = vsub.f32 %v3694_v19, %v3698_v22 }
0x28ac   : > { %v3700_v24 = vmul.f32 %v3699_v23, %v3699_v23 }
0x28ae   : > { %v3701_v26 = vsel %vm551_vm0, %v3700_v24, 0.0 }
0x28af   : > { %3702 = vadd.xlane.f32.xlu2 %v3701_v26 }
0x2922   : > { %v3703_v4 = vpop.xlane.xlu2 %3702 }
0x2923   : > { %v3704_v31 = vmul.f32 %v3703_v4, %v5071_v33 }
0x2925   : > { %v3705_v47 = vadd.f32 1e-05, %v3704_v31  ;;  %v4525_v31 = vld [vmem:[%s6107_s12 + $0x6] ss:$0 sm:$0xff] }
0x2927   : > { %4601 = vrsqrt.f32 %v3705_v47  ;;  %vm3712_vm3 = vweird.f32 %v3705_v47 }
0x292d   : > { %v4602_v32 = vpop.eup %4601 }
0x292e   : > { %v3707_v34 = vmul.f32 %v4602_v32, %v3705_v47  ;;  %vm3713_vm1 = vweird.f32 %v4602_v32  ;;  %v4526_v47 = vld [vmem:[%s6108_s13 + $0x6] ss:$0 sm:$0xff] }
0x292f   : > { %vm3714_vm4 = vmor %vm3712_vm3, %vm3713_vm1 }
0x2930   : > { %v3708_v35 = vmul.f32 %v4602_v32, %v3707_v34 }
0x2932   : > { %v3709_v36 = vmul.f32 0.5, %v3708_v35 }
0x2934   : > { %v3710_v37 = vsub.f32 1.5, %v3709_v36 }
0x2936   : > { %v3711_v8 = vmul.f32 %v4602_v32, %v3710_v37 }
0x2938   : > { %v3715_v39 = vsel %vm3714_vm4, %v4602_v32, %v3711_v8 }
0x2939   : > { %v3716_v42 = vmul.f32 %v3715_v39, %v3699_v23 }
0x293b   : > { %v3722_v43 = vmul.f32 %v4519_v38, %v3716_v42 }
0x293d   : > { %v3728_v46 = vadd.f32 %v4520_v40, %v3722_v43 }
0x293f   : > { %4396 = vmatmul.msk.f32.vlgmr.msra.gmra.mxu1 %vm551_vm0, %v3728_v46 }
0x29bc   : > { %v3759_v3 = vpop.f32.mrf.mxu1 }
0x29bd   : > { %v3760_v1 = vadd.f32 %v4521_v52, %v3759_v3 }
0x29bf   : > { %v3762_v53 = vmax.f32 %v3760_v1, 0.0 }
0x29c1   : > { %4406 = vmatmul.msk.f32.vlgmr.msra.gmra.mxu2 %vm2129_vm10, %v3762_v53 }
0x2a44   : > { %v3797_v55 = vpop.f32.mrf.mxu2 }
0x2a45   : > { %v3798_v10 = vadd.f32 %v4522_v54, %v3797_v55 }
0x2a47   : > { %v3800_v56 = vadd.f32 %v3798_v10, %v3728_v46 }
0x2a49   : > { %v3801_v57 = vsel %vm551_vm0, %v3800_v56, 0.0 }
0x2a4a   : > { %3802 = vadd.xlane.f32.xlu0 %v3801_v57 }
0x2abd   : > { %v3803_v58 = vpop.xlane.xlu0 %3802 }
0x2abe   : > { %v3804_v61 = vmul.f32 %v3803_v58, %v5071_v33 }
0x2ac0   : > { %v3805_v62 = vsub.f32 %v3800_v56, %v3804_v61 }
0x2ac2   : > { %v3806_v63 = vmul.f32 %v3805_v62, %v3805_v62 }
0x2ac4   : > { %v3807_v5 = vsel %vm551_vm0, %v3806_v63, 0.0 }
0x2ac5   : > { %3808 = vadd.xlane.f32.xlu1 %v3807_v5 }
0x2b38   : > { %v3809_v6 = vpop.xlane.xlu1 %3808 }
0x2b39   : > { %v3810_v59 = vmul.f32 %v3809_v6, %v5071_v33 }
0x2b3b   : > { %v3811_v7 = vadd.f32 1e-05, %v3810_v59 }
0x2b3d   : > { %4603 = vrsqrt.f32 %v3811_v7  ;;  %vm3818_vm6 = vweird.f32 %v3811_v7 }
0x2b43   : > { %v4604_v9 = vpop.eup %4603 }
0x2b44   : > { %v3813_v60 = vmul.f32 %v4604_v9, %v3811_v7  ;;  %vm3819_vm5 = vweird.f32 %v4604_v9 }
0x2b45   : > { %vm3820_vm7 = vmor %vm3818_vm6, %vm3819_vm5 }
0x2b46   : > { %v3814_v11 = vmul.f32 %v4604_v9, %v3813_v60 }
0x2b48   : > { %v3815_v12 = vmul.f32 0.5, %v3814_v11 }
0x2b4a   : > { %v3816_v13 = vsub.f32 1.5, %v3815_v12 }
0x2b4c   : > { %v3817_v14 = vmul.f32 %v4604_v9, %v3816_v13 }
0x2b4e   : > { %v3821_v16 = vsel %vm3820_vm7, %v4604_v9, %v3817_v14 }
0x2b4f   : > { %v3822_v2 = vmul.f32 %v3821_v16, %v3805_v62 }
0x2b51   : > { %v3828_v18 = vmul.f32 %v4523_v15, %v3822_v2 }
0x2b53   : > { %v3834_v0 = vadd.f32 %v4524_v17, %v3828_v18 }
0x2b55   : > { %v3835_v19 = vsel %vm551_vm0, %v3834_v0, 0.0 }
0x2b56   : > { %3836 = vadd.xlane.f32.xlu2 %v3835_v19 }
0x2bc9   : > { %v3837_v20 = vpop.xlane.xlu2 %3836 }
0x2bca   : > { %v3838_v21 = vmul.f32 %v3837_v20, %v5071_v33 }
0x2bcc   : > { %v3839_v22 = vsub.f32 %v3834_v0, %v3838_v21 }
0x2bce   : > { %v3840_v23 = vmul.f32 %v3839_v22, %v3839_v22 }
0x2bd0   : > { %v3841_v24 = vsel %vm551_vm0, %v3840_v23, 0.0 }
0x2bd1   : > { %3842 = vadd.xlane.f32.xlu0 %v3841_v24 }
0x2c44   : > { %v3843_v26 = vpop.xlane.xlu0 %3842 }
0x2c45   : > { %v3844_v27 = vmul.f32 %v3843_v26, %v5071_v33 }
0x2c47   : > { %v3845_v48 = vadd.f32 1e-05, %v3844_v27 }
0x2c49   : > { %4605 = vrsqrt.f32 %v3845_v48  ;;  %vm3852_vm9 = vweird.f32 %v3845_v48 }
0x2c4f   : > { %v4606_v28 = vpop.eup %4605 }
0x2c50   : > { %v3847_v29 = vmul.f32 %v4606_v28, %v3845_v48  ;;  %vm3853_vm8 = vweird.f32 %v4606_v28 }
0x2c51   : > { %vm3854_vm10 = vmor %vm3852_vm9, %vm3853_vm8 }
0x2c52   : > { %v3848_v41 = vmul.f32 %v4606_v28, %v3847_v29 }
0x2c54   : > { %v3849_v45 = vmul.f32 0.5, %v3848_v41 }
0x2c56   : > { %v3850_v30 = vsub.f32 1.5, %v3849_v45 }
0x2c58   : > { %v3851_v4 = vmul.f32 %v4606_v28, %v3850_v30 }
0x2c5a   : > { %v3855_v33 = vsel %vm3854_vm10, %v4606_v28, %v3851_v4 }
0x2c5b   : > { %v3856_v44 = vmul.f32 %v3855_v33, %v3839_v22 }
0x2c5d   : > { %v3862_v25 = vmul.f32 %v4525_v31, %v3856_v44 }
0x2c5f   : > { %v3868_v32 = vadd.f32 %v4526_v47, %v3862_v25 }
0x2c61   : > { %3869 = vst.msk [vmem:[%s501_s26] sm:$0xff] %vm551_vm0, %v3868_v32 }
0x2c62   : > { %4637 = shalt.err (!%p4634_p3)
}
0x2c63   : > { %4417 = dma.vmem_to_hbm [thread:$0]  (%p4788_p5), %s3884_s17, 128, %s3886_s3, %s3871_s15  }
0x2c64 PF: > { %p4423_p4 = scmp.ge.s32.totalorder %s4672_s16, 2  ;;  %s3897_s25 = sand.u32 1, %s4660_s29  }
0x2c65   : > { %s3898_s19 = scalar_lea.sflag [#allocation3], %s3897_s25 }
0x2c66   : > { %p4420_p7 = pnand %p4423_p4, %p4792_p6 }
0x2c68   : > { %p4421_p8 = pneg %p4420_p7 }
0x2c6a   : > { %4655 = dma.done.wait (%p4421_p8), %s3898_s19, 128  }
0x2c6b   : > { %4657 = vsyncadd (%p4421_p8), %s3898_s19, 4294967168  ;;  %s6125_s16 = sld [smem:[#allocation6_spill]]  ;;  %s6128_s29 = smov %s4664_s30 }
0x2c6c   : > { %s6126_s26 = sld [smem:[#allocation5_spill]] }
0x2c6d   : > { %s6127_s15 = sld [smem:[#allocation7_spill]] }
0x2c71   : > { %p24_p9 = scmp.ge.s32.totalorder %s6125_s16, 4  }
0x2c72   : > { %s6129_s30 = smov %s6126_s26 }
0x2c73   :  { %26 = sbr.rel (!%p24_p9) target bundleno = 6 (0x6), region = 248 }
0x2c78   :  { %3904 = vsyncpa [#allocation3], 1 }
0x2c79   :  { %3906 = vsyncpa [#allocation3 + $0x1], 1 }

</bundles_post_ra>
